<compile_context>
chip_gen: v5e
topology: v5e:2x2
jax: 0.10.0
libtpu: 0.0.40
codegen_flags: <defaults>
</compile_context>

<pallas_src>
import functools

import jax
import jax.numpy as jnp
from jax import lax
from jax.experimental import pallas as pl
from jax.experimental.pallas import tpu as pltpu


# dot_general dimension numbers (no explicit .T materialization):
_NN = (((1,), (0,)), ((), ()))   # [M,K] x [K,N] -> [M,N]
_NT = (((1,), (1,)), ((), ()))   # [M,K] x [N,K] -> [M,N]
_TN = (((0,), (0,)), ((), ()))   # [K,M] x [K,N] -> [M,N]

_BF16 = jnp.bfloat16
_F32 = jnp.float32


def _mm(a_bf, b_bf, dn):
    """bf16 x bf16 -> f32-accumulated MXU matmul (single pass)."""
    return lax.dot_general(a_bf, b_bf, dn, preferred_element_type=_F32)


# ----------------------------------------------------------------------------
# Fused Pallas kernel: per-task inner adaptation loop + query forward.
# One grid step processes `tasks_per_step` independent tasks (unrolled, so the
# LLO scheduler can interleave their MXU chains).
# ----------------------------------------------------------------------------
def _maml_fused_kernel(xs_ref, xq_ref, w1_ref, b1_ref, w2_ref, b2_ref, out_ref,
                       *, tasks_per_step, way, inner_iters, step_size,
                       inv_n_support, inv_temp):
    n_s = xs_ref.shape[1]
    shot = n_s // way

    # One-hot labels: label[r] = r % way (tile(arange(way), shot)), built as
    # pure iota comparisons (no constant input, no integer mod/div).
    row = lax.broadcasted_iota(jnp.int32, (n_s, way), 0)
    col = lax.broadcasted_iota(jnp.int32, (n_s, way), 1)
    y1h = jnp.zeros((n_s, way), _F32)
    for k in range(shot):
        y1h = y1h + (row - col == k * way).astype(_F32)

    # Shared initial parameters (same start for every task in the meta-batch).
    w1_0 = w1_ref[...]       # [D, H]  (pre-transposed nn.Linear weight)
    b1_0 = b1_ref[...]       # [1, H]
    w2_0 = w2_ref[...]       # [H, C]
    b2_0 = b2_ref[...]       # [1, C]

    for t in range(tasks_per_step):
        xs_b = xs_ref[t].astype(_BF16)   # [Ns, D]
        xq_b = xq_ref[t].astype(_BF16)   # [Nq, D]

        w1, b1, w2, b2 = w1_0, b1_0, w2_0, b2_0

        # Static unroll over the compile-time-constant inner iterations; all
        # adapted params stay as kernel-local values (vregs/VMEM).
        for _ in range(inner_iters):
            w1_b = w1.astype(_BF16)
            w2_b = w2.astype(_BF16)

            # ---- forward on support set ----
            pre = _mm(xs_b, w1_b, _NN) + b1          # [Ns, H] f32
            h = jnp.maximum(pre, 0.0)
            h_b = h.astype(_BF16)
            logits = _mm(h_b, w2_b, _NN) + b2        # [Ns, C] f32

            # ---- cross-entropy (mean reduction) gradient wrt logits ----
            m = jnp.max(logits, axis=-1, keepdims=True)
            e = jnp.exp(logits - m)
            p = e / jnp.sum(e, axis=-1, keepdims=True)   # exact division
            dlogits = (p - y1h) * inv_n_support          # [Ns, C] f32
            dlogits_b = dlogits.astype(_BF16)

            # ---- backward (first-order), gradients in the [D,H]/[H,C] layout ----
            dW2 = _mm(h_b, dlogits_b, _TN)               # [H, C]
            db2 = jnp.sum(dlogits, axis=0, keepdims=True)
            dh = _mm(dlogits_b, w2_b, _NT)               # [Ns, H]
            dpre = jnp.where(pre > 0.0, dh, 0.0)
            dpre_b = dpre.astype(_BF16)
            dW1 = _mm(xs_b, dpre_b, _TN)                 # [D, H]
            db1 = jnp.sum(dpre, axis=0, keepdims=True)

            # ---- SGD update (param - step_size * grad), f32 ----
            w1 = w1 - step_size * dW1
            b1 = b1 - step_size * db1
            w2 = w2 - step_size * dW2
            b2 = b2 - step_size * db2

        # ---- query forward with adapted params, scaled by 1/temperature ----
        pre_q = _mm(xq_b, w1.astype(_BF16), _NN) + b1
        h_q = jnp.maximum(pre_q, 0.0)
        logits_q = _mm(h_q.astype(_BF16), w2.astype(_BF16), _NN) + b2
        out_ref[t] = logits_q * inv_temp


# ----------------------------------------------------------------------------
# Wrapper: one jitted, task-batched pallas_call.
# ----------------------------------------------------------------------------
def build_maml_forward(args):
    """Mirrors MAML.forward with mode='test' / multi_stage=False.

    Accepts a single task (data_shot [Ns,D], data_query [Nq,D]) or a meta-batch
    of independent tasks (data_shot [B,Ns,D], data_query [B,Nq,D]) that all
    start from the same initial parameters.
    """
    way = int(args.way)
    inner_iters = int(args.inner_iters)
    step_size = float(args.gd_lr)
    inv_temp = 1.0 / float(args.temperature)

    @jax.jit
    def forward(data_shot, data_query, w1, b1, w2, b2):
        single = data_shot.ndim == 2
        if single:
            data_shot = data_shot[None]
            data_query = data_query[None]

        batch, n_s, d = data_shot.shape
        n_q = data_query.shape[1]
        hid = w1.shape[0]

        # One-time layout change in XLA so every in-kernel matmul is NN.
        w1t = w1.T        # [D, H]
        w2t = w2.T        # [H, C]

        tasks_per_step = next(t for t in (4, 2, 1) if batch % t == 0)
        grid = (batch // tasks_per_step,)

        kernel = functools.partial(
            _maml_fused_kernel,
            tasks_per_step=tasks_per_step,
            way=way,
            inner_iters=inner_iters,
            step_size=step_size,
            inv_n_support=1.0 / float(n_s),
            inv_temp=inv_temp,
        )

        # Advisory hint with the true (tiny) cost so XLA doesn't over-schedule
        # around the custom call.
        fwd_s = 2 * n_s * d * hid + 2 * n_s * hid * way
        bwd_s = 2 * hid * n_s * way + 2 * n_s * way * hid + 2 * d * n_s * hid
        fwd_q = 2 * n_q * d * hid + 2 * n_q * hid * way
        cost = pl.CostEstimate(
            flops=batch * (inner_iters * (fwd_s + bwd_s) + fwd_q),
            transcendentals=batch * inner_iters * n_s * way,
            bytes_accessed=4 * (batch * (n_s * d + n_q * d + n_q * way)
                                + d * hid + hid + hid * way + way),
        )

        logits = pl.pallas_call(
            kernel,
            out_shape=jax.ShapeDtypeStruct((batch, n_q, way), jnp.float32),
            grid=grid,
            in_specs=[
                pl.BlockSpec((tasks_per_step, n_s, d), lambda i: (i, 0, 0)),
                pl.BlockSpec((tasks_per_step, n_q, d), lambda i: (i, 0, 0)),
                pl.BlockSpec((d, hid), lambda i: (0, 0)),
                pl.BlockSpec((1, hid), lambda i: (0, 0)),
                pl.BlockSpec((hid, way), lambda i: (0, 0)),
                pl.BlockSpec((1, way), lambda i: (0, 0)),
            ],
            out_specs=pl.BlockSpec((tasks_per_step, n_q, way),
                                   lambda i: (i, 0, 0)),
            compiler_params=pltpu.CompilerParams(
                dimension_semantics=("parallel",)),
            cost_estimate=cost,
        )(data_shot, data_query, w1t, b1, w2t, b2)

        if single:
            logits = logits[0]
        # MAML.forward returns a one-element list in test / non-multi-stage mode.
        return [logits]

    return forward


# ----------------------------------------------------------------------------
# Args (mirrors the PyTorch args object)
# ----------------------------------------------------------------------------
class Args:
    way = 5
    shot = 1
    query = 3
    inner_iters = 2
    gd_lr = 0.1
    temperature = 0.5
    multi_stage = False


# ----------------------------------------------------------------------------
# References (per task, for correctness checks)
# ----------------------------------------------------------------------------
def _ref_task_bf16(xs, xq, w1t, b1, w2t, b2, args):
    """Pure-JAX mirror of the kernel math (bf16 operands, f32 accumulation)."""
    n_s = xs.shape[0]
    labels = jnp.arange(n_s) % args.way
    y1h = jax.nn.one_hot(labels, args.way, dtype=jnp.float32)
    xs_b = xs.astype(_BF16)
    xq_b = xq.astype(_BF16)
    w1, b1_, w2, b2_ = w1t, b1, w2t, b2
    for _ in range(args.inner_iters):
        w1_b = w1.astype(_BF16)
        w2_b = w2.astype(_BF16)
        pre = _mm(xs_b, w1_b, _NN) + b1_
        h = jnp.maximum(pre, 0.0)
        h_b = h.astype(_BF16)
        logits = _mm(h_b, w2_b, _NN) + b2_
        m = jnp.max(logits, axis=-1, keepdims=True)
        e = jnp.exp(logits - m)
        p = e / jnp.sum(e, axis=-1, keepdims=True)
        dlogits = (p - y1h) * (1.0 / n_s)
        dlogits_b = dlogits.astype(_BF16)
        dW2 = _mm(h_b, dlogits_b, _TN)
        db2 = jnp.sum(dlogits, axis=0, keepdims=True)
        dh = _mm(dlogits_b, w2_b, _NT)
        dpre = jnp.where(pre > 0.0, dh, 0.0)
        dpre_b = dpre.astype(_BF16)
        dW1 = _mm(xs_b, dpre_b, _TN)
        db1 = jnp.sum(dpre, axis=0, keepdims=True)
        w1 = w1 - args.gd_lr * dW1
        b1_ = b1_ - args.gd_lr * db1
        w2 = w2 - args.gd_lr * dW2
        b2_ = b2_ - args.gd_lr * db2
    pre_q = _mm(xq_b, w1.astype(_BF16), _NN) + b1_
    h_q = jnp.maximum(pre_q, 0.0)
    return (_mm(h_q.astype(_BF16), w2.astype(_BF16), _NN) + b2_) / args.temperature


def _ref_task_f32(xs, xq, params, args):
    """Full-f32 autodiff reference of the original first-order MAML forward."""
    n_s = xs.shape[0]
    labels = jnp.arange(n_s) % args.way

    def logits_fn(p, x):
        w1t, b1, w2t, b2 = p
        h = jnp.maximum(x @ w1t + b1, 0.0)
        return h @ w2t + b2

    def loss_fn(p):
        lg = logits_fn(p, xs)
        lp = jax.nn.log_softmax(lg, axis=-1)
        return -jnp.mean(lp[jnp.arange(n_s), labels])

    p = params
    for _ in range(args.inner_iters):
        g = jax.grad(loss_fn)(p)
        p = tuple(a - args.gd_lr * b for a, b in zip(p, g))
    return logits_fn(p, xq) / args.temperature


# ----------------------------------------------------------------------------
if __name__ == "__main__":
    args = Args()
    D, H = 64, 32                      # input feature dim, hidden dim
    B = 8                              # meta-batch of independent tasks

    key = jax.random.PRNGKey(0)
    k1, k2, k3, k4 = jax.random.split(key, 4)

    # Deterministic parameter init (nn.Linear-like scale), PyTorch layout.
    w1 = (jax.random.normal(k1, (H, D), jnp.float32) / jnp.sqrt(D)).astype(jnp.float32)
    b1 = jnp.zeros((1, H), jnp.float32)
    w2 = (jax.random.normal(k2, (args.way, H), jnp.float32) / jnp.sqrt(H)).astype(jnp.float32)
    b2 = jnp.zeros((1, args.way), jnp.float32)

    # Per-task support/query sets (support ordered to match labels arange(way)·shot).
    data_shot = jax.random.normal(k3, (B, args.way * args.shot, D), jnp.float32)
    data_query = jax.random.normal(k4, (B, args.way * args.query, D), jnp.float32)

    forward = build_maml_forward(args)
    out = forward(data_shot, data_query, w1, b1, w2, b2)
    out = [jax.block_until_ready(o) for o in out]
    logits = out[0]
    assert logits.shape == (B, args.way * args.query, args.way)

    # Single-task (2-D input) path — the original module's interface.
    out_single = forward(data_shot[0], data_query[0], w1, b1, w2, b2)
    out_single = [jax.block_until_ready(o) for o in out_single]
    assert out_single[0].shape == (args.way * args.query, args.way)
    assert jnp.allclose(out_single[0], logits[0], rtol=1e-5, atol=1e-5), \
        "single-task path mismatch vs batched path"

    # Correctness checks per task:
    #  * tight tolerance vs a pure-JAX mirror of the exact kernel math
    #    (bf16 matmul operands, f32 accumulation/updates);
    #  * loose tolerance vs a full-f32 autodiff reference — the delta is the
    #    expected bf16 operand quantization compounding over inner_iters.
    w1t, w2t = w1.T, w2.T
    for b in range(B):
        ref_mirror = _ref_task_bf16(data_shot[b], data_query[b], w1t, b1, w2t, b2, args)
        assert jnp.allclose(logits[b], ref_mirror, rtol=2e-3, atol=2e-3), \
            f"task {b}: mismatch vs bf16-mirrored JAX reference"
        ref_f32 = _ref_task_f32(data_shot[b], data_query[b], (w1t, b1, w2t, b2), args)
        assert jnp.allclose(logits[b], ref_f32, rtol=6e-2, atol=6e-2), \
            f"task {b}: mismatch vs f32 autodiff reference"

    print("KERNEL_OK")
</pallas_src>

<mosaic_0001>
module attributes {stable_mosaic.version = 11 : i64} {
  func.func @_maml_fused_kernel(%arg0: i32, %arg1: memref<4x5x64xf32, #tpu.memory_space<vmem>>, %arg2: memref<4x15x64xf32, #tpu.memory_space<vmem>>, %arg3: memref<64x32xf32, #tpu.memory_space<vmem>>, %arg4: memref<1x32xf32, #tpu.memory_space<vmem>>, %arg5: memref<32x5xf32, #tpu.memory_space<vmem>>, %arg6: memref<1x5xf32, #tpu.memory_space<vmem>>, %arg7: memref<4x15x5xf32, #tpu.memory_space<vmem>>) attributes {dimension_semantics = [#tpu.dimension_semantics<parallel>], iteration_bounds = array<i64: 2>, scalar_prefetch = 0 : i64, scratch_operands = 0 : i64, tpu.core_type = #tpu.core_type<tc>, window_params = [{transform_indices = @transform_0, window_bounds = array<i64: 4, 5, 64>}, {transform_indices = @transform_1, window_bounds = array<i64: 4, 15, 64>}, {pipeline_mode = #tpu.pipeline_mode<synchronous>, transform_indices = @transform_2, window_bounds = array<i64: 64, 32>}, {pipeline_mode = #tpu.pipeline_mode<synchronous>, transform_indices = @transform_3, window_bounds = array<i64: 1, 32>}, {pipeline_mode = #tpu.pipeline_mode<synchronous>, transform_indices = @transform_4, window_bounds = array<i64: 32, 5>}, {pipeline_mode = #tpu.pipeline_mode<synchronous>, transform_indices = @transform_5, window_bounds = array<i64: 1, 5>}, {transform_indices = @transform_6, window_bounds = array<i64: 4, 15, 5>}]} {
    %0 = tpu.iota {dimensions = array<i32: 0>} : vector<5x5xi32>
    %1 = tpu.iota {dimensions = array<i32: 1>} : vector<5x5xi32>
    %cst = arith.constant 0.000000e+00 : f32
    %2 = vector.broadcast %cst : f32 to vector<5x5xf32>
    %3 = arith.subi %0, %1 : vector<5x5xi32>
    %c0_i32 = arith.constant 0 : i32
    %4 = vector.broadcast %c0_i32 : i32 to vector<5x5xi32>
    %5 = arith.cmpi eq, %3, %4 : vector<5x5xi32>
    %6 = arith.extui %5 : vector<5x5xi1> to vector<5x5xi32>
    %7 = arith.sitofp %6 : vector<5x5xi32> to vector<5x5xf32>
    %8 = arith.addf %2, %7 : vector<5x5xf32>
    %c0 = arith.constant 0 : index
    %c0_0 = arith.constant 0 : index
    %9 = vector.load %arg3[%c0, %c0_0] : memref<64x32xf32, #tpu.memory_space<vmem>>, vector<64x32xf32>
    %c0_1 = arith.constant 0 : index
    %c0_2 = arith.constant 0 : index
    %10 = vector.load %arg4[%c0_1, %c0_2] : memref<1x32xf32, #tpu.memory_space<vmem>>, vector<1x32xf32>
    %c0_3 = arith.constant 0 : index
    %c0_4 = arith.constant 0 : index
    %11 = vector.load %arg5[%c0_3, %c0_4] : memref<32x5xf32, #tpu.memory_space<vmem>>, vector<32x5xf32>
    %c0_5 = arith.constant 0 : index
    %c0_6 = arith.constant 0 : index
    %12 = vector.load %arg6[%c0_5, %c0_6] : memref<1x5xf32, #tpu.memory_space<vmem>>, vector<1x5xf32>
    %c0_7 = arith.constant 0 : index
    %c0_8 = arith.constant 0 : index
    %c0_9 = arith.constant 0 : index
    %13 = vector.load %arg1[%c0_7, %c0_8, %c0_9] : memref<4x5x64xf32, #tpu.memory_space<vmem>>, vector<1x5x64xf32>
    %14 = vector.shape_cast %13 : vector<1x5x64xf32> to vector<5x64xf32>
    %15 = arith.truncf %14 : vector<5x64xf32> to vector<5x64xbf16>
    %c0_10 = arith.constant 0 : index
    %c0_11 = arith.constant 0 : index
    %c0_12 = arith.constant 0 : index
    %16 = vector.load %arg2[%c0_10, %c0_11, %c0_12] : memref<4x15x64xf32, #tpu.memory_space<vmem>>, vector<1x15x64xf32>
    %17 = vector.shape_cast %16 : vector<1x15x64xf32> to vector<15x64xf32>
    %18 = arith.truncf %17 : vector<15x64xf32> to vector<15x64xbf16>
    %19 = arith.truncf %9 : vector<64x32xf32> to vector<64x32xbf16>
    %20 = arith.truncf %11 : vector<32x5xf32> to vector<32x5xbf16>
    %cst_13 = arith.constant dense<0.000000e+00> : vector<5x32xf32>
    %21 = tpu.matmul %15, %19, %cst_13 {dimension_numbers = #tpu.dot_dimension_numbers<[1], [0], [0], [1], [0, 0, 1, 1], [], []>} : vector<5x64xbf16>, vector<64x32xbf16>, vector<5x32xf32> -> vector<5x32xf32>
    %22 = vector.broadcast %10 : vector<1x32xf32> to vector<5x32xf32>
    %23 = arith.addf %21, %22 : vector<5x32xf32>
    %cst_14 = arith.constant 0.000000e+00 : f32
    %24 = vector.broadcast %cst_14 : f32 to vector<5x32xf32>
    %25 = arith.maximumf %23, %24 : vector<5x32xf32>
    %26 = arith.truncf %25 : vector<5x32xf32> to vector<5x32xbf16>
    %cst_15 = arith.constant dense<0.000000e+00> : vector<5x5xf32>
    %27 = tpu.matmul %26, %20, %cst_15 {dimension_numbers = #tpu.dot_dimension_numbers<[1], [0], [0], [1], [0, 0, 1, 1], [], []>} : vector<5x32xbf16>, vector<32x5xbf16>, vector<5x5xf32> -> vector<5x5xf32>
    %28 = vector.broadcast %12 : vector<1x5xf32> to vector<5x5xf32>
    %29 = arith.addf %27, %28 : vector<5x5xf32>
    %cst_16 = arith.constant dense<0xFF800000> : vector<5xf32>
    %30 = vector.multi_reduction <maximumf>, %29, %cst_16 [1] : vector<5x5xf32> to vector<5xf32>
    %31 = vector.shape_cast %30 : vector<5xf32> to vector<5x1xf32>
    %32 = vector.broadcast %31 : vector<5x1xf32> to vector<5x5xf32>
    %33 = arith.subf %29, %32 : vector<5x5xf32>
    %34 = math.exp %33 : vector<5x5xf32>
    %cst_17 = arith.constant dense<0.000000e+00> : vector<5xf32>
    %35 = vector.multi_reduction <add>, %34, %cst_17 [1] : vector<5x5xf32> to vector<5xf32>
    %36 = vector.shape_cast %35 : vector<5xf32> to vector<5x1xf32>
    %37 = vector.broadcast %36 : vector<5x1xf32> to vector<5x5xf32>
    %38 = arith.divf %34, %37 : vector<5x5xf32>
    %39 = arith.subf %38, %8 : vector<5x5xf32>
    %cst_18 = arith.constant 2.000000e-01 : f32
    %40 = vector.broadcast %cst_18 : f32 to vector<5x5xf32>
    %41 = arith.mulf %39, %40 : vector<5x5xf32>
    %42 = arith.truncf %41 : vector<5x5xf32> to vector<5x5xbf16>
    %cst_19 = arith.constant dense<0.000000e+00> : vector<32x5xf32>
    %43 = tpu.matmul %26, %42, %cst_19 {dimension_numbers = #tpu.dot_dimension_numbers<[0], [0], [1], [1], [0, 1, 1, 1], [], []>} : vector<5x32xbf16>, vector<5x5xbf16>, vector<32x5xf32> -> vector<32x5xf32>
    %cst_20 = arith.constant dense<0.000000e+00> : vector<5xf32>
    %44 = vector.multi_reduction <add>, %41, %cst_20 [0] : vector<5x5xf32> to vector<5xf32>
    %45 = vector.shape_cast %44 : vector<5xf32> to vector<1x5xf32>
    %cst_21 = arith.constant dense<0.000000e+00> : vector<5x32xf32>
    %46 = tpu.matmul %42, %20, %cst_21 {dimension_numbers = #tpu.dot_dimension_numbers<[1], [1], [0], [0], [0, 0, 1, 0], [], []>} : vector<5x5xbf16>, vector<32x5xbf16>, vector<5x32xf32> -> vector<5x32xf32>
    %cst_22 = arith.constant 0.000000e+00 : f32
    %47 = vector.broadcast %cst_22 : f32 to vector<5x32xf32>
    %48 = arith.cmpf ogt, %23, %47 : vector<5x32xf32>
    %cst_23 = arith.constant 0.000000e+00 : f32
    %49 = vector.broadcast %cst_23 : f32 to vector<5x32xf32>
    %50 = arith.select %48, %46, %49 : vector<5x32xi1>, vector<5x32xf32>
    %51 = arith.truncf %50 : vector<5x32xf32> to vector<5x32xbf16>
    %cst_24 = arith.constant dense<0.000000e+00> : vector<64x32xf32>
    %52 = tpu.matmul %15, %51, %cst_24 {dimension_numbers = #tpu.dot_dimension_numbers<[0], [0], [1], [1], [0, 1, 1, 1], [], []>} : vector<5x64xbf16>, vector<5x32xbf16>, vector<64x32xf32> -> vector<64x32xf32>
    %cst_25 = arith.constant dense<0.000000e+00> : vector<32xf32>
    %53 = vector.multi_reduction <add>, %50, %cst_25 [0] : vector<5x32xf32> to vector<32xf32>
    %54 = vector.shape_cast %53 : vector<32xf32> to vector<1x32xf32>
    %cst_26 = arith.constant 1.000000e-01 : f32
    %55 = vector.broadcast %cst_26 : f32 to vector<64x32xf32>
    %56 = arith.mulf %55, %52 : vector<64x32xf32>
    %57 = arith.subf %9, %56 : vector<64x32xf32>
    %cst_27 = arith.constant 1.000000e-01 : f32
    %58 = vector.broadcast %cst_27 : f32 to vector<1x32xf32>
    %59 = arith.mulf %58, %54 : vector<1x32xf32>
    %60 = arith.subf %10, %59 : vector<1x32xf32>
    %cst_28 = arith.constant 1.000000e-01 : f32
    %61 = vector.broadcast %cst_28 : f32 to vector<32x5xf32>
    %62 = arith.mulf %61, %43 : vector<32x5xf32>
    %63 = arith.subf %11, %62 : vector<32x5xf32>
    %cst_29 = arith.constant 1.000000e-01 : f32
    %64 = vector.broadcast %cst_29 : f32 to vector<1x5xf32>
    %65 = arith.mulf %64, %45 : vector<1x5xf32>
    %66 = arith.subf %12, %65 : vector<1x5xf32>
    %67 = arith.truncf %57 : vector<64x32xf32> to vector<64x32xbf16>
    %68 = arith.truncf %63 : vector<32x5xf32> to vector<32x5xbf16>
    %cst_30 = arith.constant dense<0.000000e+00> : vector<5x32xf32>
    %69 = tpu.matmul %15, %67, %cst_30 {dimension_numbers = #tpu.dot_dimension_numbers<[1], [0], [0], [1], [0, 0, 1, 1], [], []>} : vector<5x64xbf16>, vector<64x32xbf16>, vector<5x32xf32> -> vector<5x32xf32>
    %70 = vector.broadcast %60 : vector<1x32xf32> to vector<5x32xf32>
    %71 = arith.addf %69, %70 : vector<5x32xf32>
    %cst_31 = arith.constant 0.000000e+00 : f32
    %72 = vector.broadcast %cst_31 : f32 to vector<5x32xf32>
    %73 = arith.maximumf %71, %72 : vector<5x32xf32>
    %74 = arith.truncf %73 : vector<5x32xf32> to vector<5x32xbf16>
    %cst_32 = arith.constant dense<0.000000e+00> : vector<5x5xf32>
    %75 = tpu.matmul %74, %68, %cst_32 {dimension_numbers = #tpu.dot_dimension_numbers<[1], [0], [0], [1], [0, 0, 1, 1], [], []>} : vector<5x32xbf16>, vector<32x5xbf16>, vector<5x5xf32> -> vector<5x5xf32>
    %76 = vector.broadcast %66 : vector<1x5xf32> to vector<5x5xf32>
    %77 = arith.addf %75, %76 : vector<5x5xf32>
    %cst_33 = arith.constant dense<0xFF800000> : vector<5xf32>
    %78 = vector.multi_reduction <maximumf>, %77, %cst_33 [1] : vector<5x5xf32> to vector<5xf32>
    %79 = vector.shape_cast %78 : vector<5xf32> to vector<5x1xf32>
    %80 = vector.broadcast %79 : vector<5x1xf32> to vector<5x5xf32>
    %81 = arith.subf %77, %80 : vector<5x5xf32>
    %82 = math.exp %81 : vector<5x5xf32>
    %cst_34 = arith.constant dense<0.000000e+00> : vector<5xf32>
    %83 = vector.multi_reduction <add>, %82, %cst_34 [1] : vector<5x5xf32> to vector<5xf32>
    %84 = vector.shape_cast %83 : vector<5xf32> to vector<5x1xf32>
    %85 = vector.broadcast %84 : vector<5x1xf32> to vector<5x5xf32>
    %86 = arith.divf %82, %85 : vector<5x5xf32>
    %87 = arith.subf %86, %8 : vector<5x5xf32>
    %cst_35 = arith.constant 2.000000e-01 : f32
    %88 = vector.broadcast %cst_35 : f32 to vector<5x5xf32>
    %89 = arith.mulf %87, %88 : vector<5x5xf32>
    %90 = arith.truncf %89 : vector<5x5xf32> to vector<5x5xbf16>
    %cst_36 = arith.constant dense<0.000000e+00> : vector<32x5xf32>
    %91 = tpu.matmul %74, %90, %cst_36 {dimension_numbers = #tpu.dot_dimension_numbers<[0], [0], [1], [1], [0, 1, 1, 1], [], []>} : vector<5x32xbf16>, vector<5x5xbf16>, vector<32x5xf32> -> vector<32x5xf32>
    %cst_37 = arith.constant dense<0.000000e+00> : vector<5xf32>
    %92 = vector.multi_reduction <add>, %89, %cst_37 [0] : vector<5x5xf32> to vector<5xf32>
    %93 = vector.shape_cast %92 : vector<5xf32> to vector<1x5xf32>
    %cst_38 = arith.constant dense<0.000000e+00> : vector<5x32xf32>
    %94 = tpu.matmul %90, %68, %cst_38 {dimension_numbers = #tpu.dot_dimension_numbers<[1], [1], [0], [0], [0, 0, 1, 0], [], []>} : vector<5x5xbf16>, vector<32x5xbf16>, vector<5x32xf32> -> vector<5x32xf32>
    %cst_39 = arith.constant 0.000000e+00 : f32
    %95 = vector.broadcast %cst_39 : f32 to vector<5x32xf32>
    %96 = arith.cmpf ogt, %71, %95 : vector<5x32xf32>
    %cst_40 = arith.constant 0.000000e+00 : f32
    %97 = vector.broadcast %cst_40 : f32 to vector<5x32xf32>
    %98 = arith.select %96, %94, %97 : vector<5x32xi1>, vector<5x32xf32>
    %99 = arith.truncf %98 : vector<5x32xf32> to vector<5x32xbf16>
    %cst_41 = arith.constant dense<0.000000e+00> : vector<64x32xf32>
    %100 = tpu.matmul %15, %99, %cst_41 {dimension_numbers = #tpu.dot_dimension_numbers<[0], [0], [1], [1], [0, 1, 1, 1], [], []>} : vector<5x64xbf16>, vector<5x32xbf16>, vector<64x32xf32> -> vector<64x32xf32>
    %cst_42 = arith.constant dense<0.000000e+00> : vector<32xf32>
    %101 = vector.multi_reduction <add>, %98, %cst_42 [0] : vector<5x32xf32> to vector<32xf32>
    %102 = vector.shape_cast %101 : vector<32xf32> to vector<1x32xf32>
    %cst_43 = arith.constant 1.000000e-01 : f32
    %103 = vector.broadcast %cst_43 : f32 to vector<64x32xf32>
    %104 = arith.mulf %103, %100 : vector<64x32xf32>
    %105 = arith.subf %57, %104 : vector<64x32xf32>
    %cst_44 = arith.constant 1.000000e-01 : f32
    %106 = vector.broadcast %cst_44 : f32 to vector<1x32xf32>
    %107 = arith.mulf %106, %102 : vector<1x32xf32>
    %108 = arith.subf %60, %107 : vector<1x32xf32>
    %cst_45 = arith.constant 1.000000e-01 : f32
    %109 = vector.broadcast %cst_45 : f32 to vector<32x5xf32>
    %110 = arith.mulf %109, %91 : vector<32x5xf32>
    %111 = arith.subf %63, %110 : vector<32x5xf32>
    %cst_46 = arith.constant 1.000000e-01 : f32
    %112 = vector.broadcast %cst_46 : f32 to vector<1x5xf32>
    %113 = arith.mulf %112, %93 : vector<1x5xf32>
    %114 = arith.subf %66, %113 : vector<1x5xf32>
    %115 = arith.truncf %105 : vector<64x32xf32> to vector<64x32xbf16>
    %cst_47 = arith.constant dense<0.000000e+00> : vector<15x32xf32>
    %116 = tpu.matmul %18, %115, %cst_47 {dimension_numbers = #tpu.dot_dimension_numbers<[1], [0], [0], [1], [0, 0, 1, 1], [], []>} : vector<15x64xbf16>, vector<64x32xbf16>, vector<15x32xf32> -> vector<15x32xf32>
    %117 = vector.broadcast %108 : vector<1x32xf32> to vector<15x32xf32>
    %118 = arith.addf %116, %117 : vector<15x32xf32>
    %cst_48 = arith.constant 0.000000e+00 : f32
    %119 = vector.broadcast %cst_48 : f32 to vector<15x32xf32>
    %120 = arith.maximumf %118, %119 : vector<15x32xf32>
    %121 = arith.truncf %120 : vector<15x32xf32> to vector<15x32xbf16>
    %122 = arith.truncf %111 : vector<32x5xf32> to vector<32x5xbf16>
    %cst_49 = arith.constant dense<0.000000e+00> : vector<15x5xf32>
    %123 = tpu.matmul %121, %122, %cst_49 {dimension_numbers = #tpu.dot_dimension_numbers<[1], [0], [0], [1], [0, 0, 1, 1], [], []>} : vector<15x32xbf16>, vector<32x5xbf16>, vector<15x5xf32> -> vector<15x5xf32>
    %124 = vector.broadcast %114 : vector<1x5xf32> to vector<15x5xf32>
    %125 = arith.addf %123, %124 : vector<15x5xf32>
    %cst_50 = arith.constant 2.000000e+00 : f32
    %126 = vector.broadcast %cst_50 : f32 to vector<15x5xf32>
    %127 = arith.mulf %125, %126 : vector<15x5xf32>
    %c0_51 = arith.constant 0 : index
    %c0_52 = arith.constant 0 : index
    %c0_53 = arith.constant 0 : index
    %128 = vector.load %arg7[%c0_51, %c0_52, %c0_53] : memref<4x15x5xf32, #tpu.memory_space<vmem>>, vector<1x15x5xf32>
    %129 = vector.shape_cast %128 : vector<1x15x5xf32> to vector<15x5xf32>
    %130 = vector.shape_cast %127 : vector<15x5xf32> to vector<1x15x5xf32>
    tpu.vector_store %arg7[%c0_51, %c0_52, %c0_53], %130 {strides = array<i32>} : memref<4x15x5xf32, #tpu.memory_space<vmem>>, vector<1x15x5xf32>,
    %c1 = arith.constant 1 : index
    %c0_54 = arith.constant 0 : index
    %c0_55 = arith.constant 0 : index
    %131 = vector.load %arg1[%c1, %c0_54, %c0_55] : memref<4x5x64xf32, #tpu.memory_space<vmem>>, vector<1x5x64xf32>
    %132 = vector.shape_cast %131 : vector<1x5x64xf32> to vector<5x64xf32>
    %133 = arith.truncf %132 : vector<5x64xf32> to vector<5x64xbf16>
    %c1_56 = arith.constant 1 : index
    %c0_57 = arith.constant 0 : index
    %c0_58 = arith.constant 0 : index
    %134 = vector.load %arg2[%c1_56, %c0_57, %c0_58] : memref<4x15x64xf32, #tpu.memory_space<vmem>>, vector<1x15x64xf32>
    %135 = vector.shape_cast %134 : vector<1x15x64xf32> to vector<15x64xf32>
    %136 = arith.truncf %135 : vector<15x64xf32> to vector<15x64xbf16>
    %137 = arith.truncf %9 : vector<64x32xf32> to vector<64x32xbf16>
    %138 = arith.truncf %11 : vector<32x5xf32> to vector<32x5xbf16>
    %cst_59 = arith.constant dense<0.000000e+00> : vector<5x32xf32>
    %139 = tpu.matmul %133, %137, %cst_59 {dimension_numbers = #tpu.dot_dimension_numbers<[1], [0], [0], [1], [0, 0, 1, 1], [], []>} : vector<5x64xbf16>, vector<64x32xbf16>, vector<5x32xf32> -> vector<5x32xf32>
    %140 = vector.broadcast %10 : vector<1x32xf32> to vector<5x32xf32>
    %141 = arith.addf %139, %140 : vector<5x32xf32>
    %cst_60 = arith.constant 0.000000e+00 : f32
    %142 = vector.broadcast %cst_60 : f32 to vector<5x32xf32>
    %143 = arith.maximumf %141, %142 : vector<5x32xf32>
    %144 = arith.truncf %143 : vector<5x32xf32> to vector<5x32xbf16>
    %cst_61 = arith.constant dense<0.000000e+00> : vector<5x5xf32>
    %145 = tpu.matmul %144, %138, %cst_61 {dimension_numbers = #tpu.dot_dimension_numbers<[1], [0], [0], [1], [0, 0, 1, 1], [], []>} : vector<5x32xbf16>, vector<32x5xbf16>, vector<5x5xf32> -> vector<5x5xf32>
    %146 = vector.broadcast %12 : vector<1x5xf32> to vector<5x5xf32>
    %147 = arith.addf %145, %146 : vector<5x5xf32>
    %cst_62 = arith.constant dense<0xFF800000> : vector<5xf32>
    %148 = vector.multi_reduction <maximumf>, %147, %cst_62 [1] : vector<5x5xf32> to vector<5xf32>
    %149 = vector.shape_cast %148 : vector<5xf32> to vector<5x1xf32>
    %150 = vector.broadcast %149 : vector<5x1xf32> to vector<5x5xf32>
    %151 = arith.subf %147, %150 : vector<5x5xf32>
    %152 = math.exp %151 : vector<5x5xf32>
    %cst_63 = arith.constant dense<0.000000e+00> : vector<5xf32>
    %153 = vector.multi_reduction <add>, %152, %cst_63 [1] : vector<5x5xf32> to vector<5xf32>
    %154 = vector.shape_cast %153 : vector<5xf32> to vector<5x1xf32>
    %155 = vector.broadcast %154 : vector<5x1xf32> to vector<5x5xf32>
    %156 = arith.divf %152, %155 : vector<5x5xf32>
    %157 = arith.subf %156, %8 : vector<5x5xf32>
    %cst_64 = arith.constant 2.000000e-01 : f32
    %158 = vector.broadcast %cst_64 : f32 to vector<5x5xf32>
    %159 = arith.mulf %157, %158 : vector<5x5xf32>
    %160 = arith.truncf %159 : vector<5x5xf32> to vector<5x5xbf16>
    %cst_65 = arith.constant dense<0.000000e+00> : vector<32x5xf32>
    %161 = tpu.matmul %144, %160, %cst_65 {dimension_numbers = #tpu.dot_dimension_numbers<[0], [0], [1], [1], [0, 1, 1, 1], [], []>} : vector<5x32xbf16>, vector<5x5xbf16>, vector<32x5xf32> -> vector<32x5xf32>
    %cst_66 = arith.constant dense<0.000000e+00> : vector<5xf32>
    %162 = vector.multi_reduction <add>, %159, %cst_66 [0] : vector<5x5xf32> to vector<5xf32>
    %163 = vector.shape_cast %162 : vector<5xf32> to vector<1x5xf32>
    %cst_67 = arith.constant dense<0.000000e+00> : vector<5x32xf32>
    %164 = tpu.matmul %160, %138, %cst_67 {dimension_numbers = #tpu.dot_dimension_numbers<[1], [1], [0], [0], [0, 0, 1, 0], [], []>} : vector<5x5xbf16>, vector<32x5xbf16>, vector<5x32xf32> -> vector<5x32xf32>
    %cst_68 = arith.constant 0.000000e+00 : f32
    %165 = vector.broadcast %cst_68 : f32 to vector<5x32xf32>
    %166 = arith.cmpf ogt, %141, %165 : vector<5x32xf32>
    %cst_69 = arith.constant 0.000000e+00 : f32
    %167 = vector.broadcast %cst_69 : f32 to vector<5x32xf32>
    %168 = arith.select %166, %164, %167 : vector<5x32xi1>, vector<5x32xf32>
    %169 = arith.truncf %168 : vector<5x32xf32> to vector<5x32xbf16>
    %cst_70 = arith.constant dense<0.000000e+00> : vector<64x32xf32>
    %170 = tpu.matmul %133, %169, %cst_70 {dimension_numbers = #tpu.dot_dimension_numbers<[0], [0], [1], [1], [0, 1, 1, 1], [], []>} : vector<5x64xbf16>, vector<5x32xbf16>, vector<64x32xf32> -> vector<64x32xf32>
    %cst_71 = arith.constant dense<0.000000e+00> : vector<32xf32>
    %171 = vector.multi_reduction <add>, %168, %cst_71 [0] : vector<5x32xf32> to vector<32xf32>
    %172 = vector.shape_cast %171 : vector<32xf32> to vector<1x32xf32>
    %cst_72 = arith.constant 1.000000e-01 : f32
    %173 = vector.broadcast %cst_72 : f32 to vector<64x32xf32>
    %174 = arith.mulf %173, %170 : vector<64x32xf32>
    %175 = arith.subf %9, %174 : vector<64x32xf32>
    %cst_73 = arith.constant 1.000000e-01 : f32
    %176 = vector.broadcast %cst_73 : f32 to vector<1x32xf32>
    %177 = arith.mulf %176, %172 : vector<1x32xf32>
    %178 = arith.subf %10, %177 : vector<1x32xf32>
    %cst_74 = arith.constant 1.000000e-01 : f32
    %179 = vector.broadcast %cst_74 : f32 to vector<32x5xf32>
    %180 = arith.mulf %179, %161 : vector<32x5xf32>
    %181 = arith.subf %11, %180 : vector<32x5xf32>
    %cst_75 = arith.constant 1.000000e-01 : f32
    %182 = vector.broadcast %cst_75 : f32 to vector<1x5xf32>
    %183 = arith.mulf %182, %163 : vector<1x5xf32>
    %184 = arith.subf %12, %183 : vector<1x5xf32>
    %185 = arith.truncf %175 : vector<64x32xf32> to vector<64x32xbf16>
    %186 = arith.truncf %181 : vector<32x5xf32> to vector<32x5xbf16>
    %cst_76 = arith.constant dense<0.000000e+00> : vector<5x32xf32>
    %187 = tpu.matmul %133, %185, %cst_76 {dimension_numbers = #tpu.dot_dimension_numbers<[1], [0], [0], [1], [0, 0, 1, 1], [], []>} : vector<5x64xbf16>, vector<64x32xbf16>, vector<5x32xf32> -> vector<5x32xf32>
    %188 = vector.broadcast %178 : vector<1x32xf32> to vector<5x32xf32>
    %189 = arith.addf %187, %188 : vector<5x32xf32>
    %cst_77 = arith.constant 0.000000e+00 : f32
    %190 = vector.broadcast %cst_77 : f32 to vector<5x32xf32>
    %191 = arith.maximumf %189, %190 : vector<5x32xf32>
    %192 = arith.truncf %191 : vector<5x32xf32> to vector<5x32xbf16>
    %cst_78 = arith.constant dense<0.000000e+00> : vector<5x5xf32>
    %193 = tpu.matmul %192, %186, %cst_78 {dimension_numbers = #tpu.dot_dimension_numbers<[1], [0], [0], [1], [0, 0, 1, 1], [], []>} : vector<5x32xbf16>, vector<32x5xbf16>, vector<5x5xf32> -> vector<5x5xf32>
    %194 = vector.broadcast %184 : vector<1x5xf32> to vector<5x5xf32>
    %195 = arith.addf %193, %194 : vector<5x5xf32>
    %cst_79 = arith.constant dense<0xFF800000> : vector<5xf32>
    %196 = vector.multi_reduction <maximumf>, %195, %cst_79 [1] : vector<5x5xf32> to vector<5xf32>
    %197 = vector.shape_cast %196 : vector<5xf32> to vector<5x1xf32>
    %198 = vector.broadcast %197 : vector<5x1xf32> to vector<5x5xf32>
    %199 = arith.subf %195, %198 : vector<5x5xf32>
    %200 = math.exp %199 : vector<5x5xf32>
    %cst_80 = arith.constant dense<0.000000e+00> : vector<5xf32>
    %201 = vector.multi_reduction <add>, %200, %cst_80 [1] : vector<5x5xf32> to vector<5xf32>
    %202 = vector.shape_cast %201 : vector<5xf32> to vector<5x1xf32>
    %203 = vector.broadcast %202 : vector<5x1xf32> to vector<5x5xf32>
    %204 = arith.divf %200, %203 : vector<5x5xf32>
    %205 = arith.subf %204, %8 : vector<5x5xf32>
    %cst_81 = arith.constant 2.000000e-01 : f32
    %206 = vector.broadcast %cst_81 : f32 to vector<5x5xf32>
    %207 = arith.mulf %205, %206 : vector<5x5xf32>
    %208 = arith.truncf %207 : vector<5x5xf32> to vector<5x5xbf16>
    %cst_82 = arith.constant dense<0.000000e+00> : vector<32x5xf32>
    %209 = tpu.matmul %192, %208, %cst_82 {dimension_numbers = #tpu.dot_dimension_numbers<[0], [0], [1], [1], [0, 1, 1, 1], [], []>} : vector<5x32xbf16>, vector<5x5xbf16>, vector<32x5xf32> -> vector<32x5xf32>
    %cst_83 = arith.constant dense<0.000000e+00> : vector<5xf32>
    %210 = vector.multi_reduction <add>, %207, %cst_83 [0] : vector<5x5xf32> to vector<5xf32>
    %211 = vector.shape_cast %210 : vector<5xf32> to vector<1x5xf32>
    %cst_84 = arith.constant dense<0.000000e+00> : vector<5x32xf32>
    %212 = tpu.matmul %208, %186, %cst_84 {dimension_numbers = #tpu.dot_dimension_numbers<[1], [1], [0], [0], [0, 0, 1, 0], [], []>} : vector<5x5xbf16>, vector<32x5xbf16>, vector<5x32xf32> -> vector<5x32xf32>
    %cst_85 = arith.constant 0.000000e+00 : f32
    %213 = vector.broadcast %cst_85 : f32 to vector<5x32xf32>
    %214 = arith.cmpf ogt, %189, %213 : vector<5x32xf32>
    %cst_86 = arith.constant 0.000000e+00 : f32
    %215 = vector.broadcast %cst_86 : f32 to vector<5x32xf32>
    %216 = arith.select %214, %212, %215 : vector<5x32xi1>, vector<5x32xf32>
    %217 = arith.truncf %216 : vector<5x32xf32> to vector<5x32xbf16>
    %cst_87 = arith.constant dense<0.000000e+00> : vector<64x32xf32>
    %218 = tpu.matmul %133, %217, %cst_87 {dimension_numbers = #tpu.dot_dimension_numbers<[0], [0], [1], [1], [0, 1, 1, 1], [], []>} : vector<5x64xbf16>, vector<5x32xbf16>, vector<64x32xf32> -> vector<64x32xf32>
    %cst_88 = arith.constant dense<0.000000e+00> : vector<32xf32>
    %219 = vector.multi_reduction <add>, %216, %cst_88 [0] : vector<5x32xf32> to vector<32xf32>
    %220 = vector.shape_cast %219 : vector<32xf32> to vector<1x32xf32>
    %cst_89 = arith.constant 1.000000e-01 : f32
    %221 = vector.broadcast %cst_89 : f32 to vector<64x32xf32>
    %222 = arith.mulf %221, %218 : vector<64x32xf32>
    %223 = arith.subf %175, %222 : vector<64x32xf32>
    %cst_90 = arith.constant 1.000000e-01 : f32
    %224 = vector.broadcast %cst_90 : f32 to vector<1x32xf32>
    %225 = arith.mulf %224, %220 : vector<1x32xf32>
    %226 = arith.subf %178, %225 : vector<1x32xf32>
    %cst_91 = arith.constant 1.000000e-01 : f32
    %227 = vector.broadcast %cst_91 : f32 to vector<32x5xf32>
    %228 = arith.mulf %227, %209 : vector<32x5xf32>
    %229 = arith.subf %181, %228 : vector<32x5xf32>
    %cst_92 = arith.constant 1.000000e-01 : f32
    %230 = vector.broadcast %cst_92 : f32 to vector<1x5xf32>
    %231 = arith.mulf %230, %211 : vector<1x5xf32>
    %232 = arith.subf %184, %231 : vector<1x5xf32>
    %233 = arith.truncf %223 : vector<64x32xf32> to vector<64x32xbf16>
    %cst_93 = arith.constant dense<0.000000e+00> : vector<15x32xf32>
    %234 = tpu.matmul %136, %233, %cst_93 {dimension_numbers = #tpu.dot_dimension_numbers<[1], [0], [0], [1], [0, 0, 1, 1], [], []>} : vector<15x64xbf16>, vector<64x32xbf16>, vector<15x32xf32> -> vector<15x32xf32>
    %235 = vector.broadcast %226 : vector<1x32xf32> to vector<15x32xf32>
    %236 = arith.addf %234, %235 : vector<15x32xf32>
    %cst_94 = arith.constant 0.000000e+00 : f32
    %237 = vector.broadcast %cst_94 : f32 to vector<15x32xf32>
    %238 = arith.maximumf %236, %237 : vector<15x32xf32>
    %239 = arith.truncf %238 : vector<15x32xf32> to vector<15x32xbf16>
    %240 = arith.truncf %229 : vector<32x5xf32> to vector<32x5xbf16>
    %cst_95 = arith.constant dense<0.000000e+00> : vector<15x5xf32>
    %241 = tpu.matmul %239, %240, %cst_95 {dimension_numbers = #tpu.dot_dimension_numbers<[1], [0], [0], [1], [0, 0, 1, 1], [], []>} : vector<15x32xbf16>, vector<32x5xbf16>, vector<15x5xf32> -> vector<15x5xf32>
    %242 = vector.broadcast %232 : vector<1x5xf32> to vector<15x5xf32>
    %243 = arith.addf %241, %242 : vector<15x5xf32>
    %cst_96 = arith.constant 2.000000e+00 : f32
    %244 = vector.broadcast %cst_96 : f32 to vector<15x5xf32>
    %245 = arith.mulf %243, %244 : vector<15x5xf32>
    %c1_97 = arith.constant 1 : index
    %c0_98 = arith.constant 0 : index
    %c0_99 = arith.constant 0 : index
    %246 = vector.load %arg7[%c1_97, %c0_98, %c0_99] : memref<4x15x5xf32, #tpu.memory_space<vmem>>, vector<1x15x5xf32>
    %247 = vector.shape_cast %246 : vector<1x15x5xf32> to vector<15x5xf32>
    %248 = vector.shape_cast %245 : vector<15x5xf32> to vector<1x15x5xf32>
    tpu.vector_store %arg7[%c1_97, %c0_98, %c0_99], %248 {strides = array<i32>} : memref<4x15x5xf32, #tpu.memory_space<vmem>>, vector<1x15x5xf32>,
    %c2 = arith.constant 2 : index
    %c0_100 = arith.constant 0 : index
    %c0_101 = arith.constant 0 : index
    %249 = vector.load %arg1[%c2, %c0_100, %c0_101] : memref<4x5x64xf32, #tpu.memory_space<vmem>>, vector<1x5x64xf32>
    %250 = vector.shape_cast %249 : vector<1x5x64xf32> to vector<5x64xf32>
    %251 = arith.truncf %250 : vector<5x64xf32> to vector<5x64xbf16>
    %c2_102 = arith.constant 2 : index
    %c0_103 = arith.constant 0 : index
    %c0_104 = arith.constant 0 : index
    %252 = vector.load %arg2[%c2_102, %c0_103, %c0_104] : memref<4x15x64xf32, #tpu.memory_space<vmem>>, vector<1x15x64xf32>
    %253 = vector.shape_cast %252 : vector<1x15x64xf32> to vector<15x64xf32>
    %254 = arith.truncf %253 : vector<15x64xf32> to vector<15x64xbf16>
    %255 = arith.truncf %9 : vector<64x32xf32> to vector<64x32xbf16>
    %256 = arith.truncf %11 : vector<32x5xf32> to vector<32x5xbf16>
    %cst_105 = arith.constant dense<0.000000e+00> : vector<5x32xf32>
    %257 = tpu.matmul %251, %255, %cst_105 {dimension_numbers = #tpu.dot_dimension_numbers<[1], [0], [0], [1], [0, 0, 1, 1], [], []>} : vector<5x64xbf16>, vector<64x32xbf16>, vector<5x32xf32> -> vector<5x32xf32>
    %258 = vector.broadcast %10 : vector<1x32xf32> to vector<5x32xf32>
    %259 = arith.addf %257, %258 : vector<5x32xf32>
    %cst_106 = arith.constant 0.000000e+00 : f32
    %260 = vector.broadcast %cst_106 : f32 to vector<5x32xf32>
    %261 = arith.maximumf %259, %260 : vector<5x32xf32>
    %262 = arith.truncf %261 : vector<5x32xf32> to vector<5x32xbf16>
    %cst_107 = arith.constant dense<0.000000e+00> : vector<5x5xf32>
    %263 = tpu.matmul %262, %256, %cst_107 {dimension_numbers = #tpu.dot_dimension_numbers<[1], [0], [0], [1], [0, 0, 1, 1], [], []>} : vector<5x32xbf16>, vector<32x5xbf16>, vector<5x5xf32> -> vector<5x5xf32>
    %264 = vector.broadcast %12 : vector<1x5xf32> to vector<5x5xf32>
    %265 = arith.addf %263, %264 : vector<5x5xf32>
    %cst_108 = arith.constant dense<0xFF800000> : vector<5xf32>
    %266 = vector.multi_reduction <maximumf>, %265, %cst_108 [1] : vector<5x5xf32> to vector<5xf32>
    %267 = vector.shape_cast %266 : vector<5xf32> to vector<5x1xf32>
    %268 = vector.broadcast %267 : vector<5x1xf32> to vector<5x5xf32>
    %269 = arith.subf %265, %268 : vector<5x5xf32>
    %270 = math.exp %269 : vector<5x5xf32>
    %cst_109 = arith.constant dense<0.000000e+00> : vector<5xf32>
    %271 = vector.multi_reduction <add>, %270, %cst_109 [1] : vector<5x5xf32> to vector<5xf32>
    %272 = vector.shape_cast %271 : vector<5xf32> to vector<5x1xf32>
    %273 = vector.broadcast %272 : vector<5x1xf32> to vector<5x5xf32>
    %274 = arith.divf %270, %273 : vector<5x5xf32>
    %275 = arith.subf %274, %8 : vector<5x5xf32>
    %cst_110 = arith.constant 2.000000e-01 : f32
    %276 = vector.broadcast %cst_110 : f32 to vector<5x5xf32>
    %277 = arith.mulf %275, %276 : vector<5x5xf32>
    %278 = arith.truncf %277 : vector<5x5xf32> to vector<5x5xbf16>
    %cst_111 = arith.constant dense<0.000000e+00> : vector<32x5xf32>
    %279 = tpu.matmul %262, %278, %cst_111 {dimension_numbers = #tpu.dot_dimension_numbers<[0], [0], [1], [1], [0, 1, 1, 1], [], []>} : vector<5x32xbf16>, vector<5x5xbf16>, vector<32x5xf32> -> vector<32x5xf32>
    %cst_112 = arith.constant dense<0.000000e+00> : vector<5xf32>
    %280 = vector.multi_reduction <add>, %277, %cst_112 [0] : vector<5x5xf32> to vector<5xf32>
    %281 = vector.shape_cast %280 : vector<5xf32> to vector<1x5xf32>
    %cst_113 = arith.constant dense<0.000000e+00> : vector<5x32xf32>
    %282 = tpu.matmul %278, %256, %cst_113 {dimension_numbers = #tpu.dot_dimension_numbers<[1], [1], [0], [0], [0, 0, 1, 0], [], []>} : vector<5x5xbf16>, vector<32x5xbf16>, vector<5x32xf32> -> vector<5x32xf32>
    %cst_114 = arith.constant 0.000000e+00 : f32
    %283 = vector.broadcast %cst_114 : f32 to vector<5x32xf32>
    %284 = arith.cmpf ogt, %259, %283 : vector<5x32xf32>
    %cst_115 = arith.constant 0.000000e+00 : f32
    %285 = vector.broadcast %cst_115 : f32 to vector<5x32xf32>
    %286 = arith.select %284, %282, %285 : vector<5x32xi1>, vector<5x32xf32>
    %287 = arith.truncf %286 : vector<5x32xf32> to vector<5x32xbf16>
    %cst_116 = arith.constant dense<0.000000e+00> : vector<64x32xf32>
    %288 = tpu.matmul %251, %287, %cst_116 {dimension_numbers = #tpu.dot_dimension_numbers<[0], [0], [1], [1], [0, 1, 1, 1], [], []>} : vector<5x64xbf16>, vector<5x32xbf16>, vector<64x32xf32> -> vector<64x32xf32>
    %cst_117 = arith.constant dense<0.000000e+00> : vector<32xf32>
    %289 = vector.multi_reduction <add>, %286, %cst_117 [0] : vector<5x32xf32> to vector<32xf32>
    %290 = vector.shape_cast %289 : vector<32xf32> to vector<1x32xf32>
    %cst_118 = arith.constant 1.000000e-01 : f32
    %291 = vector.broadcast %cst_118 : f32 to vector<64x32xf32>
    %292 = arith.mulf %291, %288 : vector<64x32xf32>
    %293 = arith.subf %9, %292 : vector<64x32xf32>
    %cst_119 = arith.constant 1.000000e-01 : f32
    %294 = vector.broadcast %cst_119 : f32 to vector<1x32xf32>
    %295 = arith.mulf %294, %290 : vector<1x32xf32>
    %296 = arith.subf %10, %295 : vector<1x32xf32>
    %cst_120 = arith.constant 1.000000e-01 : f32
    %297 = vector.broadcast %cst_120 : f32 to vector<32x5xf32>
    %298 = arith.mulf %297, %279 : vector<32x5xf32>
    %299 = arith.subf %11, %298 : vector<32x5xf32>
    %cst_121 = arith.constant 1.000000e-01 : f32
    %300 = vector.broadcast %cst_121 : f32 to vector<1x5xf32>
    %301 = arith.mulf %300, %281 : vector<1x5xf32>
    %302 = arith.subf %12, %301 : vector<1x5xf32>
    %303 = arith.truncf %293 : vector<64x32xf32> to vector<64x32xbf16>
    %304 = arith.truncf %299 : vector<32x5xf32> to vector<32x5xbf16>
    %cst_122 = arith.constant dense<0.000000e+00> : vector<5x32xf32>
    %305 = tpu.matmul %251, %303, %cst_122 {dimension_numbers = #tpu.dot_dimension_numbers<[1], [0], [0], [1], [0, 0, 1, 1], [], []>} : vector<5x64xbf16>, vector<64x32xbf16>, vector<5x32xf32> -> vector<5x32xf32>
    %306 = vector.broadcast %296 : vector<1x32xf32> to vector<5x32xf32>
    %307 = arith.addf %305, %306 : vector<5x32xf32>
    %cst_123 = arith.constant 0.000000e+00 : f32
    %308 = vector.broadcast %cst_123 : f32 to vector<5x32xf32>
    %309 = arith.maximumf %307, %308 : vector<5x32xf32>
    %310 = arith.truncf %309 : vector<5x32xf32> to vector<5x32xbf16>
    %cst_124 = arith.constant dense<0.000000e+00> : vector<5x5xf32>
    %311 = tpu.matmul %310, %304, %cst_124 {dimension_numbers = #tpu.dot_dimension_numbers<[1], [0], [0], [1], [0, 0, 1, 1], [], []>} : vector<5x32xbf16>, vector<32x5xbf16>, vector<5x5xf32> -> vector<5x5xf32>
    %312 = vector.broadcast %302 : vector<1x5xf32> to vector<5x5xf32>
    %313 = arith.addf %311, %312 : vector<5x5xf32>
    %cst_125 = arith.constant dense<0xFF800000> : vector<5xf32>
    %314 = vector.multi_reduction <maximumf>, %313, %cst_125 [1] : vector<5x5xf32> to vector<5xf32>
    %315 = vector.shape_cast %314 : vector<5xf32> to vector<5x1xf32>
    %316 = vector.broadcast %315 : vector<5x1xf32> to vector<5x5xf32>
    %317 = arith.subf %313, %316 : vector<5x5xf32>
    %318 = math.exp %317 : vector<5x5xf32>
    %cst_126 = arith.constant dense<0.000000e+00> : vector<5xf32>
    %319 = vector.multi_reduction <add>, %318, %cst_126 [1] : vector<5x5xf32> to vector<5xf32>
    %320 = vector.shape_cast %319 : vector<5xf32> to vector<5x1xf32>
    %321 = vector.broadcast %320 : vector<5x1xf32> to vector<5x5xf32>
    %322 = arith.divf %318, %321 : vector<5x5xf32>
    %323 = arith.subf %322, %8 : vector<5x5xf32>
    %cst_127 = arith.constant 2.000000e-01 : f32
    %324 = vector.broadcast %cst_127 : f32 to vector<5x5xf32>
    %325 = arith.mulf %323, %324 : vector<5x5xf32>
    %326 = arith.truncf %325 : vector<5x5xf32> to vector<5x5xbf16>
    %cst_128 = arith.constant dense<0.000000e+00> : vector<32x5xf32>
    %327 = tpu.matmul %310, %326, %cst_128 {dimension_numbers = #tpu.dot_dimension_numbers<[0], [0], [1], [1], [0, 1, 1, 1], [], []>} : vector<5x32xbf16>, vector<5x5xbf16>, vector<32x5xf32> -> vector<32x5xf32>
    %cst_129 = arith.constant dense<0.000000e+00> : vector<5xf32>
    %328 = vector.multi_reduction <add>, %325, %cst_129 [0] : vector<5x5xf32> to vector<5xf32>
    %329 = vector.shape_cast %328 : vector<5xf32> to vector<1x5xf32>
    %cst_130 = arith.constant dense<0.000000e+00> : vector<5x32xf32>
    %330 = tpu.matmul %326, %304, %cst_130 {dimension_numbers = #tpu.dot_dimension_numbers<[1], [1], [0], [0], [0, 0, 1, 0], [], []>} : vector<5x5xbf16>, vector<32x5xbf16>, vector<5x32xf32> -> vector<5x32xf32>
    %cst_131 = arith.constant 0.000000e+00 : f32
    %331 = vector.broadcast %cst_131 : f32 to vector<5x32xf32>
    %332 = arith.cmpf ogt, %307, %331 : vector<5x32xf32>
    %cst_132 = arith.constant 0.000000e+00 : f32
    %333 = vector.broadcast %cst_132 : f32 to vector<5x32xf32>
    %334 = arith.select %332, %330, %333 : vector<5x32xi1>, vector<5x32xf32>
    %335 = arith.truncf %334 : vector<5x32xf32> to vector<5x32xbf16>
    %cst_133 = arith.constant dense<0.000000e+00> : vector<64x32xf32>
    %336 = tpu.matmul %251, %335, %cst_133 {dimension_numbers = #tpu.dot_dimension_numbers<[0], [0], [1], [1], [0, 1, 1, 1], [], []>} : vector<5x64xbf16>, vector<5x32xbf16>, vector<64x32xf32> -> vector<64x32xf32>
    %cst_134 = arith.constant dense<0.000000e+00> : vector<32xf32>
    %337 = vector.multi_reduction <add>, %334, %cst_134 [0] : vector<5x32xf32> to vector<32xf32>
    %338 = vector.shape_cast %337 : vector<32xf32> to vector<1x32xf32>
    %cst_135 = arith.constant 1.000000e-01 : f32
    %339 = vector.broadcast %cst_135 : f32 to vector<64x32xf32>
    %340 = arith.mulf %339, %336 : vector<64x32xf32>
    %341 = arith.subf %293, %340 : vector<64x32xf32>
    %cst_136 = arith.constant 1.000000e-01 : f32
    %342 = vector.broadcast %cst_136 : f32 to vector<1x32xf32>
    %343 = arith.mulf %342, %338 : vector<1x32xf32>
    %344 = arith.subf %296, %343 : vector<1x32xf32>
    %cst_137 = arith.constant 1.000000e-01 : f32
    %345 = vector.broadcast %cst_137 : f32 to vector<32x5xf32>
    %346 = arith.mulf %345, %327 : vector<32x5xf32>
    %347 = arith.subf %299, %346 : vector<32x5xf32>
    %cst_138 = arith.constant 1.000000e-01 : f32
    %348 = vector.broadcast %cst_138 : f32 to vector<1x5xf32>
    %349 = arith.mulf %348, %329 : vector<1x5xf32>
    %350 = arith.subf %302, %349 : vector<1x5xf32>
    %351 = arith.truncf %341 : vector<64x32xf32> to vector<64x32xbf16>
    %cst_139 = arith.constant dense<0.000000e+00> : vector<15x32xf32>
    %352 = tpu.matmul %254, %351, %cst_139 {dimension_numbers = #tpu.dot_dimension_numbers<[1], [0], [0], [1], [0, 0, 1, 1], [], []>} : vector<15x64xbf16>, vector<64x32xbf16>, vector<15x32xf32> -> vector<15x32xf32>
    %353 = vector.broadcast %344 : vector<1x32xf32> to vector<15x32xf32>
    %354 = arith.addf %352, %353 : vector<15x32xf32>
    %cst_140 = arith.constant 0.000000e+00 : f32
    %355 = vector.broadcast %cst_140 : f32 to vector<15x32xf32>
    %356 = arith.maximumf %354, %355 : vector<15x32xf32>
    %357 = arith.truncf %356 : vector<15x32xf32> to vector<15x32xbf16>
    %358 = arith.truncf %347 : vector<32x5xf32> to vector<32x5xbf16>
    %cst_141 = arith.constant dense<0.000000e+00> : vector<15x5xf32>
    %359 = tpu.matmul %357, %358, %cst_141 {dimension_numbers = #tpu.dot_dimension_numbers<[1], [0], [0], [1], [0, 0, 1, 1], [], []>} : vector<15x32xbf16>, vector<32x5xbf16>, vector<15x5xf32> -> vector<15x5xf32>
    %360 = vector.broadcast %350 : vector<1x5xf32> to vector<15x5xf32>
    %361 = arith.addf %359, %360 : vector<15x5xf32>
    %cst_142 = arith.constant 2.000000e+00 : f32
    %362 = vector.broadcast %cst_142 : f32 to vector<15x5xf32>
    %363 = arith.mulf %361, %362 : vector<15x5xf32>
    %c2_143 = arith.constant 2 : index
    %c0_144 = arith.constant 0 : index
    %c0_145 = arith.constant 0 : index
    %364 = vector.load %arg7[%c2_143, %c0_144, %c0_145] : memref<4x15x5xf32, #tpu.memory_space<vmem>>, vector<1x15x5xf32>
    %365 = vector.shape_cast %364 : vector<1x15x5xf32> to vector<15x5xf32>
    %366 = vector.shape_cast %363 : vector<15x5xf32> to vector<1x15x5xf32>
    tpu.vector_store %arg7[%c2_143, %c0_144, %c0_145], %366 {strides = array<i32>} : memref<4x15x5xf32, #tpu.memory_space<vmem>>, vector<1x15x5xf32>,
    %c3 = arith.constant 3 : index
    %c0_146 = arith.constant 0 : index
    %c0_147 = arith.constant 0 : index
    %367 = vector.load %arg1[%c3, %c0_146, %c0_147] : memref<4x5x64xf32, #tpu.memory_space<vmem>>, vector<1x5x64xf32>
    %368 = vector.shape_cast %367 : vector<1x5x64xf32> to vector<5x64xf32>
    %369 = arith.truncf %368 : vector<5x64xf32> to vector<5x64xbf16>
    %c3_148 = arith.constant 3 : index
    %c0_149 = arith.constant 0 : index
    %c0_150 = arith.constant 0 : index
    %370 = vector.load %arg2[%c3_148, %c0_149, %c0_150] : memref<4x15x64xf32, #tpu.memory_space<vmem>>, vector<1x15x64xf32>
    %371 = vector.shape_cast %370 : vector<1x15x64xf32> to vector<15x64xf32>
    %372 = arith.truncf %371 : vector<15x64xf32> to vector<15x64xbf16>
    %373 = arith.truncf %9 : vector<64x32xf32> to vector<64x32xbf16>
    %374 = arith.truncf %11 : vector<32x5xf32> to vector<32x5xbf16>
    %cst_151 = arith.constant dense<0.000000e+00> : vector<5x32xf32>
    %375 = tpu.matmul %369, %373, %cst_151 {dimension_numbers = #tpu.dot_dimension_numbers<[1], [0], [0], [1], [0, 0, 1, 1], [], []>} : vector<5x64xbf16>, vector<64x32xbf16>, vector<5x32xf32> -> vector<5x32xf32>
    %376 = vector.broadcast %10 : vector<1x32xf32> to vector<5x32xf32>
    %377 = arith.addf %375, %376 : vector<5x32xf32>
    %cst_152 = arith.constant 0.000000e+00 : f32
    %378 = vector.broadcast %cst_152 : f32 to vector<5x32xf32>
    %379 = arith.maximumf %377, %378 : vector<5x32xf32>
    %380 = arith.truncf %379 : vector<5x32xf32> to vector<5x32xbf16>
    %cst_153 = arith.constant dense<0.000000e+00> : vector<5x5xf32>
    %381 = tpu.matmul %380, %374, %cst_153 {dimension_numbers = #tpu.dot_dimension_numbers<[1], [0], [0], [1], [0, 0, 1, 1], [], []>} : vector<5x32xbf16>, vector<32x5xbf16>, vector<5x5xf32> -> vector<5x5xf32>
    %382 = vector.broadcast %12 : vector<1x5xf32> to vector<5x5xf32>
    %383 = arith.addf %381, %382 : vector<5x5xf32>
    %cst_154 = arith.constant dense<0xFF800000> : vector<5xf32>
    %384 = vector.multi_reduction <maximumf>, %383, %cst_154 [1] : vector<5x5xf32> to vector<5xf32>
    %385 = vector.shape_cast %384 : vector<5xf32> to vector<5x1xf32>
    %386 = vector.broadcast %385 : vector<5x1xf32> to vector<5x5xf32>
    %387 = arith.subf %383, %386 : vector<5x5xf32>
    %388 = math.exp %387 : vector<5x5xf32>
    %cst_155 = arith.constant dense<0.000000e+00> : vector<5xf32>
    %389 = vector.multi_reduction <add>, %388, %cst_155 [1] : vector<5x5xf32> to vector<5xf32>
    %390 = vector.shape_cast %389 : vector<5xf32> to vector<5x1xf32>
    %391 = vector.broadcast %390 : vector<5x1xf32> to vector<5x5xf32>
    %392 = arith.divf %388, %391 : vector<5x5xf32>
    %393 = arith.subf %392, %8 : vector<5x5xf32>
    %cst_156 = arith.constant 2.000000e-01 : f32
    %394 = vector.broadcast %cst_156 : f32 to vector<5x5xf32>
    %395 = arith.mulf %393, %394 : vector<5x5xf32>
    %396 = arith.truncf %395 : vector<5x5xf32> to vector<5x5xbf16>
    %cst_157 = arith.constant dense<0.000000e+00> : vector<32x5xf32>
    %397 = tpu.matmul %380, %396, %cst_157 {dimension_numbers = #tpu.dot_dimension_numbers<[0], [0], [1], [1], [0, 1, 1, 1], [], []>} : vector<5x32xbf16>, vector<5x5xbf16>, vector<32x5xf32> -> vector<32x5xf32>
    %cst_158 = arith.constant dense<0.000000e+00> : vector<5xf32>
    %398 = vector.multi_reduction <add>, %395, %cst_158 [0] : vector<5x5xf32> to vector<5xf32>
    %399 = vector.shape_cast %398 : vector<5xf32> to vector<1x5xf32>
    %cst_159 = arith.constant dense<0.000000e+00> : vector<5x32xf32>
    %400 = tpu.matmul %396, %374, %cst_159 {dimension_numbers = #tpu.dot_dimension_numbers<[1], [1], [0], [0], [0, 0, 1, 0], [], []>} : vector<5x5xbf16>, vector<32x5xbf16>, vector<5x32xf32> -> vector<5x32xf32>
    %cst_160 = arith.constant 0.000000e+00 : f32
    %401 = vector.broadcast %cst_160 : f32 to vector<5x32xf32>
    %402 = arith.cmpf ogt, %377, %401 : vector<5x32xf32>
    %cst_161 = arith.constant 0.000000e+00 : f32
    %403 = vector.broadcast %cst_161 : f32 to vector<5x32xf32>
    %404 = arith.select %402, %400, %403 : vector<5x32xi1>, vector<5x32xf32>
    %405 = arith.truncf %404 : vector<5x32xf32> to vector<5x32xbf16>
    %cst_162 = arith.constant dense<0.000000e+00> : vector<64x32xf32>
    %406 = tpu.matmul %369, %405, %cst_162 {dimension_numbers = #tpu.dot_dimension_numbers<[0], [0], [1], [1], [0, 1, 1, 1], [], []>} : vector<5x64xbf16>, vector<5x32xbf16>, vector<64x32xf32> -> vector<64x32xf32>
    %cst_163 = arith.constant dense<0.000000e+00> : vector<32xf32>
    %407 = vector.multi_reduction <add>, %404, %cst_163 [0] : vector<5x32xf32> to vector<32xf32>
    %408 = vector.shape_cast %407 : vector<32xf32> to vector<1x32xf32>
    %cst_164 = arith.constant 1.000000e-01 : f32
    %409 = vector.broadcast %cst_164 : f32 to vector<64x32xf32>
    %410 = arith.mulf %409, %406 : vector<64x32xf32>
    %411 = arith.subf %9, %410 : vector<64x32xf32>
    %cst_165 = arith.constant 1.000000e-01 : f32
    %412 = vector.broadcast %cst_165 : f32 to vector<1x32xf32>
    %413 = arith.mulf %412, %408 : vector<1x32xf32>
    %414 = arith.subf %10, %413 : vector<1x32xf32>
    %cst_166 = arith.constant 1.000000e-01 : f32
    %415 = vector.broadcast %cst_166 : f32 to vector<32x5xf32>
    %416 = arith.mulf %415, %397 : vector<32x5xf32>
    %417 = arith.subf %11, %416 : vector<32x5xf32>
    %cst_167 = arith.constant 1.000000e-01 : f32
    %418 = vector.broadcast %cst_167 : f32 to vector<1x5xf32>
    %419 = arith.mulf %418, %399 : vector<1x5xf32>
    %420 = arith.subf %12, %419 : vector<1x5xf32>
    %421 = arith.truncf %411 : vector<64x32xf32> to vector<64x32xbf16>
    %422 = arith.truncf %417 : vector<32x5xf32> to vector<32x5xbf16>
    %cst_168 = arith.constant dense<0.000000e+00> : vector<5x32xf32>
    %423 = tpu.matmul %369, %421, %cst_168 {dimension_numbers = #tpu.dot_dimension_numbers<[1], [0], [0], [1], [0, 0, 1, 1], [], []>} : vector<5x64xbf16>, vector<64x32xbf16>, vector<5x32xf32> -> vector<5x32xf32>
    %424 = vector.broadcast %414 : vector<1x32xf32> to vector<5x32xf32>
    %425 = arith.addf %423, %424 : vector<5x32xf32>
    %cst_169 = arith.constant 0.000000e+00 : f32
    %426 = vector.broadcast %cst_169 : f32 to vector<5x32xf32>
    %427 = arith.maximumf %425, %426 : vector<5x32xf32>
    %428 = arith.truncf %427 : vector<5x32xf32> to vector<5x32xbf16>
    %cst_170 = arith.constant dense<0.000000e+00> : vector<5x5xf32>
    %429 = tpu.matmul %428, %422, %cst_170 {dimension_numbers = #tpu.dot_dimension_numbers<[1], [0], [0], [1], [0, 0, 1, 1], [], []>} : vector<5x32xbf16>, vector<32x5xbf16>, vector<5x5xf32> -> vector<5x5xf32>
    %430 = vector.broadcast %420 : vector<1x5xf32> to vector<5x5xf32>
    %431 = arith.addf %429, %430 : vector<5x5xf32>
    %cst_171 = arith.constant dense<0xFF800000> : vector<5xf32>
    %432 = vector.multi_reduction <maximumf>, %431, %cst_171 [1] : vector<5x5xf32> to vector<5xf32>
    %433 = vector.shape_cast %432 : vector<5xf32> to vector<5x1xf32>
    %434 = vector.broadcast %433 : vector<5x1xf32> to vector<5x5xf32>
    %435 = arith.subf %431, %434 : vector<5x5xf32>
    %436 = math.exp %435 : vector<5x5xf32>
    %cst_172 = arith.constant dense<0.000000e+00> : vector<5xf32>
    %437 = vector.multi_reduction <add>, %436, %cst_172 [1] : vector<5x5xf32> to vector<5xf32>
    %438 = vector.shape_cast %437 : vector<5xf32> to vector<5x1xf32>
    %439 = vector.broadcast %438 : vector<5x1xf32> to vector<5x5xf32>
    %440 = arith.divf %436, %439 : vector<5x5xf32>
    %441 = arith.subf %440, %8 : vector<5x5xf32>
    %cst_173 = arith.constant 2.000000e-01 : f32
    %442 = vector.broadcast %cst_173 : f32 to vector<5x5xf32>
    %443 = arith.mulf %441, %442 : vector<5x5xf32>
    %444 = arith.truncf %443 : vector<5x5xf32> to vector<5x5xbf16>
    %cst_174 = arith.constant dense<0.000000e+00> : vector<32x5xf32>
    %445 = tpu.matmul %428, %444, %cst_174 {dimension_numbers = #tpu.dot_dimension_numbers<[0], [0], [1], [1], [0, 1, 1, 1], [], []>} : vector<5x32xbf16>, vector<5x5xbf16>, vector<32x5xf32> -> vector<32x5xf32>
    %cst_175 = arith.constant dense<0.000000e+00> : vector<5xf32>
    %446 = vector.multi_reduction <add>, %443, %cst_175 [0] : vector<5x5xf32> to vector<5xf32>
    %447 = vector.shape_cast %446 : vector<5xf32> to vector<1x5xf32>
    %cst_176 = arith.constant dense<0.000000e+00> : vector<5x32xf32>
    %448 = tpu.matmul %444, %422, %cst_176 {dimension_numbers = #tpu.dot_dimension_numbers<[1], [1], [0], [0], [0, 0, 1, 0], [], []>} : vector<5x5xbf16>, vector<32x5xbf16>, vector<5x32xf32> -> vector<5x32xf32>
    %cst_177 = arith.constant 0.000000e+00 : f32
    %449 = vector.broadcast %cst_177 : f32 to vector<5x32xf32>
    %450 = arith.cmpf ogt, %425, %449 : vector<5x32xf32>
    %cst_178 = arith.constant 0.000000e+00 : f32
    %451 = vector.broadcast %cst_178 : f32 to vector<5x32xf32>
    %452 = arith.select %450, %448, %451 : vector<5x32xi1>, vector<5x32xf32>
    %453 = arith.truncf %452 : vector<5x32xf32> to vector<5x32xbf16>
    %cst_179 = arith.constant dense<0.000000e+00> : vector<64x32xf32>
    %454 = tpu.matmul %369, %453, %cst_179 {dimension_numbers = #tpu.dot_dimension_numbers<[0], [0], [1], [1], [0, 1, 1, 1], [], []>} : vector<5x64xbf16>, vector<5x32xbf16>, vector<64x32xf32> -> vector<64x32xf32>
    %cst_180 = arith.constant dense<0.000000e+00> : vector<32xf32>
    %455 = vector.multi_reduction <add>, %452, %cst_180 [0] : vector<5x32xf32> to vector<32xf32>
    %456 = vector.shape_cast %455 : vector<32xf32> to vector<1x32xf32>
    %cst_181 = arith.constant 1.000000e-01 : f32
    %457 = vector.broadcast %cst_181 : f32 to vector<64x32xf32>
    %458 = arith.mulf %457, %454 : vector<64x32xf32>
    %459 = arith.subf %411, %458 : vector<64x32xf32>
    %cst_182 = arith.constant 1.000000e-01 : f32
    %460 = vector.broadcast %cst_182 : f32 to vector<1x32xf32>
    %461 = arith.mulf %460, %456 : vector<1x32xf32>
    %462 = arith.subf %414, %461 : vector<1x32xf32>
    %cst_183 = arith.constant 1.000000e-01 : f32
    %463 = vector.broadcast %cst_183 : f32 to vector<32x5xf32>
    %464 = arith.mulf %463, %445 : vector<32x5xf32>
    %465 = arith.subf %417, %464 : vector<32x5xf32>
    %cst_184 = arith.constant 1.000000e-01 : f32
    %466 = vector.broadcast %cst_184 : f32 to vector<1x5xf32>
    %467 = arith.mulf %466, %447 : vector<1x5xf32>
    %468 = arith.subf %420, %467 : vector<1x5xf32>
    %469 = arith.truncf %459 : vector<64x32xf32> to vector<64x32xbf16>
    %cst_185 = arith.constant dense<0.000000e+00> : vector<15x32xf32>
    %470 = tpu.matmul %372, %469, %cst_185 {dimension_numbers = #tpu.dot_dimension_numbers<[1], [0], [0], [1], [0, 0, 1, 1], [], []>} : vector<15x64xbf16>, vector<64x32xbf16>, vector<15x32xf32> -> vector<15x32xf32>
    %471 = vector.broadcast %462 : vector<1x32xf32> to vector<15x32xf32>
    %472 = arith.addf %470, %471 : vector<15x32xf32>
    %cst_186 = arith.constant 0.000000e+00 : f32
    %473 = vector.broadcast %cst_186 : f32 to vector<15x32xf32>
    %474 = arith.maximumf %472, %473 : vector<15x32xf32>
    %475 = arith.truncf %474 : vector<15x32xf32> to vector<15x32xbf16>
    %476 = arith.truncf %465 : vector<32x5xf32> to vector<32x5xbf16>
    %cst_187 = arith.constant dense<0.000000e+00> : vector<15x5xf32>
    %477 = tpu.matmul %475, %476, %cst_187 {dimension_numbers = #tpu.dot_dimension_numbers<[1], [0], [0], [1], [0, 0, 1, 1], [], []>} : vector<15x32xbf16>, vector<32x5xbf16>, vector<15x5xf32> -> vector<15x5xf32>
    %478 = vector.broadcast %468 : vector<1x5xf32> to vector<15x5xf32>
    %479 = arith.addf %477, %478 : vector<15x5xf32>
    %cst_188 = arith.constant 2.000000e+00 : f32
    %480 = vector.broadcast %cst_188 : f32 to vector<15x5xf32>
    %481 = arith.mulf %479, %480 : vector<15x5xf32>
    %c3_189 = arith.constant 3 : index
    %c0_190 = arith.constant 0 : index
    %c0_191 = arith.constant 0 : index
    %482 = vector.load %arg7[%c3_189, %c0_190, %c0_191] : memref<4x15x5xf32, #tpu.memory_space<vmem>>, vector<1x15x5xf32>
    %483 = vector.shape_cast %482 : vector<1x15x5xf32> to vector<15x5xf32>
    %484 = vector.shape_cast %481 : vector<15x5xf32> to vector<1x15x5xf32>
    tpu.vector_store %arg7[%c3_189, %c0_190, %c0_191], %484 {strides = array<i32>} : memref<4x15x5xf32, #tpu.memory_space<vmem>>, vector<1x15x5xf32>,
    return
  }
  func.func @transform_0(%arg0: i32) -> (i32, i32, i32) {
    %c0_i32 = arith.constant 0 : i32
    %c0_i32_0 = arith.constant 0 : i32
    %c0_i32_1 = arith.constant 0 : i32
    return %arg0, %c0_i32, %c0_i32_0 : i32, i32, i32
  }
  func.func @transform_1(%arg0: i32) -> (i32, i32, i32) {
    %c0_i32 = arith.constant 0 : i32
    %c0_i32_0 = arith.constant 0 : i32
    %c0_i32_1 = arith.constant 0 : i32
    return %arg0, %c0_i32, %c0_i32_0 : i32, i32, i32
  }
  func.func @transform_2(%arg0: i32) -> (i32, i32) {
    %c0_i32 = arith.constant 0 : i32
    %c0_i32_0 = arith.constant 0 : i32
    %c0_i32_1 = arith.constant 0 : i32
    return %c0_i32, %c0_i32_0 : i32, i32
  }
  func.func @transform_3(%arg0: i32) -> (i32, i32) {
    %c0_i32 = arith.constant 0 : i32
    %c0_i32_0 = arith.constant 0 : i32
    %c0_i32_1 = arith.constant 0 : i32
    return %c0_i32, %c0_i32_0 : i32, i32
  }
  func.func @transform_4(%arg0: i32) -> (i32, i32) {
    %c0_i32 = arith.constant 0 : i32
    %c0_i32_0 = arith.constant 0 : i32
    %c0_i32_1 = arith.constant 0 : i32
    return %c0_i32, %c0_i32_0 : i32, i32
  }
  func.func @transform_5(%arg0: i32) -> (i32, i32) {
    %c0_i32 = arith.constant 0 : i32
    %c0_i32_0 = arith.constant 0 : i32
    %c0_i32_1 = arith.constant 0 : i32
    return %c0_i32, %c0_i32_0 : i32, i32
  }
  func.func @transform_6(%arg0: i32) -> (i32, i32, i32) {
    %c0_i32 = arith.constant 0 : i32
    %c0_i32_0 = arith.constant 0 : i32
    %c0_i32_1 = arith.constant 0 : i32
    return %arg0, %c0_i32, %c0_i32_0 : i32, i32, i32
  }
}

</mosaic_0001>

<bundles_post_ra>
// kernel: forward.1
= control target key start
LH: loop header
LB: loop body
LE: loop exit
PB: predicated region body
PF: predicated region fallthrough
CT: control target
= control target key end

     0   :  { %s2612_s21 = smov 0   ;;  %s3505_s0 = inlined_call_operand.vmem [shape: f32[8,5,64], index: 0, kind: input, shape index: {}]   ;;  %s3506_s1 = inlined_call_operand.vmem [shape: f32[8,15,64], index: 1, kind: input, shape index: {}]   ;;  %s3507_s2 = inlined_call_operand.vmem [shape: f32[64,32], index: 2, kind: input, shape index: {}]   ;;  %s3508_s3 = inlined_call_operand.vmem [shape: f32[1,32], index: 3, kind: input, shape index: {}]   ;;  %s3509_s4 = inlined_call_operand.vmem [shape: f32[32,5], index: 4, kind: input, shape index: {}]   ;;  %s3510_s5 = inlined_call_operand.vmem [shape: f32[1,5], index: 5, kind: input, shape index: {}]   ;;  %s3511_s6 = inlined_call_operand.vmem [shape: f32[8,15,5], index: 6, kind: output, shape index: {}]  }
   0x1 LB: > { %s2393_s22 = sadd.s32 4294967295, %s2573_s21   ;;  %p2397_p0 = scmp.ge.s32.totalorder %s2573_s21, 1  ;;  %s2573_s21 = sphi %s2612_s21, %s16_s21  }
   0x2   : > { %p225_p1 = scmp.lt.s32.totalorder %s2573_s21, 3 }
   0x4   : > { %p226_p2 = pnand %p2397_p0, %p225_p1 }
   0x5   : > { %s2398_s29 = sshll.u32 (!%p226_p2), %s2393_s22, 2 }
   0x6   : > { %229 = sbr.rel (%p226_p2) target bundleno = 7384 (0x1cd8), region = 44  ;;  %p263_p3 = scmp.lt.s32.totalorder (!%p226_p2), %s2398_s29, 7 }
   0xb   : > { %v2623_v0 = vld [vmem:[%s3507_s2 + $0x30] sm:$0xff]  ;;  %v2628_v1 = vld [vmem:[%s3507_s2 + $0x38] sm:$0xff]  ;;  %v2633_v2 = vld [vmem:[%s3507_s2 + $0x20] sm:$0xff]  ;;  %s3513_s29 = smov (!%p263_p3, %s2398_s29), 7  ;;  %vm320_vm0 = vcmask 523264   ;;  %vm342_vm1 = vcmask 261120   ;;  %v283_v39 = vlaneseq }
   0xc   : > { %v2637_v3 = vpack.c.bf16 %v2628_v1, %v2623_v0  ;;  %v2642_v4 = vld [vmem:[%s3507_s2 + $0x28] sm:$0xff]  ;;  %v2654_v6 = vld [vmem:[%s3507_s2 + $0x10] sm:$0xff]  ;;  %v2659_v7 = vld [vmem:[%s3507_s2 + $0x18] sm:$0xff]  ;;  %s2399_s12 = sshll.u32 %s3513_s29, 3  ;;  %vm359_vm2 = vcmask 36864   ;;  %vm403_vm3 = vcmask 39936  }
   0xd   : > { %v2647_v5 = vpack.c.bf16 %v2642_v4, %v2633_v2  ;;  %s2665_s15 = scalar_lea.vmem %s3505_s0, %s2399_s12  ;;  %v2670_v8 = vpack.c.bf16 %v2659_v7, %v2654_v6  ;;  %v2676_v10 = vld [vmem:[%s3507_s2] sm:$0xff]  ;;  %v2681_v11 = vld [vmem:[%s3507_s2 + $0x8] sm:$0xff]  ;;  %v2697_v14 = vld [vmem:[%s3509_s4 + $0x10] sm:$0xff]  ;;  %v284_v40 = vshrl.u32 %v283_v39, 7  ;;  %v286_v41 = vand.u32 127, %v283_v39  ;;  %s2504_s14 = sshll.u32 %s3513_s29, 4 }
   0xe   : > { %328 = vmatpush.bf16.msra.mxu0 %v2637_v3  ;;  %v306_v9 = vld [vmem:[%s2665_s15] sm:$0x1f]  ;;  %v2689_v13 = vpack.c.bf16 %v2681_v11, %v2676_v10  ;;  %v2702_v15 = vld [vmem:[%s3509_s4 + $0x18] sm:$0xff]  ;;  %v2717_v18 = vld [vmem:[%s3509_s4 + $0x8] sm:$0xff]  ;;  %v2575_v53 = vmov 0.0   ;;  %vm410_vm9 = vcmask 1041408   ;;  %s2904_s18 = scalar_lea.vmem %s3506_s1, %s2504_s14  ;;  %s2939_s22 = scalar_lea.vmem %s3511_s6, %s2504_s14 }
   0xf   : > { %v2683_v12 = vpack.c.bf16 %v306_v9, %v306_v9  ;;  %v2706_v16 = vpack.c.bf16 %v2702_v15, %v2697_v14  ;;  %v2712_v17 = vld [vmem:[%s3509_s4] sm:$0xff]  ;;  %v287_v45 = vsub.s32 %v284_v40, %v286_v41  ;;  %vm411_vm10 = vcmask 1042432  }
  0x10   : > { %v2721_v19 = vpack.c.bf16 %v2717_v18, %v2712_v17  ;;  %v2727_v20 = vld [vmem:[%s3508_s3] ss:$0 sm:$0xff]  ;;  %v2576_v57 = vmov 65535   ;;  %vm527_vm12 = vcmask 258048  }
  0x11   : > { %467 = vxpose.xlu1.c.b16.start.end [1/1] (short) (narrow) %v2683_v12, 64  ;;  %352 = vmatpush.bf16.msra.mxu1 %v2706_v16  ;;  %v2737_v26 = vld [vmem:[%s3510_s5] ss:$0 sm:$0xff]  ;;  %v2744_v36 = vsel %vm403_vm3, %v2706_v16, 0  ;;  %vm288_vm6 = vcmp.eq.s32.totalorder %v287_v45, 0  ;;  %v412_v58 = vsel %vm410_vm9, 4294967295, %v2576_v57 }
  0x12   : > { %329 = vmatpush.bf16.msra.mxu0 %v2647_v5  ;;  %v2749_v37 = vsel %vm403_vm3, %v2721_v19, 0  ;;  %v2752_v54 = vsel %vm288_vm6, 1.0, %v2575_v53  ;;  %v2757_v60 = vsel %vm411_vm10, %v412_v58, 0  ;;  %vm827_vm6 = vcmask 38912  }
  0x15   : > { %353 = vmatpush.bf16.msra.mxu1 %v2721_v19 }
  0x16   : > { %330 = vmatpush.bf16.msra.mxu0 %v2670_v8 }
  0x1a   : > { %331 = vmatpush.bf16.msra.mxu0 %v2689_v13 }
  0x1d   : > { %2407 = vmatmul.msk.bf16.vlgmr.msra.gmra.mxu0 %vm320_vm0, %v2683_v12 }
  0x1e   : > { %457 = vmatpush.bf16.xpose.msrb.mxu0 %v2744_v36 }
  0x26   : > { %458 = vmatpush.bf16.xpose.msrb.mxu0 %v2749_v37 }
  0x9a   : > { %v333_v21 = vpop.f32.mrf.mxu0 }
  0x9b   : > { %v2730_v22 = vadd.f32 %v2727_v20, %v333_v21 }
  0x9d   : > { %v337_v23 = vmax.f32 %v2730_v22, 0.0  ;;  %vm464_vm11 = vcmp.gt.f32.partialorder %v2730_v22, 0.0 }
  0x9f   : > { %v338_v24 = vpack.c.bf16 %v337_v23, %v337_v23 }
  0xa1   : > { %387 = vxpose.xlu1.c.b16.start.end [1/1] (short) (narrow) %v338_v24, 32  ;;  %2408 = vmatmul.msk.bf16.vlgmr.msra.gmra.mxu1 %vm342_vm1, %v338_v24 }
  0xa2   : > { %v335_v25 = vpop.f32.mrf.mxu0 }
  0xbd   : > { %v2769_v24 = vpop.trf.xlu1 }
 0x11e   : > { %v355_v27 = vpop.f32.mrf.mxu1 }
 0x11f   : > { %v356_v28 = vadd.f32 %v2737_v26, %v355_v27  ;;  %v2773_v27 = vpop.trf.xlu1 }
 0x121   : > { %v360_v29 = vsel %vm359_vm2, %v356_v28, -inf }
 0x122   : > { %361 = vmax.xlane.f32.xlu0 %v360_v29 }
 0x126   : > { %v357_v30 = vpop.f32.mrf.mxu1 }
 0x127   : > { %v2777_v22 = vpop.trf.xlu1 }
 0x195   : > { %v362_v31 = vpop.xlane.xlu0 %361 }
 0x196   : > { %v363_v32 = vsub.f32 %v356_v28, %v362_v31  ;;  %v2781_v28 = vpop.trf.xlu1 }
 0x198   : > { %v364_v33 = vmul.f32 1.442695, %v363_v32 }
 0x19a   : > { %2519 = vpow2.f32 %v364_v33 }
 0x19e   : > { %v395_v29 = vpop.trf.xlu1 }
 0x1a0   : > { %v2520_v34 = vpop.eup %2519 }
 0x1a1   : > { %v366_v35 = vsel %vm359_vm2, %v2520_v34, 0.0 }
 0x1a2   : > { %367 = vadd.xlane.f32.xlu0 %v366_v35 }
 0x1a6   : > { %v396_v30 = vpop.trf.xlu1 }
 0x215   : > { %v368_v38 = vpop.xlane.xlu0 %367 }
 0x216   : > { %2521 = vrcp.f32 %v368_v38  ;;  %v380_v46 = vand.u32 2147483648, %v368_v38  ;;  %v378_v48 = vand.u32 2147483647, %v368_v38  ;;  %vm374_vm5 = vweird.f32 %v368_v38 }
 0x218   : > { %v381_v50 = vor.u32 1.1754944e-38, %v380_v46  ;;  %vm379_vm8 = vcmp.eq.f32.partialorder %v378_v48, 8.507059e+37 }
 0x21c   : > { %v2522_v42 = vpop.eup %2521 }
 0x21d   : > { %v370_v43 = vmul.f32 %v2522_v42, %v368_v38  ;;  %vm375_vm4 = vweird.f32 %v2522_v42 }
 0x21e   : > { %vm376_vm7 = vmor %vm374_vm5, %vm375_vm4 }
 0x21f   : > { %v371_v44 = vsub.f32 1.0, %v370_v43 }
 0x221   : > { %v372_v47 = vmul.f32 %v2522_v42, %v371_v44 }
 0x223   : > { %v373_v49 = vadd.f32 %v2522_v42, %v372_v47 }
 0x225   : > { %v377_v51 = vsel %vm376_vm7, %v2522_v42, %v373_v49 }
 0x226   : > { %v382_v52 = vsel %vm379_vm8, %v381_v50, %v377_v51 }
 0x227   : > { %v383_v55 = vmul.f32 %v2520_v34, %v382_v52 }
 0x229   : > { %v384_v56 = vsub.f32 %v383_v55, %v2752_v54 }
 0x22b   : > { %v2755_v59 = vmul.f32 0.2, %v384_v56 }
 0x22d   : > { %v386_v61 = vpack.c.bf16 %v2755_v59, %v2755_v59 }
 0x22f   : > { %2411 = vmatmul.msk.bf16.vlgmr.msrb.gmra.mxu0 %vm403_vm3, %v386_v61  ;;  %v415_v62 = vand.u32 %v2757_v60, %v386_v61 }
 0x231   : > { %424 = vmatpush.bf16.msra.mxu2 %v415_v62 }
 0x234   : > { %2409 = vmatmul.msk.bf16.vlgmr.msra.gmra.mxu2 %vm403_vm3, %v395_v29 }
 0x244   : > { %2410 = vmatmul.msk.bf16.gmra.mxu2 %vm403_vm3, %v396_v30 }
 0x2ac   : > { %v460_v63 = vpop.f32.mrf.mxu0 }
 0x2ad   : > { %v2764_v9 = vsel %vm464_vm11, %v460_v63, 0.0 }
 0x2ae   : > { %v466_v21 = vpack.c.bf16 %v2764_v9, %v2764_v9 }
 0x2b0   : > { %v496_v23 = vand.u32 %v466_v21, %v2757_v60 }
 0x2b2   : > { %505 = vmatpush.bf16.msrb.mxu1 %v496_v23 }
 0x2b4   : > { %v462_v25 = vpop.f32.mrf.mxu0 }
 0x2b5   : > { %2412 = vmatmul.msk.bf16.vlgmr.msrb.gmra.mxu1 %vm403_vm3, %v2769_v24 }
 0x2b7   : > { %v426_v21 = vpop.f32.mrf.mxu2 }
 0x2b8   : > { %v553_v30 = vmul.f32 0.1, %v426_v21 }
 0x2bf   : > { %v428_v23 = vpop.f32.mrf.mxu2 }
 0x2c5   : > { %2413 = vmatmul.msk.bf16.gmra.mxu1 %vm403_vm3, %v2773_v27 }
 0x2c7   : > { %v431_v25 = vpop.f32.mrf.mxu2 }
 0x2c8   : > { %v555_v29 = vmul.f32 0.1, %v431_v25 }
 0x2d5   : > { %2414 = vmatmul.msk.bf16.gmra.mxu1 %vm403_vm3, %v2777_v22 }
 0x2e5   : > { %2415 = vmatmul.msk.bf16.gmra.mxu1 %vm403_vm3, %v2781_v28 }
 0x332   : > { %v507_v31 = vpop.f32.mrf.mxu1 }
 0x333   : > { %v535_v56 = vmul.f32 0.1, %v507_v31  ;;  %v554_v31 = vmul.f32 0.1, %v428_v23 }
 0x335   : > { %v2815_v62 = vsub.f32 %v2676_v10, %v535_v56 }
 0x33a   : > { %v509_v32 = vpop.f32.mrf.mxu1 }
 0x33b   : > { %v536_v52 = vmul.f32 0.1, %v509_v32  ;;  %v433_v32 = vpop.f32.mrf.mxu2 }
 0x33d   : > { %v2810_v58 = vsub.f32 %v2681_v11, %v536_v52 }
 0x33f   : > { %v563_v63 = vpack.c.bf16 %v2810_v58, %v2815_v62 }
 0x342   : > { %v512_v33 = vpop.f32.mrf.mxu1 }
 0x343   : > { %v537_v50 = vmul.f32 0.1, %v512_v33  ;;  %v2822_v33 = vsub.f32 %v2697_v14, %v555_v29 }
 0x345   : > { %v2807_v57 = vsub.f32 %v2654_v6, %v537_v50 }
 0x34a   : > { %v514_v34 = vpop.f32.mrf.mxu1 }
 0x34b   : > { %v538_v47 = vmul.f32 0.1, %v514_v34  ;;  %v556_v34 = vmul.f32 0.1, %v433_v32 }
 0x34d   : > { %v2802_v53 = vsub.f32 %v2659_v7, %v538_v47 }
 0x34f   : > { %v564_v61 = vpack.c.bf16 %v2802_v53, %v2807_v57 }
 0x352   : > { %v517_v35 = vpop.f32.mrf.mxu1 }
 0x353   : > { %v539_v44 = vmul.f32 0.1, %v517_v35  ;;  %v2825_v35 = vsub.f32 %v2712_v17, %v553_v30 }
 0x355   : > { %v2799_v51 = vsub.f32 %v2633_v2, %v539_v44 }
 0x35a   : > { %v519_v38 = vpop.f32.mrf.mxu1 }
 0x35b   : > { %v540_v42 = vmul.f32 0.1, %v519_v38  ;;  %v2828_v38 = vsub.f32 %v2702_v15, %v556_v34 }
 0x35d   : > { %v2794_v48 = vsub.f32 %v2642_v4, %v540_v42 }
 0x35f   : > { %v565_v55 = vpack.c.bf16 %v2794_v48, %v2799_v51 }
 0x362   : > { %v522_v39 = vpop.f32.mrf.mxu1 }
 0x363   : > { %v541_v40 = vmul.f32 0.1, %v522_v39  ;;  %v2831_v39 = vsub.f32 %v2717_v18, %v554_v31  ;;  %v436_v31 = vsel %vm359_vm2, %v2755_v59, 0.0 }
 0x364   : > { %v437_v32 = vrot.slane %v436_v31, 4 }
 0x365   : > { %v2788_v45 = vsub.f32 %v2623_v0, %v541_v40 }
 0x366   : > { %v438_v34 = vadd.f32 %v437_v32, %v436_v31 }
 0x36a   : > { %v524_v41 = vpop.f32.mrf.mxu1 }
 0x36b   : > { %v542_v43 = vmul.f32 0.1, %v524_v41  ;;  %v567_v41 = vpack.c.bf16 %v2831_v39, %v2825_v35 }
 0x36d   : > { %v2791_v46 = vsub.f32 %v2628_v1, %v542_v43  ;;  %v687_v42 = vsel %vm403_vm3, %v567_v41, 0  ;;  %v528_v43 = vsel %vm527_vm12, %v2764_v9, 0.0 }
 0x36e   : > { %v529_v44 = vrot.slane %v528_v43, 4 }
 0x36f   : > { %v566_v49 = vpack.c.bf16 %v2791_v46, %v2788_v45 }
 0x370   : > { %v530_v47 = vadd.f32 %v529_v44, %v528_v43  ;;  %v2856_v44 = vld [vmem:[%s3510_s5] sm:$0x1] }
 0x371   : > { %576 = vmatpush.bf16.msra.mxu0 %v566_v49 }
 0x372   : > { %v531_v49 = vrot.slane %v530_v47, 2 }
 0x374   : > { %v532_v50 = vadd.f32 %v531_v49, %v530_v47 }
 0x375   : > { %577 = vmatpush.bf16.msra.mxu0 %v565_v55 }
 0x376   : > { %v533_v52 = vrot.slane %v532_v50, 1 }
 0x378   : > { %v534_v55 = vadd.f32 %v533_v52, %v532_v50 }
 0x379   : > { %578 = vmatpush.bf16.msra.mxu0 %v564_v61  ;;  %v2844_v61 = vld [vmem:[%s3508_s3] sm:$0x1] }
 0x37a   : > { %v551_v56 = vmul.f32 0.1, %v534_v55 }
 0x37d   : > { %579 = vmatpush.bf16.msra.mxu0 %v563_v63  ;;  %v2847_v63 = vsub.f32 %v2844_v61, %v551_v56 }
 0x37f   : > { %v570_v21 = vperm.slane %v2847_v63, 0 }
 0x380   : > { %2416 = vmatmul.msk.bf16.vlgmr.msra.gmra.mxu0 %vm320_vm0, %v2683_v12  ;;  %v568_v12 = vpack.c.bf16 %v2828_v38, %v2822_v33 }
 0x382   : > { %v690_v40 = vsel %vm403_vm3, %v568_v12, 0  ;;  %599 = vmatpush.bf16.msra.mxu3 %v568_v12  ;;  %v439_v12 = vrot.slane %v438_v34, 2 }
 0x383   : > { %698 = vmatpush.bf16.xpose.msrb.mxu0 %v690_v40 }
 0x384   : > { %v440_v40 = vadd.f32 %v439_v12, %v438_v34 }
 0x386   : > { %600 = vmatpush.bf16.msra.mxu3 %v567_v41  ;;  %v441_v41 = vrot.slane %v440_v40, 1 }
 0x38b   : > { %699 = vmatpush.bf16.xpose.msrb.mxu0 %v687_v42  ;;  %v442_v42 = vadd.f32 %v441_v41, %v440_v40 }
 0x38d   : > { %v561_v43 = vmul.f32 0.1, %v442_v42 }
 0x38f   : > { %v2859_v47 = vsub.f32 %v2856_v44, %v561_v43 }
 0x391   : > { %v588_v49 = vperm.slane %v2859_v47, 0 }
 0x3fd   : > { %v581_v23 = vpop.f32.mrf.mxu0 }
 0x3fe   : > { %v582_v25 = vadd.f32 %v581_v23, %v570_v21 }
 0x400   : > { %v585_v9 = vmax.f32 %v582_v25, 0.0  ;;  %vm705_vm5 = vcmp.gt.f32.partialorder %v582_v25, 0.0 }
 0x402   : > { %v586_v29 = vpack.c.bf16 %v585_v9, %v585_v9 }
 0x404   : > { %633 = vxpose.xlu0.c.b16.start.end [1/1] (short) (narrow) %v586_v29, 32  ;;  %2417 = vmatmul.msk.bf16.vlgmr.msra.gmra.mxu3 %vm342_vm1, %v586_v29 }
 0x405   : > { %v583_v30 = vpop.f32.mrf.mxu0 }
 0x487   : > { %v602_v50 = vpop.f32.mrf.mxu3 }
 0x488   : > { %v603_v52 = vadd.f32 %v602_v50, %v588_v49 }
 0x48a   : > { %v606_v59 = vsel %vm359_vm2, %v603_v52, -inf }
 0x48b   : > { %607 = vmax.xlane.f32.xlu2 %v606_v59 }
 0x48f   : > { %v604_v55 = vpop.f32.mrf.mxu3 }
 0x4fe   : > { %v608_v56 = vpop.xlane.xlu2 %607 }
 0x4ff   : > { %v609_v21 = vsub.f32 %v603_v52, %v608_v56 }
 0x501   : > { %v610_v23 = vmul.f32 1.442695, %v609_v21 }
 0x503   : > { %2523 = vpow2.f32 %v610_v23  ;;  %v641_v23 = vpop.trf.xlu0 }
 0x509   : > { %v2524_v9 = vpop.eup %2523 }
 0x50a   : > { %v612_v29 = vsel %vm359_vm2, %v2524_v9, 0.0 }
 0x50b   : > { %613 = vadd.xlane.f32.xlu2 %v612_v29  ;;  %v642_v29 = vpop.trf.xlu0 }
 0x57e   : > { %v614_v30 = vpop.xlane.xlu2 %613 }
 0x57f   : > { %2525 = vrcp.f32 %v614_v30  ;;  %v626_v12 = vand.u32 2147483648, %v614_v30  ;;  %v624_v41 = vand.u32 2147483647, %v614_v30  ;;  %vm620_vm14 = vweird.f32 %v614_v30 }
 0x581   : > { %v627_v43 = vor.u32 1.1754944e-38, %v626_v12  ;;  %vm625_vm4 = vcmp.eq.f32.partialorder %v624_v41, 8.507059e+37 }
 0x585   : > { %v2526_v31 = vpop.eup %2525 }
 0x586   : > { %v616_v32 = vmul.f32 %v2526_v31, %v614_v30  ;;  %vm621_vm13 = vweird.f32 %v2526_v31 }
 0x587   : > { %vm622_vm15 = vmor %vm620_vm14, %vm621_vm13 }
 0x588   : > { %v617_v34 = vsub.f32 1.0, %v616_v32 }
 0x58a   : > { %v618_v40 = vmul.f32 %v2526_v31, %v617_v34 }
 0x58c   : > { %v619_v42 = vadd.f32 %v2526_v31, %v618_v40 }
 0x58e   : > { %v623_v49 = vsel %vm622_vm15, %v2526_v31, %v619_v42 }
 0x58f   : > { %v628_v50 = vsel %vm625_vm4, %v627_v43, %v623_v49 }
 0x590   : > { %v629_v52 = vmul.f32 %v2524_v9, %v628_v50 }
 0x592   : > { %v630_v59 = vsub.f32 %v629_v52, %v2752_v54 }
 0x594   : > { %v2865_v55 = vmul.f32 0.2, %v630_v59 }
 0x596   : > { %v632_v56 = vpack.c.bf16 %v2865_v55, %v2865_v55 }
 0x598   : > { %2420 = vmatmul.msk.bf16.vlgmr.msrb.gmra.mxu0 %vm403_vm3, %v632_v56  ;;  %v656_v21 = vand.u32 %v632_v56, %v2757_v60 }
 0x59a   : > { %665 = vmatpush.bf16.msrb.mxu2 %v656_v21 }
 0x59d   : > { %2418 = vmatmul.msk.bf16.vlgmr.msrb.gmra.mxu2 %vm403_vm3, %v641_v23 }
 0x5ad   : > { %2419 = vmatmul.msk.bf16.gmra.mxu2 %vm403_vm3, %v642_v29 }
 0x615   : > { %v701_v30 = vpop.f32.mrf.mxu0 }
 0x616   : > { %v2873_v9 = vsel %vm705_vm5, %v701_v30, 0.0 }
 0x617   : > { %v707_v31 = vpack.c.bf16 %v2873_v9, %v2873_v9 }
 0x619   : > { %v709_v32 = vand.u32 %v707_v31, %v2757_v60 }
 0x61b   : > { %718 = vmatpush.bf16.msrb.mxu3 %v709_v32 }
 0x61d   : > { %v703_v34 = vpop.f32.mrf.mxu0 }
 0x61e   : > { %2421 = vmatmul.msk.bf16.vlgmr.msrb.gmra.mxu3 %vm403_vm3, %v2769_v24 }
 0x620   : > { %v667_v12 = vpop.f32.mrf.mxu2 }
 0x621   : > { %v765_v50 = vmul.f32 0.1, %v667_v12 }
 0x623   : > { %v769_v24 = vsub.f32 %v2825_v35, %v765_v50 }
 0x628   : > { %v669_v40 = vpop.f32.mrf.mxu2 }
 0x629   : > { %v766_v43 = vmul.f32 0.1, %v669_v40 }
 0x62b   : > { %v770_v56 = vsub.f32 %v2831_v39, %v766_v43 }
 0x62e   : > { %2422 = vmatmul.msk.bf16.gmra.mxu3 %vm403_vm3, %v2773_v27  ;;  %v802_v27 = vpack.c.bf16 %v770_v56, %v769_v24 }
 0x630   : > { %v672_v41 = vpop.f32.mrf.mxu2 }
 0x631   : > { %v767_v42 = vmul.f32 0.1, %v672_v41 }
 0x633   : > { %v771_v52 = vsub.f32 %v2822_v33, %v767_v42 }
 0x638   : > { %v674_v25 = vpop.f32.mrf.mxu2 }
 0x639   : > { %v768_v49 = vmul.f32 0.1, %v674_v25 }
 0x63b   : > { %v772_v59 = vsub.f32 %v2828_v38, %v768_v49 }
 0x63d   : > { %v803_v21 = vpack.c.bf16 %v772_v59, %v771_v52 }
 0x63e   : > { %2423 = vmatmul.msk.bf16.gmra.mxu3 %vm403_vm3, %v2777_v22 }
 0x63f   : > { %816 = vmatpush.bf16.msra.mxu2 %v803_v21 }
 0x643   : > { %817 = vmatpush.bf16.msra.mxu2 %v802_v27  ;;  %v2427_v27 = vld [vmem:[%s2665_s15 + $0x8] sm:$0x1f] }
 0x647   : > { %863 = vmatpush.bf16.msrb.mxu2 %v2706_v16 }
 0x64b   : > { %864 = vmatpush.bf16.msrb.mxu2 %v2721_v19 }
 0x64e   : > { %2424 = vmatmul.msk.bf16.gmra.mxu3 %vm403_vm3, %v2781_v28 }
 0x6a1   : > { %v720_v33 = vpop.f32.mrf.mxu3 }
 0x6a2   : > { %v747_v56 = vmul.f32 0.1, %v720_v33 }
 0x6a9   : > { %v722_v38 = vpop.f32.mrf.mxu3 }
 0x6aa   : > { %v748_v50 = vmul.f32 0.1, %v722_v38 }
 0x6b1   : > { %v725_v23 = vpop.f32.mrf.mxu3 }
 0x6b2   : > { %v749_v43 = vmul.f32 0.1, %v725_v23 }
 0x6b4   : > { %v757_v21 = vsub.f32 %v2807_v57, %v749_v43 }
 0x6b9   : > { %v727_v39 = vpop.f32.mrf.mxu3 }
 0x6ba   : > { %v750_v42 = vmul.f32 0.1, %v727_v39 }
 0x6bc   : > { %v758_v52 = vsub.f32 %v2802_v53, %v750_v42  ;;  %v309_v53 = vld [vmem:[%s2904_s18 + $0x8] sm:$0x7f] }
 0x6c1   : > { %v730_v29 = vpop.f32.mrf.mxu3 }
 0x6c2   : > { %v751_v12 = vmul.f32 0.1, %v730_v29 }
 0x6c4   : > { %v759_v49 = vsub.f32 %v2799_v51, %v751_v12  ;;  %v308_v51 = vld [vmem:[%s2904_s18] sm:$0xff] }
 0x6c5   : > { %v310_v57 = vpack.c.bf16 %v309_v53, %v308_v51 }
 0x6c9   : > { %v732_v30 = vpop.f32.mrf.mxu3 }
 0x6ca   : > { %v752_v32 = vmul.f32 0.1, %v732_v30 }
 0x6cc   : > { %v760_v28 = vsub.f32 %v2794_v48, %v752_v32  ;;  %v755_v48 = vsub.f32 %v2815_v62, %v747_v56  ;;  %v740_v62 = vsel %vm527_vm12, %v2873_v9, 0.0 }
 0x6cd   : > { %v741_v33 = vrot.slane %v740_v62, 4 }
 0x6ce   : > { %v777_v59 = vpack.c.bf16 %v760_v28, %v759_v49 }
 0x6cf   : > { %v742_v38 = vadd.f32 %v741_v33, %v740_v62 }
 0x6d1   : > { %v735_v22 = vpop.f32.mrf.mxu3  ;;  %v743_v23 = vrot.slane %v742_v38, 2 }
 0x6d2   : > { %v753_v31 = vmul.f32 0.1, %v735_v22 }
 0x6d3   : > { %v744_v39 = vadd.f32 %v743_v23, %v742_v38 }
 0x6d4   : > { %v761_v40 = vsub.f32 %v2788_v45, %v753_v31  ;;  %v756_v45 = vsub.f32 %v2810_v58, %v748_v50  ;;  %v2917_v58 = vpack.c.bf16 %v2427_v27, %v2427_v27 }
 0x6d5   : > { %v745_v29 = vrot.slane %v744_v39, 1 }
 0x6d6   : > { %v775_v24 = vpack.c.bf16 %v756_v45, %v755_v48 }
 0x6d7   : > { %v746_v30 = vadd.f32 %v745_v29, %v744_v39 }
 0x6d9   : > { %v737_v35 = vpop.f32.mrf.mxu3  ;;  %v763_v22 = vmul.f32 0.1, %v746_v30 }
 0x6da   : > { %v754_v34 = vmul.f32 0.1, %v737_v35 }
 0x6db   : > { %v764_v35 = vsub.f32 %v2847_v63, %v763_v22  ;;  %v677_v63 = vsel %vm359_vm2, %v2865_v55, 0.0 }
 0x6dc   : > { %v762_v41 = vsub.f32 %v2791_v46, %v754_v34  ;;  %v776_v46 = vpack.c.bf16 %v758_v52, %v757_v21  ;;  %v678_v52 = vrot.slane %v677_v63, 4 }
 0x6dd   : > { %v780_v32 = vperm.slane %v764_v35, 0 }
 0x6de   : > { %v778_v25 = vpack.c.bf16 %v762_v41, %v761_v40 }
 0x6e0   : > { %789 = vmatpush.bf16.msra.mxu0 %v778_v25 }
 0x6e4   : > { %790 = vmatpush.bf16.msra.mxu0 %v777_v59  ;;  %v679_v59 = vadd.f32 %v678_v52, %v677_v63 }
 0x6e6   : > { %v680_v56 = vrot.slane %v679_v59, 2 }
 0x6e8   : > { %791 = vmatpush.bf16.msra.mxu0 %v776_v46  ;;  %v681_v21 = vadd.f32 %v680_v56, %v679_v59 }
 0x6ea   : > { %v682_v45 = vrot.slane %v681_v21, 1 }
 0x6ec   : > { %792 = vmatpush.bf16.msra.mxu0 %v775_v24  ;;  %v683_v46 = vadd.f32 %v682_v45, %v681_v21 }
 0x6ee   : > { %v773_v48 = vmul.f32 0.1, %v683_v46 }
 0x6ef   : > { %2425 = vmatmul.msk.bf16.vlgmr.msra.gmra.mxu0 %vm320_vm0, %v310_v57 }
 0x6f0   : > { %843 = vmatpush.bf16.msrb.mxu0 %v2637_v3 }
 0x6f4   : > { %844 = vmatpush.bf16.msrb.mxu0 %v2647_v5 }
 0x6f8   : > { %845 = vmatpush.bf16.msrb.mxu0 %v2670_v8 }
 0x6fc   : > { %846 = vmatpush.bf16.msrb.mxu0 %v2689_v13 }
 0x6ff   : > { %2430 = vmatmul.msk.bf16.vlgmr.msrb.gmra.mxu0 %vm320_vm0, %v2917_v58 }
 0x700   : > { %956 = vmatpush.bf16.xpose.msra.mxu0 %v2744_v36 }
 0x708   : > { %957 = vmatpush.bf16.xpose.msra.mxu0 %v2749_v37 }
 0x76c   : > { %v794_v31 = vpop.f32.mrf.mxu0 }
 0x76d   : > { %v795_v34 = vadd.f32 %v794_v31, %v780_v32 }
 0x76f   : > { %v799_v41 = vmax.f32 %v795_v34, 0.0 }
 0x774   : > { %v796_v12 = vpop.f32.mrf.mxu0 }
 0x775   : > { %v797_v40 = vadd.f32 %v796_v12, %v780_v32 }
 0x777   : > { %v800_v42 = vmax.f32 %v797_v40, 0.0 }
 0x779   : > { %v801_v28 = vpack.c.bf16 %v800_v42, %v799_v41 }
 0x77b   : > { %2426 = vmatmul.msk.bf16.vlgmr.msra.gmra.mxu2 %vm342_vm1, %v801_v28 }
 0x77c   : > { %v848_v9 = vpop.f32.mrf.mxu0 }
 0x77d   : > { %v2927_v25 = vadd.f32 %v2727_v20, %v848_v9  ;;  %v774_v20 = vsub.f32 %v2859_v47, %v773_v48 }
 0x77f   : > { %v852_v43 = vmax.f32 %v2927_v25, 0.0  ;;  %v805_v51 = vperm.slane %v774_v20, 0  ;;  %vm963_vm11 = vcmp.gt.f32.partialorder %v2927_v25, 0.0 }
 0x781   : > { %v853_v49 = vpack.c.bf16 %v852_v43, %v852_v43 }
 0x783   : > { %897 = vxpose.xlu0.c.b16.start.end [1/1] (short) (narrow) %v853_v49, 32 }
 0x784   : > { %v850_v50 = vpop.f32.mrf.mxu0 }
 0x78b   : > { %2431 = vmatmul.msk.bf16.vlgmr.msrb.gmra.mxu2 %vm342_vm1, %v853_v49 }
 0x7fe   : > { %v819_v53 = vpop.f32.mrf.mxu2 }
 0x7ff   : > { %v820_v24 = vadd.f32 %v819_v53, %v805_v51 }
 0x801   : > { %v824_v55 = vmul.f32 2.0, %v820_v24 }
 0x803   : > { %826 = vst.msk [vmem:[%s2939_s22] sm:$0xff] %vm403_vm3, %v824_v55 }
 0x806   : > { %v821_v57 = vpop.f32.mrf.mxu2 }
 0x807   : > { %v822_v27 = vadd.f32 %v821_v57, %v805_v51 }
 0x809   : > { %v825_v62 = vmul.f32 2.0, %v822_v27 }
 0x80b   : > { %828 = vst.msk [vmem:[%s2939_s22 + $0x8] sm:$0x7f] %vm827_vm6, %v825_v62 }
 0x80e   : > { %v866_v47 = vpop.f32.mrf.mxu2 }
 0x80f   : > { %v867_v33 = vadd.f32 %v2737_v26, %v866_v47 }
 0x811   : > { %v870_v38 = vsel %vm359_vm2, %v867_v33, -inf }
 0x812   : > { %871 = vmax.xlane.f32.xlu2 %v870_v38 }
 0x816   : > { %v868_v23 = vpop.f32.mrf.mxu2 }
 0x82f   : > { %v905_v25 = vpop.trf.xlu0 }
 0x83f   : > { %v906_v24 = vpop.trf.xlu0 }
 0x885   : > { %v872_v39 = vpop.xlane.xlu2 %871 }
 0x886   : > { %v873_v29 = vsub.f32 %v867_v33, %v872_v39 }
 0x888   : > { %v874_v30 = vmul.f32 1.442695, %v873_v29 }
 0x88a   : > { %2527 = vpow2.f32 %v874_v30 }
 0x890   : > { %v2528_v22 = vpop.eup %2527 }
 0x891   : > { %v876_v31 = vsel %vm359_vm2, %v2528_v22, 0.0 }
 0x892   : > { %877 = vadd.xlane.f32.xlu2 %v876_v31 }
 0x8bb   : > { %966 = vxpose.xlu2.c.b16.start.end [1/1] (short) (narrow) %v2917_v58, 64 }
 0x905   : > { %v878_v35 = vpop.xlane.xlu2 %877 }
 0x906   : > { %2529 = vrcp.f32 %v878_v35  ;;  %v890_v26 = vand.u32 2147483648, %v878_v35  ;;  %v888_v41 = vand.u32 2147483647, %v878_v35  ;;  %vm884_vm8 = vweird.f32 %v878_v35 }
 0x908   : > { %v891_v28 = vor.u32 1.1754944e-38, %v890_v26  ;;  %vm889_vm10 = vcmp.eq.f32.partialorder %v888_v41, 8.507059e+37 }
 0x90c   : > { %v2530_v32 = vpop.eup %2529 }
 0x90d   : > { %v880_v34 = vmul.f32 %v2530_v32, %v878_v35  ;;  %vm885_vm7 = vweird.f32 %v2530_v32 }
 0x90e   : > { %vm886_vm9 = vmor %vm884_vm8, %vm885_vm7 }
 0x90f   : > { %v881_v12 = vsub.f32 1.0, %v880_v34 }
 0x911   : > { %v882_v40 = vmul.f32 %v2530_v32, %v881_v12 }
 0x913   : > { %v883_v42 = vadd.f32 %v2530_v32, %v882_v40 }
 0x915   : > { %v887_v9 = vsel %vm886_vm9, %v2530_v32, %v883_v42 }
 0x916   : > { %v892_v43 = vsel %vm889_vm10, %v891_v28, %v887_v9 }
 0x917   : > { %v893_v49 = vmul.f32 %v2528_v22, %v892_v43 }
 0x919   : > { %v894_v50 = vsub.f32 %v893_v49, %v2752_v54 }
 0x91b   : > { %v2950_v63 = vmul.f32 0.2, %v894_v50 }
 0x91d   : > { %v896_v52 = vpack.c.bf16 %v2950_v63, %v2950_v63 }
 0x91f   : > { %2434 = vmatmul.msk.bf16.vlgmr.msra.gmra.mxu0 %vm403_vm3, %v896_v52  ;;  %v920_v59 = vand.u32 %v896_v52, %v2757_v60 }
 0x921   : > { %929 = vmatpush.bf16.msra.mxu1 %v920_v59 }
 0x924   : > { %2432 = vmatmul.msk.bf16.vlgmr.msra.gmra.mxu1 %vm403_vm3, %v905_v25 }
 0x934   : > { %2433 = vmatmul.msk.bf16.gmra.mxu1 %vm403_vm3, %v906_v24 }
 0x95c   : > { %v2962_v48 = vpop.trf.xlu2 }
 0x96c   : > { %v2968_v51 = vpop.trf.xlu2 }
 0x97c   : > { %v2973_v53 = vpop.trf.xlu2 }
 0x98c   : > { %v2978_v55 = vpop.trf.xlu2 }
 0x99c   : > { %v959_v56 = vpop.f32.mrf.mxu0 }
 0x99d   : > { %v2957_v21 = vsel %vm963_vm11, %v959_v56, 0.0 }
 0x99e   : > { %v965_v45 = vpack.c.bf16 %v2957_v21, %v2957_v21 }
 0x9a0   : > { %v995_v46 = vand.u32 %v965_v45, %v2757_v60 }
 0x9a1   : > { %v931_v23 = vpop.f32.mrf.mxu1 }
 0x9a2   : > { %1004 = vmatpush.bf16.msra.mxu2 %v995_v46  ;;  %v1051_v59 = vmul.f32 0.1, %v931_v23 }
 0x9a4   : > { %v961_v20 = vpop.f32.mrf.mxu0 }
 0x9a5   : > { %2435 = vmatmul.msk.bf16.vlgmr.msra.gmra.mxu2 %vm403_vm3, %v2962_v48 }
 0x9a6   : > { %1361 = vmatpush.bf16.msrb.mxu2 %v2706_v16 }
 0x9a9   : > { %v933_v29 = vpop.f32.mrf.mxu1 }
 0x9aa   : > { %1362 = vmatpush.bf16.msrb.mxu2 %v2721_v19  ;;  %v1052_v56 = vmul.f32 0.1, %v933_v29 }
 0x9ac   : > { %v3021_v25 = vsub.f32 %v2717_v18, %v1052_v56 }
 0x9b1   : > { %v936_v42 = vpop.f32.mrf.mxu1 }
 0x9b2   : > { %v1053_v50 = vmul.f32 0.1, %v936_v42 }
 0x9b4   : > { %v3013_v46 = vsub.f32 %v2697_v14, %v1053_v50 }
 0x9b5   : > { %2436 = vmatmul.msk.bf16.gmra.mxu2 %vm403_vm3, %v2968_v51 }
 0x9b9   : > { %v938_v45 = vpop.f32.mrf.mxu1 }
 0x9c5   : > { %2437 = vmatmul.msk.bf16.gmra.mxu2 %vm403_vm3, %v2973_v53 }
 0x9d5   : > { %2438 = vmatmul.msk.bf16.gmra.mxu2 %vm403_vm3, %v2978_v55 }
 0xa28   : > { %v1006_v57 = vpop.f32.mrf.mxu2 }
 0xa29   : > { %v1033_v49 = vmul.f32 0.1, %v1006_v57 }
 0xa30   : > { %v1008_v27 = vpop.f32.mrf.mxu2 }
 0xa31   : > { %v1034_v43 = vmul.f32 0.1, %v1008_v27 }
 0xa33   : > { %v3005_v52 = vsub.f32 %v2681_v11, %v1034_v43  ;;  %v3018_v11 = vsub.f32 %v2712_v17, %v1051_v59 }
 0xa35   : > { %v1065_v57 = vpack.c.bf16 %v3021_v25, %v3018_v11 }
 0xa37   : > { %v1185_v17 = vsel %vm403_vm3, %v1065_v57, 0 }
 0xa38   : > { %v1011_v62 = vpop.f32.mrf.mxu2 }
 0xa39   : > { %v1035_v28 = vmul.f32 0.1, %v1011_v62 }
 0xa40   : > { %v1013_v47 = vpop.f32.mrf.mxu2 }
 0xa41   : > { %v1036_v26 = vmul.f32 0.1, %v1013_v47 }
 0xa48   : > { %v1016_v33 = vpop.f32.mrf.mxu2 }
 0xa49   : > { %v1037_v32 = vmul.f32 0.1, %v1016_v33 }
 0xa4b   : > { %v2994_v9 = vsub.f32 %v2633_v2, %v1037_v32 }
 0xa50   : > { %v1018_v38 = vpop.f32.mrf.mxu2 }
 0xa51   : > { %v1038_v31 = vmul.f32 0.1, %v1018_v38 }
 0xa53   : > { %v2989_v40 = vsub.f32 %v2642_v4, %v1038_v31  ;;  %v3002_v4 = vsub.f32 %v2654_v6, %v1035_v28  ;;  %v1054_v6 = vmul.f32 0.1, %v938_v45 }
 0xa55   : > { %v3024_v24 = vsub.f32 %v2702_v15, %v1054_v6  ;;  %v1026_v15 = vsel %vm527_vm12, %v2957_v21, 0.0 }
 0xa56   : > { %v1027_v18 = vrot.slane %v1026_v15, 4 }
 0xa58   : > { %v1021_v39 = vpop.f32.mrf.mxu2  ;;  %v1028_v27 = vadd.f32 %v1027_v18, %v1026_v15 }
 0xa59   : > { %v1039_v30 = vmul.f32 0.1, %v1021_v39 }
 0xa5a   : > { %v1029_v62 = vrot.slane %v1028_v27, 2 }
 0xa5b   : > { %v2983_v34 = vsub.f32 %v2623_v0, %v1039_v30  ;;  %v2997_v0 = vsub.f32 %v2659_v7, %v1036_v26  ;;  %v3010_v7 = vsub.f32 %v2676_v10, %v1033_v49  ;;  %v1066_v10 = vpack.c.bf16 %v3024_v24, %v3013_v46 }
 0xa5c   : > { %v1030_v47 = vadd.f32 %v1029_v62, %v1028_v27 }
 0xa5d   : > { %v1062_v2 = vpack.c.bf16 %v2997_v0, %v3002_v4  ;;  %v1061_v20 = vpack.c.bf16 %v3005_v52, %v3010_v7  ;;  %v1188_v14 = vsel %vm403_vm3, %v1066_v10, 0  ;;  %1097 = vmatpush.bf16.msra.mxu3 %v1066_v10 }
 0xa5e   : > { %v1031_v33 = vrot.slane %v1030_v47, 1 }
 0xa60   : > { %v1023_v22 = vpop.f32.mrf.mxu2  ;;  %v1032_v38 = vadd.f32 %v1031_v33, %v1030_v47 }
 0xa61   : > { %v1040_v35 = vmul.f32 0.1, %v1023_v22  ;;  %1098 = vmatpush.bf16.msra.mxu3 %v1065_v57 }
 0xa62   : > { %v1049_v23 = vmul.f32 0.1, %v1032_v38 }
 0xa63   : > { %v2986_v12 = vsub.f32 %v2628_v1, %v1040_v35  ;;  %v1063_v1 = vpack.c.bf16 %v2989_v40, %v2994_v9  ;;  %v941_v35 = vsel %vm359_vm2, %v2950_v63, 0.0 }
 0xa64   : > { %v3037_v39 = vsub.f32 %v2844_v61, %v1049_v23  ;;  %v942_v32 = vrot.slane %v941_v35, 4 }
 0xa65   : > { %v1064_v41 = vpack.c.bf16 %v2986_v12, %v2983_v34 }
 0xa66   : > { %v943_v26 = vadd.f32 %v942_v32, %v941_v35 }
 0xa67   : > { %1074 = vmatpush.bf16.msrb.mxu0 %v1064_v41 }
 0xa68   : > { %v944_v41 = vrot.slane %v943_v26, 2 }
 0xa6a   : > { %v945_v42 = vadd.f32 %v944_v41, %v943_v26 }
 0xa6b   : > { %1075 = vmatpush.bf16.msrb.mxu0 %v1063_v1 }
 0xa6c   : > { %v946_v61 = vrot.slane %v945_v42, 1 }
 0xa6e   : > { %v947_v28 = vadd.f32 %v946_v61, %v945_v42 }
 0xa6f   : > { %1076 = vmatpush.bf16.msrb.mxu0 %v1062_v2 }
 0xa70   : > { %v1059_v43 = vmul.f32 0.1, %v947_v28 }
 0xa72   : > { %v3047_v1 = vsub.f32 %v2856_v44, %v1059_v43 }
 0xa73   : > { %1077 = vmatpush.bf16.msrb.mxu0 %v1061_v20 }
 0xa74   : > { %v1086_v49 = vperm.slane %v3047_v1, 0 }
 0xa76   : > { %2439 = vmatmul.msk.bf16.vlgmr.msrb.gmra.mxu0 %vm320_vm0, %v2917_v58  ;;  %v1068_v58 = vperm.slane %v3037_v39, 0 }
 0xa77   : > { %1196 = vmatpush.bf16.xpose.msra.mxu0 %v1188_v14 }
 0xa7f   : > { %1197 = vmatpush.bf16.xpose.msra.mxu0 %v1185_v17 }
 0xaf3   : > { %v1079_v29 = vpop.f32.mrf.mxu0 }
 0xaf4   : > { %v1080_v30 = vadd.f32 %v1079_v29, %v1068_v58 }
 0xaf6   : > { %v1083_v22 = vmax.f32 %v1080_v30, 0.0  ;;  %vm1203_vm5 = vcmp.gt.f32.partialorder %v1080_v30, 0.0 }
 0xaf8   : > { %v3040_v31 = vpack.c.bf16 %v1083_v22, %v1083_v22 }
 0xafa   : > { %2440 = vmatmul.msk.bf16.vlgmr.msra.gmra.mxu3 %vm342_vm1, %v3040_v31 }
 0xafb   : > { %v1081_v21 = vpop.f32.mrf.mxu0 }
 0xb7d   : > { %v1100_v50 = vpop.f32.mrf.mxu3 }
 0xb7e   : > { %v1101_v2 = vadd.f32 %v1100_v50, %v1086_v49 }
 0xb80   : > { %v1104_v59 = vsel %vm359_vm2, %v1101_v2, -inf }
 0xb81   : > { %1105 = vmax.xlane.f32.xlu1 %v1104_v59 }
 0xb85   : > { %v1102_v56 = vpop.f32.mrf.mxu3 }
 0xbf4   : > { %v1106_v45 = vpop.xlane.xlu1 %1105 }
 0xbf5   : > { %v1107_v63 = vsub.f32 %v1101_v2, %v1106_v45 }
 0xbf7   : > { %v1108_v6 = vmul.f32 1.442695, %v1107_v63 }
 0xbf9   : > { %2531 = vpow2.f32 %v1108_v6 }
 0xbff   : > { %v2532_v20 = vpop.eup %2531 }
 0xc00   : > { %v1110_v10 = vsel %vm359_vm2, %v2532_v20, 0.0 }
 0xc01   : > { %1111 = vadd.xlane.f32.xlu2 %v1110_v10 }
 0xc74   : > { %v1112_v14 = vpop.xlane.xlu2 %1111 }
 0xc75   : > { %2533 = vrcp.f32 %v1112_v14  ;;  %v1124_v15 = vand.u32 2147483648, %v1112_v14  ;;  %v1122_v27 = vand.u32 2147483647, %v1112_v14  ;;  %vm1118_vm14 = vweird.f32 %v1112_v14 }
 0xc77   : > { %v1125_v47 = vor.u32 1.1754944e-38, %v1124_v15  ;;  %vm1123_vm4 = vcmp.eq.f32.partialorder %v1122_v27, 8.507059e+37  ;;  %v2428_v27 = vld [vmem:[%s2904_s18 + $0x10] sm:$0xff] }
 0xc7b   : > { %v2534_v44 = vpop.eup %2533 }
 0xc7c   : > { %v1114_v57 = vmul.f32 %v2534_v44, %v1112_v14  ;;  %vm1119_vm13 = vweird.f32 %v2534_v44 }
 0xc7d   : > { %vm1120_vm15 = vmor %vm1118_vm14, %vm1119_vm13 }
 0xc7e   : > { %v1115_v17 = vsub.f32 1.0, %v1114_v57 }
 0xc80   : > { %v1116_v18 = vmul.f32 %v2534_v44, %v1115_v17 }
 0xc82   : > { %v1117_v62 = vadd.f32 %v2534_v44, %v1116_v18 }
 0xc84   : > { %v1121_v33 = vsel %vm1120_vm15, %v2534_v44, %v1117_v62  ;;  %v2429_v62 = vld [vmem:[%s2904_s18 + $0x18] sm:$0x7f] }
 0xc85   : > { %v1126_v38 = vsel %vm1123_vm4, %v1125_v47, %v1121_v33 }
 0xc86   : > { %v1127_v23 = vmul.f32 %v2532_v20, %v1126_v38 }
 0xc88   : > { %v1128_v58 = vsub.f32 %v1127_v23, %v2752_v54 }
 0xc8a   : > { %v3053_v29 = vmul.f32 0.2, %v1128_v58 }
 0xc8c   : > { %v1130_v22 = vpack.c.bf16 %v3053_v29, %v3053_v29 }
 0xc8e   : > { %2443 = vmatmul.msk.bf16.vlgmr.msra.gmra.mxu0 %vm403_vm3, %v1130_v22  ;;  %v1154_v21 = vand.u32 %v1130_v22, %v2757_v60 }
 0xc90   : > { %1163 = vmatpush.bf16.msrb.mxu1 %v1154_v21 }
 0xd0b   : > { %v1199_v35 = vpop.f32.mrf.mxu0 }
 0xd0c   : > { %v1204_v32 = vsel %vm1203_vm5, %v1199_v35, 0.0 }
 0xd0d   : > { %v1205_v26 = vpack.c.bf16 %v1204_v32, %v1204_v32 }
 0xd0f   : > { %v1207_v41 = vand.u32 %v1205_v26, %v2757_v60 }
 0xd11   : > { %1216 = vmatpush.bf16.msrb.mxu3 %v1207_v41 }
 0xd13   : > { %v1201_v42 = vpop.f32.mrf.mxu0 }
 0xd14   : > { %2444 = vmatmul.msk.bf16.vlgmr.msrb.gmra.mxu3 %vm403_vm3, %v2962_v48 }
 0xd24   : > { %2445 = vmatmul.msk.bf16.gmra.mxu3 %vm403_vm3, %v2968_v51 }
 0xd34   : > { %2446 = vmatmul.msk.bf16.gmra.mxu3 %vm403_vm3, %v2973_v53 }
 0xd44   : > { %2447 = vmatmul.msk.bf16.gmra.mxu3 %vm403_vm3, %v2978_v55 }
 0xd97   : > { %v1218_v61 = vpop.f32.mrf.mxu3 }
 0xd98   : > { %v1245_v15 = vmul.f32 0.1, %v1218_v61 }
 0xd9f   : > { %v1220_v30 = vpop.f32.mrf.mxu3 }
 0xda0   : > { %v1246_v44 = vmul.f32 0.1, %v1220_v30 }
 0xda7   : > { %v1223_v28 = vpop.f32.mrf.mxu3 }
 0xda8   : > { %v1247_v10 = vmul.f32 0.1, %v1223_v28 }
 0xdaf   : > { %v1225_v43 = vpop.f32.mrf.mxu3 }
 0xdb0   : > { %v1248_v53 = vmul.f32 0.1, %v1225_v43 }
 0xdb2   : > { %v1256_v57 = vsub.f32 %v2997_v0, %v1248_v53  ;;  %v2452_v0 = vld [vmem:[%s2665_s15 + $0x10] sm:$0x1f] }
 0xdb7   : > { %v1228_v49 = vpop.f32.mrf.mxu3 }
 0xdb8   : > { %v1249_v63 = vmul.f32 0.1, %v1228_v49 }
 0xdba   : > { %v1257_v14 = vsub.f32 %v2994_v9, %v1249_v63  ;;  %v835_v9 = vpack.c.bf16 %v2429_v62, %v2428_v27 }
 0xdbf   : > { %v1230_v50 = vpop.f32.mrf.mxu3 }
 0xdc0   : > { %v1250_v45 = vmul.f32 0.1, %v1230_v50 }
 0xdc2   : > { %v1258_v55 = vsub.f32 %v2989_v40, %v1250_v45  ;;  %v1253_v40 = vsub.f32 %v3010_v7, %v1245_v15 }
 0xdc4   : > { %v1275_v17 = vpack.c.bf16 %v1258_v55, %v1257_v14 }
 0xdc7   : > { %v1233_v2 = vpop.f32.mrf.mxu3 }
 0xdc8   : > { %v1251_v59 = vmul.f32 0.1, %v1233_v2 }
 0xdca   : > { %v1259_v51 = vsub.f32 %v2983_v34, %v1251_v59  ;;  %v1255_v34 = vsub.f32 %v3002_v4, %v1247_v10  ;;  %v3085_v4 = vpack.c.bf16 %v2452_v0, %v2452_v0 }
 0xdcc   : > { %v1274_v18 = vpack.c.bf16 %v1256_v57, %v1255_v34 }
 0xdcf   : > { %v1235_v56 = vpop.f32.mrf.mxu3 }
 0xdd0   : > { %v1252_v48 = vmul.f32 0.1, %v1235_v56 }
 0xdd2   : > { %v1260_v6 = vsub.f32 %v2986_v12, %v1252_v48  ;;  %v1254_v12 = vsub.f32 %v3005_v52, %v1246_v44  ;;  %v1238_v52 = vsel %vm527_vm12, %v1204_v32, 0.0  ;;  %v3097_v32 = vld [vmem:[%s3508_s3] ss:$0 sm:$0xff] }
 0xdd3   : > { %v1239_v7 = vrot.slane %v1238_v52, 4  ;;  %v3104_v48 = vld [vmem:[%s3510_s5] ss:$0 sm:$0xff] }
 0xdd4   : > { %v1276_v20 = vpack.c.bf16 %v1260_v6, %v1259_v51  ;;  %v1273_v47 = vpack.c.bf16 %v1254_v12, %v1253_v40 }
 0xdd5   : > { %v1240_v33 = vadd.f32 %v1239_v7, %v1238_v52 }
 0xdd6   : > { %1287 = vmatpush.bf16.msrb.mxu0 %v1276_v20 }
 0xdd7   : > { %v1241_v38 = vrot.slane %v1240_v33, 2 }
 0xdd9   : > { %v1242_v23 = vadd.f32 %v1241_v38, %v1240_v33 }
 0xdda   : > { %1288 = vmatpush.bf16.msrb.mxu0 %v1275_v17 }
 0xddb   : > { %v1243_v58 = vrot.slane %v1242_v23, 1 }
 0xddd   : > { %v1244_v22 = vadd.f32 %v1243_v58, %v1242_v23 }
 0xdde   : > { %1289 = vmatpush.bf16.msrb.mxu0 %v1274_v18 }
 0xddf   : > { %v1261_v21 = vmul.f32 0.1, %v1244_v22 }
 0xde1   : > { %v1262_v35 = vsub.f32 %v3037_v39, %v1261_v21 }
 0xde2   : > { %1290 = vmatpush.bf16.msrb.mxu0 %v1273_v47 }
 0xde3   : > { %v1278_v26 = vperm.slane %v1262_v35, 0 }
 0xde5   : > { %2448 = vmatmul.msk.bf16.vlgmr.msrb.gmra.mxu0 %vm320_vm0, %v835_v9 }
 0xde6   : > { %1341 = vmatpush.bf16.msra.mxu0 %v2637_v3 }
 0xdea   : > { %1342 = vmatpush.bf16.msra.mxu0 %v2647_v5 }
 0xdee   : > { %1343 = vmatpush.bf16.msra.mxu0 %v2670_v8 }
 0xdf2   : > { %1344 = vmatpush.bf16.msra.mxu0 %v2689_v13 }
 0xdf5   : > { %2455 = vmatmul.msk.bf16.vlgmr.msra.gmra.mxu0 %vm320_vm0, %v3085_v4 }
 0xdf6   : > { %1454 = vmatpush.bf16.xpose.msrb.mxu0 %v2744_v36 }
 0xdfe   : > { %1455 = vmatpush.bf16.xpose.msrb.mxu0 %v2749_v37 }
 0xe62   : > { %v1292_v41 = vpop.f32.mrf.mxu0 }
 0xe63   : > { %v1293_v42 = vadd.f32 %v1292_v41, %v1278_v26 }
 0xe65   : > { %v1297_v28 = vmax.f32 %v1293_v42, 0.0 }
 0xe6a   : > { %v1294_v61 = vpop.f32.mrf.mxu0 }
 0xe6b   : > { %v1295_v30 = vadd.f32 %v1294_v61, %v1278_v26 }
 0xe6d   : > { %v1298_v43 = vmax.f32 %v1295_v30, 0.0 }
 0xe6f   : > { %v3092_v49 = vpack.c.bf16 %v1298_v43, %v1297_v28 }
 0xe72   : > { %v1346_v50 = vpop.f32.mrf.mxu0 }
 0xe73   : > { %v1347_v2 = vadd.f32 %v3097_v32, %v1346_v50 }
 0xe75   : > { %v1350_v59 = vmax.f32 %v1347_v2, 0.0  ;;  %vm1461_vm11 = vcmp.gt.f32.partialorder %v1347_v2, 0.0 }
 0xe77   : > { %v1351_v56 = vpack.c.bf16 %v1350_v59, %v1350_v59 }
 0xe79   : > { %1395 = vxpose.xlu2.c.b16.start.end [1/1] (short) (narrow) %v1351_v56, 32  ;;  %2456 = vmatmul.msk.bf16.vlgmr.msrb.gmra.mxu2 %vm342_vm1, %v1351_v56 }
 0xe7a   : > { %v1348_v39 = vpop.f32.mrf.mxu0 }
 0xefc   : > { %v1364_v45 = vpop.f32.mrf.mxu2 }
 0xefd   : > { %v1365_v63 = vadd.f32 %v3104_v48, %v1364_v45 }
 0xeff   : > { %v1368_v51 = vsel %vm359_vm2, %v1365_v63, -inf }
 0xf00   : > { %1369 = vmax.xlane.f32.xlu0 %v1368_v51 }
 0xf04   : > { %v1366_v6 = vpop.f32.mrf.mxu2 }
 0xf29   : > { %1464 = vxpose.xlu0.c.b16.start.end [1/1] (short) (narrow) %v3085_v4, 64 }
 0xf73   : > { %v1370_v53 = vpop.xlane.xlu0 %1369 }
 0xf74   : > { %v1371_v55 = vsub.f32 %v1365_v63, %v1370_v53 }
 0xf76   : > { %v1372_v20 = vmul.f32 1.442695, %v1371_v55  ;;  %v1403_v55 = vpop.trf.xlu2 }
 0xf78   : > { %2535 = vpow2.f32 %v1372_v20 }
 0xf7e   : > { %v2536_v10 = vpop.eup %2535  ;;  %v1404_v20 = vpop.trf.xlu2 }
 0xf7f   : > { %v1374_v14 = vsel %vm359_vm2, %v2536_v10, 0.0 }
 0xf80   : > { %1375 = vadd.xlane.f32.xlu1 %v1374_v14 }
 0xfba   : > { %1131 = vxpose.xlu1.c.b16.start.end [1/1] (short) (narrow) %v3040_v31, 32 }
 0xfd5   : > { %v3124_v21 = vpop.trf.xlu0 }
 0xfe5   : > { %v3130_v26 = vpop.trf.xlu0 }
 0xff3   : > { %v1376_v44 = vpop.xlane.xlu1 %1375 }
 0xff4   : > { %2537 = vrcp.f32 %v1376_v44  ;;  %v1388_v34 = vand.u32 2147483648, %v1376_v44  ;;  %v1386_v18 = vand.u32 2147483647, %v1376_v44  ;;  %vm1382_vm8 = vweird.f32 %v1376_v44 }
 0xff5   : > { %v3134_v41 = vpop.trf.xlu0 }
 0xff6   : > { %v1389_v27 = vor.u32 1.1754944e-38, %v1388_v34  ;;  %vm1387_vm10 = vcmp.eq.f32.partialorder %v1386_v18, 8.507059e+37  ;;  %v3162_v18 = vld [vmem:[%s3507_s2 + $0x38] sm:$0xff] }
 0xffa   : > { %v2538_v57 = vpop.eup %2537 }
 0xffb   : > { %v1378_v17 = vmul.f32 %v2538_v57, %v1376_v44  ;;  %vm1383_vm7 = vweird.f32 %v2538_v57 }
 0xffc   : > { %vm1384_vm9 = vmor %vm1382_vm8, %vm1383_vm7 }
 0xffd   : > { %v1379_v15 = vsub.f32 1.0, %v1378_v17 }
 0xfff   : > { %v1380_v12 = vmul.f32 %v2538_v57, %v1379_v15 }
0x1001   : > { %v1381_v40 = vadd.f32 %v2538_v57, %v1380_v12 }
0x1003   : > { %v1385_v62 = vsel %vm1384_vm9, %v2538_v57, %v1381_v40 }
0x1004   : > { %v1390_v47 = vsel %vm1387_vm10, %v1389_v27, %v1385_v62  ;;  %v3170_v62 = vld [vmem:[%s3507_s2 + $0x28] sm:$0xff] }
0x1005   : > { %v1391_v9 = vmul.f32 %v2536_v10, %v1390_v47  ;;  %v3138_v42 = vpop.trf.xlu0 }
0x1007   : > { %v1392_v0 = vsub.f32 %v1391_v9, %v2752_v54 }
0x1009   : > { %v3112_v31 = vmul.f32 0.2, %v1392_v0 }
0x100b   : > { %v1394_v52 = vpack.c.bf16 %v3112_v31, %v3112_v31 }
0x100d   : > { %2459 = vmatmul.msk.bf16.vlgmr.msrb.gmra.mxu0 %vm403_vm3, %v1394_v52  ;;  %v1418_v6 = vand.u32 %v1394_v52, %v2757_v60  ;;  %v3180_v52 = vld [vmem:[%s3507_s2 + $0x20] sm:$0xff] }
0x1066   : > { %v1139_v7 = vpop.trf.xlu1 }
0x1067   : > { %2441 = vmatmul.msk.bf16.vlgmr.msrb.gmra.mxu1 %vm403_vm3, %v1139_v7 }
0x1076   : > { %v1140_v33 = vpop.trf.xlu1 }
0x1077   : > { %2442 = vmatmul.msk.bf16.gmra.mxu1 %vm403_vm3, %v1140_v33 }
0x108a   : > { %v1457_v38 = vpop.f32.mrf.mxu0 }
0x108b   : > { %v3119_v23 = vsel %vm1461_vm11, %v1457_v38, 0.0  ;;  %v3188_v38 = vld [vmem:[%s3507_s2 + $0x18] sm:$0xff] }
0x108c   : > { %v1463_v58 = vpack.c.bf16 %v3119_v23, %v3119_v23 }
0x108e   : > { %v1493_v22 = vand.u32 %v1463_v58, %v2757_v60 }
0x1090   : > { %1502 = vmatpush.bf16.msra.mxu2 %v1493_v22 }
0x1092   : > { %v1459_v35 = vpop.f32.mrf.mxu0 }
0x1093   : > { %2460 = vmatmul.msk.bf16.vlgmr.msra.gmra.mxu2 %vm403_vm3, %v3124_v21 }
0x1094   : > { %1859 = vmatpush.bf16.msrb.mxu2 %v2706_v16 }
0x1098   : > { %1860 = vmatpush.bf16.msrb.mxu2 %v2721_v19 }
0x10a3   : > { %2461 = vmatmul.msk.bf16.gmra.mxu2 %vm403_vm3, %v3130_v26 }
0x10b3   : > { %2462 = vmatmul.msk.bf16.gmra.mxu2 %vm403_vm3, %v3134_v41 }
0x10c3   : > { %2463 = vmatmul.msk.bf16.gmra.mxu2 %vm403_vm3, %v3138_v42 }
0x10e4   : > { %v1165_v16 = vpop.f32.mrf.mxu1 }
0x10e5   : > { %v1263_v2 = vmul.f32 0.1, %v1165_v16  ;;  %v3198_v16 = vld [vmem:[%s3507_s2 + $0x10] sm:$0xff] }
0x10e7   : > { %v1267_v63 = vsub.f32 %v3018_v11, %v1263_v2 }
0x10ec   : > { %v1167_v61 = vpop.f32.mrf.mxu1 }
0x10ed   : > { %v1264_v43 = vmul.f32 0.1, %v1167_v61 }
0x10ef   : > { %v1268_v39 = vsub.f32 %v3021_v25, %v1264_v43  ;;  %v3216_v43 = vld [vmem:[%s3507_s2] sm:$0xff] }
0x10f1   : > { %v1300_v51 = vpack.c.bf16 %v1268_v39, %v1267_v63 }
0x10f4   : > { %v1170_v30 = vpop.f32.mrf.mxu1 }
0x10f5   : > { %v1265_v28 = vmul.f32 0.1, %v1170_v30  ;;  %v3206_v30 = vld [vmem:[%s3507_s2 + $0x8] sm:$0xff] }
0x10f7   : > { %v1269_v59 = vsub.f32 %v3013_v46, %v1265_v28 }
0x10fc   : > { %v1172_v19 = vpop.f32.mrf.mxu1 }
0x10fd   : > { %v1266_v50 = vmul.f32 0.1, %v1172_v19 }
0x10ff   : > { %v1270_v56 = vsub.f32 %v3024_v24, %v1266_v50 }
0x1101   : > { %v1301_v45 = vpack.c.bf16 %v1270_v56, %v1269_v59  ;;  %v1175_v59 = vsel %vm359_vm2, %v3053_v29, 0.0 }
0x1102   : > { %v1176_v56 = vrot.slane %v1175_v59, 4 }
0x1103   : > { %1314 = vmatpush.bf16.msra.mxu1 %v1301_v45 }
0x1104   : > { %v1177_v39 = vadd.f32 %v1176_v56, %v1175_v59 }
0x1106   : > { %v1178_v45 = vrot.slane %v1177_v39, 2 }
0x1107   : > { %1315 = vmatpush.bf16.msra.mxu1 %v1300_v51 }
0x1108   : > { %v1179_v63 = vadd.f32 %v1178_v45, %v1177_v39 }
0x110a   : > { %2449 = vmatmul.msk.bf16.vlgmr.msra.gmra.mxu1 %vm342_vm1, %v3092_v49  ;;  %v3154_v49 = vld [vmem:[%s3507_s2 + $0x30] sm:$0xff]  ;;  %v1180_v51 = vrot.slane %v1179_v63, 1 }
0x110b   : > { %1427 = vmatpush.bf16.msrb.mxu1 %v1418_v6 }
0x110c   : > { %v1181_v6 = vadd.f32 %v1180_v51, %v1179_v63  ;;  %v1524_v63 = vsel %vm527_vm12, %v3119_v23, 0.0 }
0x110d   : > { %v1525_v51 = vrot.slane %v1524_v63, 4 }
0x1116   : > { %v1504_v53 = vpop.f32.mrf.mxu2 }
0x1117   : > { %v1531_v35 = vmul.f32 0.1, %v1504_v53  ;;  %v1271_v53 = vmul.f32 0.1, %v1181_v6  ;;  %v1526_v6 = vadd.f32 %v1525_v51, %v1524_v63 }
0x1119   : > { %v3219_v50 = vsub.f32 %v3216_v43, %v1531_v35 }
0x111a   : > { %2457 = vmatmul.msk.bf16.vlgmr.msrb.gmra.mxu1 %vm403_vm3, %v1403_v55  ;;  %v1272_v55 = vsub.f32 %v3047_v1, %v1271_v53  ;;  %v3235_v1 = vld [vmem:[%s3509_s4 + $0x10] sm:$0xff]  ;;  %v1527_v53 = vrot.slane %v1526_v6, 2 }
0x111e   : > { %v1506_v46 = vpop.f32.mrf.mxu2 }
0x111f   : > { %v1532_v33 = vmul.f32 0.1, %v1506_v46  ;;  %v1303_v46 = vperm.slane %v1272_v55, 0  ;;  %v1528_v55 = vadd.f32 %v1527_v53, %v1526_v6 }
0x1121   : > { %v3209_v28 = vsub.f32 %v3206_v30, %v1532_v33 }
0x1123   : > { %v1559_v2 = vpack.c.bf16 %v3209_v28, %v3219_v50 }
0x1126   : > { %v1509_v24 = vpop.f32.mrf.mxu2 }
0x1127   : > { %v1533_v0 = vmul.f32 0.1, %v1509_v24 }
0x1129   : > { %v3201_v61 = vsub.f32 %v3198_v16, %v1533_v0  ;;  %v3243_v0 = vld [vmem:[%s3509_s4] sm:$0xff] }
0x112a   : > { %2458 = vmatmul.msk.bf16.gmra.mxu1 %vm403_vm3, %v1404_v20 }
0x112e   : > { %v1511_v25 = vpop.f32.mrf.mxu2 }
0x112f   : > { %v1534_v27 = vmul.f32 0.1, %v1511_v25 }
0x1131   : > { %v3191_v58 = vsub.f32 %v3188_v38, %v1534_v27 }
0x1133   : > { %v1560_v19 = vpack.c.bf16 %v3191_v58, %v3201_v61 }
0x1136   : > { %v1514_v11 = vpop.f32.mrf.mxu2 }
0x1137   : > { %v1535_v34 = vmul.f32 0.1, %v1514_v11 }
0x1139   : > { %v3183_v7 = vsub.f32 %v3180_v52, %v1535_v34 }
0x113e   : > { %v1516_v10 = vpop.f32.mrf.mxu2 }
0x113f   : > { %v1536_v17 = vmul.f32 0.1, %v1516_v10 }
0x1141   : > { %v3173_v47 = vsub.f32 %v3170_v62, %v1536_v17 }
0x1143   : > { %v1561_v22 = vpack.c.bf16 %v3173_v47, %v3183_v7 }
0x1146   : > { %v1519_v14 = vpop.f32.mrf.mxu2 }
0x1147   : > { %v1537_v44 = vmul.f32 0.1, %v1519_v14 }
0x1149   : > { %v3157_v12 = vsub.f32 %v3154_v49, %v1537_v44 }
0x114e   : > { %v1521_v57 = vpop.f32.mrf.mxu2 }
0x114f   : > { %v1538_v15 = vmul.f32 0.1, %v1521_v57 }
0x1151   : > { %v3165_v40 = vsub.f32 %v3162_v18, %v1538_v15 }
0x1153   : > { %v1562_v9 = vpack.c.bf16 %v3165_v40, %v3157_v12 }
0x1155   : > { %1572 = vmatpush.bf16.msra.mxu0 %v1562_v9 }
0x1159   : > { %1573 = vmatpush.bf16.msra.mxu0 %v1561_v22  ;;  %v3251_v22 = vld [vmem:[%s3509_s4 + $0x8] sm:$0xff] }
0x115d   : > { %1574 = vmatpush.bf16.msra.mxu0 %v1560_v19  ;;  %v3259_v19 = vld [vmem:[%s3509_s4 + $0x18] sm:$0xff] }
0x1161   : > { %1575 = vmatpush.bf16.msra.mxu0 %v1559_v2 }
0x1164   : > { %2464 = vmatmul.msk.bf16.vlgmr.msra.gmra.mxu0 %vm320_vm0, %v3085_v4 }
0x1187   : > { %v1317_v24 = vpop.f32.mrf.mxu1 }
0x1188   : > { %v1318_v20 = vadd.f32 %v1317_v24, %v1303_v46 }
0x118a   : > { %v1322_v25 = vmul.f32 2.0, %v1318_v20 }
0x118c   : > { %2450 = vst.msk [vmem:[%s2939_s22 + $0x10] sm:$0xff] %vm403_vm3, %v1322_v25  ;;  %v3275_v25 = vld [vmem:[%s3508_s3] sm:$0x1] }
0x118f   : > { %v1319_v29 = vpop.f32.mrf.mxu1 }
0x1190   : > { %v1320_v11 = vadd.f32 %v1319_v29, %v1303_v46  ;;  %v1529_v46 = vrot.slane %v1528_v55, 1 }
0x1192   : > { %v1323_v10 = vmul.f32 2.0, %v1320_v11  ;;  %v1530_v24 = vadd.f32 %v1529_v46, %v1528_v55 }
0x1194   : > { %2451 = vst.msk [vmem:[%s2939_s22 + $0x18] sm:$0x7f] %vm827_vm6, %v1323_v10  ;;  %v1547_v20 = vmul.f32 0.1, %v1530_v24 }
0x1196   : > { %v3278_v29 = vsub.f32 %v3275_v25, %v1547_v20 }
0x1197   : > { %v1429_v4 = vpop.f32.mrf.mxu1 }
0x1198   : > { %v1549_v17 = vmul.f32 0.1, %v1429_v4  ;;  %v1566_v11 = vperm.slane %v3278_v29, 0 }
0x119a   : > { %v3246_v33 = vsub.f32 %v3243_v0, %v1549_v17 }
0x119f   : > { %v1431_v14 = vpop.f32.mrf.mxu1 }
0x11a0   : > { %v1550_v15 = vmul.f32 0.1, %v1431_v14 }
0x11a2   : > { %v3254_v35 = vsub.f32 %v3251_v22, %v1550_v15 }
0x11a4   : > { %v1563_v39 = vpack.c.bf16 %v3254_v35, %v3246_v33 }
0x11a6   : > { %v1683_v45 = vsel %vm403_vm3, %v1563_v39, 0 }
0x11a7   : > { %v1434_v44 = vpop.f32.mrf.mxu1 }
0x11a8   : > { %v1551_v57 = vmul.f32 0.1, %v1434_v44 }
0x11aa   : > { %v3238_v27 = vsub.f32 %v3235_v1, %v1551_v57  ;;  %v1439_v57 = vsel %vm359_vm2, %v3112_v31, 0.0 }
0x11ab   : > { %v1440_v17 = vrot.slane %v1439_v57, 4 }
0x11ad   : > { %v1441_v15 = vadd.f32 %v1440_v17, %v1439_v57 }
0x11af   : > { %v1436_v34 = vpop.f32.mrf.mxu1 }
0x11b0   : > { %v1552_v9 = vmul.f32 0.1, %v1436_v34  ;;  %v1442_v34 = vrot.slane %v1441_v15, 2 }
0x11b2   : > { %v3262_v2 = vsub.f32 %v3259_v19, %v1552_v9  ;;  %v1443_v9 = vadd.f32 %v1442_v34, %v1441_v15 }
0x11b4   : > { %v1564_v59 = vpack.c.bf16 %v3262_v2, %v3238_v27 }
0x11b6   : > { %1595 = vmatpush.bf16.msra.mxu3 %v1564_v59  ;;  %v1686_v56 = vsel %vm403_vm3, %v1564_v59, 0  ;;  %v1444_v59 = vrot.slane %v1443_v9, 1 }
0x11b7   : > { %1694 = vmatpush.bf16.xpose.msrb.mxu0 %v1686_v56 }
0x11b8   : > { %v1445_v56 = vadd.f32 %v1444_v59, %v1443_v9 }
0x11ba   : > { %1596 = vmatpush.bf16.msra.mxu3 %v1563_v39  ;;  %v1557_v39 = vmul.f32 0.1, %v1445_v56 }
0x11bf   : > { %1695 = vmatpush.bf16.xpose.msrb.mxu0 %v1683_v45  ;;  %v3290_v45 = vld [vmem:[%s3510_s5] sm:$0x1] }
0x11c0   : > { %v3293_v63 = vsub.f32 %v3290_v45, %v1557_v39 }
0x11c2   : > { %v1584_v51 = vperm.slane %v3293_v63, 0 }
0x11e1   : > { %v1577_v10 = vpop.f32.mrf.mxu0 }
0x11e2   : > { %v1578_v23 = vadd.f32 %v1577_v10, %v1566_v11 }
0x11e4   : > { %v1581_v4 = vmax.f32 %v1578_v23, 0.0  ;;  %vm1701_vm5 = vcmp.gt.f32.partialorder %v1578_v23, 0.0 }
0x11e6   : > { %v3281_v14 = vpack.c.bf16 %v1581_v4, %v1581_v4 }
0x11e8   : > { %2465 = vmatmul.msk.bf16.vlgmr.msra.gmra.mxu3 %vm342_vm1, %v3281_v14 }
0x11e9   : > { %v1579_v44 = vpop.f32.mrf.mxu0 }
0x126b   : > { %v1598_v6 = vpop.f32.mrf.mxu3 }
0x126c   : > { %v1599_v53 = vadd.f32 %v1598_v6, %v1584_v51 }
0x126e   : > { %v1602_v31 = vsel %vm359_vm2, %v1599_v53, -inf }
0x126f   : > { %1603 = vmax.xlane.f32.xlu1 %v1602_v31 }
0x1273   : > { %v1600_v55 = vpop.f32.mrf.mxu3 }
0x12e2   : > { %v1604_v46 = vpop.xlane.xlu1 %1603 }
0x12e3   : > { %v1605_v24 = vsub.f32 %v1599_v53, %v1604_v46 }
0x12e5   : > { %v1606_v20 = vmul.f32 1.442695, %v1605_v24 }
0x12e7   : > { %2539 = vpow2.f32 %v1606_v20 }
0x12ed   : > { %v2540_v11 = vpop.eup %2539 }
0x12ee   : > { %v1608_v10 = vsel %vm359_vm2, %v2540_v11, 0.0 }
0x12ef   : > { %1609 = vadd.xlane.f32.xlu0 %v1608_v10 }
0x1362   : > { %v1610_v4 = vpop.xlane.xlu0 %1609 }
0x1363   : > { %2541 = vrcp.f32 %v1610_v4  ;;  %v1622_v15 = vand.u32 2147483648, %v1610_v4  ;;  %v1620_v9 = vand.u32 2147483647, %v1610_v4  ;;  %vm1616_vm14 = vweird.f32 %v1610_v4 }
0x1365   : > { %v1623_v56 = vor.u32 1.1754944e-38, %v1622_v15  ;;  %vm1621_vm4 = vcmp.eq.f32.partialorder %v1620_v9, 8.507059e+37 }
0x1369   : > { %v2542_v44 = vpop.eup %2541 }
0x136a   : > { %v1612_v57 = vmul.f32 %v2542_v44, %v1610_v4  ;;  %vm1617_vm13 = vweird.f32 %v2542_v44 }
0x136b   : > { %vm1618_vm15 = vmor %vm1616_vm14, %vm1617_vm13 }
0x136c   : > { %v1613_v17 = vsub.f32 1.0, %v1612_v57 }
0x136e   : > { %v1614_v34 = vmul.f32 %v2542_v44, %v1613_v17 }
0x1370   : > { %v1615_v59 = vadd.f32 %v2542_v44, %v1614_v34 }
0x1372   : > { %v1619_v39 = vsel %vm1618_vm15, %v2542_v44, %v1615_v59 }
0x1373   : > { %v1624_v51 = vsel %vm1621_vm4, %v1623_v56, %v1619_v39 }
0x1374   : > { %v1625_v6 = vmul.f32 %v2540_v11, %v1624_v51 }
0x1376   : > { %v1626_v53 = vsub.f32 %v1625_v6, %v2752_v54 }
0x1378   : > { %v3299_v31 = vmul.f32 0.2, %v1626_v53 }
0x137a   : > { %v1628_v55 = vpack.c.bf16 %v3299_v31, %v3299_v31 }
0x137c   : > { %2468 = vmatmul.msk.bf16.vlgmr.msrb.gmra.mxu0 %vm403_vm3, %v1628_v55  ;;  %v1652_v46 = vand.u32 %v1628_v55, %v2757_v60 }
0x137e   : > { %1661 = vmatpush.bf16.msra.mxu1 %v1652_v46 }
0x13f9   : > { %v1697_v24 = vpop.f32.mrf.mxu0 }
0x13fa   : > { %v1702_v20 = vsel %vm1701_vm5, %v1697_v24, 0.0 }
0x13fb   : > { %v1703_v10 = vpack.c.bf16 %v1702_v20, %v1702_v20 }
0x13fd   : > { %v1705_v4 = vand.u32 %v1703_v10, %v2757_v60 }
0x13ff   : > { %1714 = vmatpush.bf16.msrb.mxu3 %v1705_v4 }
0x1401   : > { %v1699_v11 = vpop.f32.mrf.mxu0 }
0x1402   : > { %2469 = vmatmul.msk.bf16.vlgmr.msrb.gmra.mxu3 %vm403_vm3, %v3124_v21 }
0x1412   : > { %2470 = vmatmul.msk.bf16.gmra.mxu3 %vm403_vm3, %v3130_v26 }
0x1422   : > { %2471 = vmatmul.msk.bf16.gmra.mxu3 %vm403_vm3, %v3134_v41 }
0x1432   : > { %2472 = vmatmul.msk.bf16.gmra.mxu3 %vm403_vm3, %v3138_v42 }
0x1485   : > { %v1716_v44 = vpop.f32.mrf.mxu3 }
0x1486   : > { %v1743_v11 = vmul.f32 0.1, %v1716_v44 }
0x148d   : > { %v1718_v23 = vpop.f32.mrf.mxu3 }
0x148e   : > { %v1744_v24 = vmul.f32 0.1, %v1718_v23 }
0x1495   : > { %v1721_v57 = vpop.f32.mrf.mxu3 }
0x1496   : > { %v1745_v55 = vmul.f32 0.1, %v1721_v57  ;;  %v2454_v57 = vld [vmem:[%s2904_s18 + $0x28] sm:$0x7f] }
0x149d   : > { %v1723_v17 = vpop.f32.mrf.mxu3 }
0x149e   : > { %v1746_v41 = vmul.f32 0.1, %v1723_v17 }
0x14a0   : > { %v1754_v10 = vsub.f32 %v3191_v58, %v1746_v41  ;;  %v2477_v58 = vld [vmem:[%s2665_s15 + $0x18] sm:$0x1f] }
0x14a5   : > { %v1726_v15 = vpop.f32.mrf.mxu3 }
0x14a6   : > { %v1747_v51 = vmul.f32 0.1, %v1726_v15  ;;  %v2453_v15 = vld [vmem:[%s2904_s18 + $0x20] sm:$0xff] }
0x14a8   : > { %v1755_v46 = vsub.f32 %v3183_v7, %v1747_v51  ;;  %v1333_v7 = vpack.c.bf16 %v2454_v57, %v2453_v15 }
0x14ad   : > { %v1728_v34 = vpop.f32.mrf.mxu3 }
0x14ae   : > { %v1748_v39 = vmul.f32 0.1, %v1728_v34 }
0x14b0   : > { %v1756_v42 = vsub.f32 %v3173_v47, %v1748_v39  ;;  %v1751_v47 = vsub.f32 %v3219_v50, %v1743_v11 }
0x14b2   : > { %v1773_v4 = vpack.c.bf16 %v1756_v42, %v1755_v46 }
0x14b5   : > { %v1731_v9 = vpop.f32.mrf.mxu3 }
0x14b6   : > { %v1749_v59 = vmul.f32 0.1, %v1731_v9 }
0x14b8   : > { %v1757_v26 = vsub.f32 %v3157_v12, %v1749_v59  ;;  %v1753_v12 = vsub.f32 %v3201_v61, %v1745_v55  ;;  %v3331_v61 = vpack.c.bf16 %v2477_v58, %v2477_v58 }
0x14ba   : > { %v1772_v17 = vpack.c.bf16 %v1754_v10, %v1753_v12 }
0x14bd   : > { %v1733_v56 = vpop.f32.mrf.mxu3 }
0x14be   : > { %v1750_v21 = vmul.f32 0.1, %v1733_v56 }
0x14c0   : > { %v1758_v6 = vsub.f32 %v3165_v40, %v1750_v21  ;;  %v1752_v40 = vsub.f32 %v3209_v28, %v1744_v24 }
0x14c2   : > { %v1774_v53 = vpack.c.bf16 %v1758_v6, %v1757_v26  ;;  %v1771_v34 = vpack.c.bf16 %v1752_v40, %v1751_v47 }
0x14c4   : > { %1785 = vmatpush.bf16.msra.mxu0 %v1774_v53 }
0x14c8   : > { %1786 = vmatpush.bf16.msra.mxu0 %v1773_v4 }
0x14cc   : > { %1787 = vmatpush.bf16.msra.mxu0 %v1772_v17 }
0x14d0   : > { %1788 = vmatpush.bf16.msra.mxu0 %v1771_v34 }
0x14d3   : > { %2473 = vmatmul.msk.bf16.vlgmr.msra.gmra.mxu0 %vm320_vm0, %v1333_v7 }
0x14d4   : > { %1839 = vmatpush.bf16.msrb.mxu0 %v2637_v3  ;;  %v1736_v3 = vsel %vm527_vm12, %v1702_v20, 0.0 }
0x14d5   : > { %v1737_v28 = vrot.slane %v1736_v3, 4 }
0x14d7   : > { %v1738_v50 = vadd.f32 %v1737_v28, %v1736_v3 }
0x14d8   : > { %1840 = vmatpush.bf16.msrb.mxu0 %v2647_v5 }
0x14d9   : > { %v1739_v44 = vrot.slane %v1738_v50, 2 }
0x14db   : > { %v1740_v5 = vadd.f32 %v1739_v44, %v1738_v50 }
0x14dc   : > { %1841 = vmatpush.bf16.msrb.mxu0 %v2670_v8 }
0x14dd   : > { %v1741_v23 = vrot.slane %v1740_v5, 1 }
0x14df   : > { %v1742_v8 = vadd.f32 %v1741_v23, %v1740_v5 }
0x14e0   : > { %1842 = vmatpush.bf16.msrb.mxu0 %v2689_v13 }
0x14e1   : > { %v1759_v9 = vmul.f32 0.1, %v1742_v8 }
0x14e3   : > { %2480 = vmatmul.msk.bf16.vlgmr.msrb.gmra.mxu0 %vm320_vm0, %v3331_v61  ;;  %v1760_v13 = vsub.f32 %v3278_v29, %v1759_v9 }
0x14e4   : > { %1952 = vmatpush.bf16.xpose.msra.mxu0 %v2744_v36 }
0x14e5   : > { %v1776_v59 = vperm.slane %v1760_v13, 0 }
0x14ec   : > { %1953 = vmatpush.bf16.xpose.msra.mxu0 %v2749_v37 }
0x1550   : > { %v1790_v36 = vpop.f32.mrf.mxu0 }
0x1551   : > { %v1791_v56 = vadd.f32 %v1790_v36, %v1776_v59 }
0x1553   : > { %v1795_v51 = vmax.f32 %v1791_v56, 0.0 }
0x1558   : > { %v1792_v39 = vpop.f32.mrf.mxu0 }
0x1559   : > { %v1793_v21 = vadd.f32 %v1792_v39, %v1776_v59 }
0x155b   : > { %v1796_v26 = vmax.f32 %v1793_v21, 0.0 }
0x155d   : > { %v3338_v6 = vpack.c.bf16 %v1796_v26, %v1795_v51 }
0x1560   : > { %v1844_v37 = vpop.f32.mrf.mxu0 }
0x1561   : > { %v1845_v20 = vadd.f32 %v3097_v32, %v1844_v37 }
0x1563   : > { %v1848_v41 = vmax.f32 %v1845_v20, 0.0  ;;  %vm1959_vm11 = vcmp.gt.f32.partialorder %v1845_v20, 0.0 }
0x1565   : > { %v1849_v42 = vpack.c.bf16 %v1848_v41, %v1848_v41 }
0x1567   : > { %1893 = vxpose.xlu0.c.b16.start.end [1/1] (short) (narrow) %v1849_v42, 32  ;;  %2481 = vmatmul.msk.bf16.vlgmr.msrb.gmra.mxu2 %vm342_vm1, %v1849_v42 }
0x1568   : > { %v1846_v53 = vpop.f32.mrf.mxu0 }
0x15ea   : > { %v1862_v55 = vpop.f32.mrf.mxu2 }
0x15eb   : > { %v1863_v29 = vadd.f32 %v3104_v48, %v1862_v55 }
0x15ed   : > { %v1866_v46 = vsel %vm359_vm2, %v1863_v29, -inf }
0x15ee   : > { %1867 = vmax.xlane.f32.xlu2 %v1866_v46 }
0x15f2   : > { %v1864_v24 = vpop.f32.mrf.mxu2 }
0x1617   : > { %1962 = vxpose.xlu2.c.b16.start.end [1/1] (short) (narrow) %v3331_v61, 64 }
0x1661   : > { %v1868_v10 = vpop.xlane.xlu2 %1867 }
0x1662   : > { %v1869_v4 = vsub.f32 %v1863_v29, %v1868_v10 }
0x1664   : > { %v1870_v11 = vmul.f32 1.442695, %v1869_v4 }
0x1666   : > { %2543 = vpow2.f32 %v1870_v11 }
0x166c   : > { %v2544_v32 = vpop.eup %2543 }
0x166d   : > { %v1872_v12 = vsel %vm359_vm2, %v2544_v32, 0.0 }
0x166e   : > { %1873 = vadd.xlane.f32.xlu1 %v1872_v12 }
0x16a8   : > { %1629 = vxpose.xlu1.c.b16.start.end [1/1] (short) (narrow) %v3281_v14, 32 }
0x16b8   : > { %v3360_v56 = vpop.trf.xlu2 }
0x16c8   : > { %v3364_v21 = vpop.trf.xlu2 }
0x16d8   : > { %v3368_v51 = vpop.trf.xlu2 }
0x16e1   : > { %v1874_v40 = vpop.xlane.xlu1 %1873 }
0x16e2   : > { %2545 = vrcp.f32 %v1874_v40  ;;  %v1886_v15 = vand.u32 2147483648, %v1874_v40  ;;  %v1884_v34 = vand.u32 2147483647, %v1874_v40  ;;  %vm1880_vm8 = vweird.f32 %v1874_v40 }
0x16e4   : > { %v1887_v58 = vor.u32 1.1754944e-38, %v1886_v15  ;;  %vm1885_vm10 = vcmp.eq.f32.partialorder %v1884_v34, 8.507059e+37 }
0x16e8   : > { %v2546_v17 = vpop.eup %2545  ;;  %v3372_v26 = vpop.trf.xlu2 }
0x16e9   : > { %v1876_v48 = vmul.f32 %v2546_v17, %v1874_v40  ;;  %vm1881_vm7 = vweird.f32 %v2546_v17 }
0x16ea   : > { %vm1882_vm9 = vmor %vm1880_vm8, %vm1881_vm7 }
0x16eb   : > { %v1877_v47 = vsub.f32 1.0, %v1876_v48  ;;  %v1901_v48 = vpop.trf.xlu0 }
0x16ed   : > { %v1878_v57 = vmul.f32 %v2546_v17, %v1877_v47 }
0x16ef   : > { %v1879_v7 = vadd.f32 %v2546_v17, %v1878_v57 }
0x16f1   : > { %v1883_v3 = vsel %vm1882_vm9, %v2546_v17, %v1879_v7 }
0x16f2   : > { %v1888_v28 = vsel %vm1885_vm10, %v1887_v58, %v1883_v3 }
0x16f3   : > { %v1889_v50 = vmul.f32 %v2544_v32, %v1888_v28  ;;  %v1902_v47 = vpop.trf.xlu0 }
0x16f5   : > { %v1890_v44 = vsub.f32 %v1889_v50, %v2752_v54 }
0x16f7   : > { %v3348_v14 = vmul.f32 0.2, %v1890_v44 }
0x16f9   : > { %v1892_v5 = vpack.c.bf16 %v3348_v14, %v3348_v14 }
0x16fb   : > { %2484 = vmatmul.msk.bf16.vlgmr.msra.gmra.mxu0 %vm403_vm3, %v1892_v5  ;;  %v1916_v40 = vand.u32 %v1892_v5, %v2757_v60 }
0x1754   : > { %v1637_v23 = vpop.trf.xlu1 }
0x1755   : > { %2466 = vmatmul.msk.bf16.vlgmr.msra.gmra.mxu1 %vm403_vm3, %v1637_v23 }
0x1764   : > { %v1638_v8 = vpop.trf.xlu1 }
0x1765   : > { %2467 = vmatmul.msk.bf16.gmra.mxu1 %vm403_vm3, %v1638_v8 }
0x1778   : > { %v1955_v9 = vpop.f32.mrf.mxu0 }
0x1779   : > { %v3355_v13 = vsel %vm1959_vm11, %v1955_v9, 0.0 }
0x177a   : > { %v1961_v59 = vpack.c.bf16 %v3355_v13, %v3355_v13 }
0x177c   : > { %v1991_v36 = vand.u32 %v1961_v59, %v2757_v60 }
0x177e   : > { %2000 = vmatpush.bf16.msra.mxu2 %v1991_v36 }
0x1780   : > { %v1957_v39 = vpop.f32.mrf.mxu0 }
0x1781   : > { %2485 = vmatmul.msk.bf16.vlgmr.msra.gmra.mxu2 %vm403_vm3, %v3360_v56 }
0x1791   : > { %2486 = vmatmul.msk.bf16.gmra.mxu2 %vm403_vm3, %v3364_v21 }
0x17a1   : > { %2487 = vmatmul.msk.bf16.gmra.mxu2 %vm403_vm3, %v3368_v51 }
0x17b1   : > { %2488 = vmatmul.msk.bf16.gmra.mxu2 %vm403_vm3, %v3372_v26 }
0x17d2   : > { %v1663_v37 = vpop.f32.mrf.mxu1 }
0x17d3   : > { %v1761_v46 = vmul.f32 0.1, %v1663_v37 }
0x17d5   : > { %v1765_v32 = vsub.f32 %v3246_v33, %v1761_v46 }
0x17da   : > { %v1665_v20 = vpop.f32.mrf.mxu1 }
0x17db   : > { %v1762_v55 = vmul.f32 0.1, %v1665_v20 }
0x17dd   : > { %v1766_v4 = vsub.f32 %v3254_v35, %v1762_v55 }
0x17df   : > { %v1798_v12 = vpack.c.bf16 %v1766_v4, %v1765_v32 }
0x17e2   : > { %v1668_v41 = vpop.f32.mrf.mxu1 }
0x17e3   : > { %v1763_v42 = vmul.f32 0.1, %v1668_v41 }
0x17e5   : > { %v1767_v24 = vsub.f32 %v3238_v27, %v1763_v42 }
0x17ea   : > { %v1670_v53 = vpop.f32.mrf.mxu1 }
0x17eb   : > { %v1764_v29 = vmul.f32 0.1, %v1670_v53 }
0x17ed   : > { %v1768_v10 = vsub.f32 %v3262_v2, %v1764_v29 }
0x17ef   : > { %v1799_v11 = vpack.c.bf16 %v1768_v10, %v1767_v24 }
0x17f1   : > { %1812 = vmatpush.bf16.msrb.mxu1 %v1799_v11 }
0x17f5   : > { %1813 = vmatpush.bf16.msrb.mxu1 %v1798_v12 }
0x17f8   : > { %2474 = vmatmul.msk.bf16.vlgmr.msrb.gmra.mxu1 %vm342_vm1, %v3338_v6 }
0x17f9   : > { %1925 = vmatpush.bf16.msra.mxu1 %v1916_v40 }
0x1804   : > { %v2002_v17 = vpop.f32.mrf.mxu2 }
0x1808   : > { %2482 = vmatmul.msk.bf16.vlgmr.msra.gmra.mxu1 %vm403_vm3, %v1901_v48 }
0x180c   : > { %v2004_v27 = vpop.f32.mrf.mxu2 }
0x180d   : > { %v2030_v59 = vmul.f32 0.1, %v2004_v27 }
0x1814   : > { %v2007_v2 = vpop.f32.mrf.mxu2 }
0x1815   : > { %v2031_v8 = vmul.f32 0.1, %v2007_v2 }
0x1817   : > { %v3405_v39 = vsub.f32 %v3198_v16, %v2031_v8  ;;  %v1673_v16 = vsel %vm359_vm2, %v3299_v31, 0.0 }
0x1818   : > { %2483 = vmatmul.msk.bf16.gmra.mxu1 %vm403_vm3, %v1902_v47 }
0x181c   : > { %v2009_v35 = vpop.f32.mrf.mxu2 }
0x181d   : > { %v2032_v44 = vmul.f32 0.1, %v2009_v35 }
0x181f   : > { %v3400_v36 = vsub.f32 %v3188_v38, %v2032_v44 }
0x1824   : > { %v2012_v33 = vpop.f32.mrf.mxu2 }
0x1825   : > { %v2033_v28 = vmul.f32 0.1, %v2012_v33 }
0x1827   : > { %v3397_v9 = vsub.f32 %v3180_v52, %v2033_v28  ;;  %v2058_v52 = vpack.c.bf16 %v3400_v36, %v3405_v39 }
0x182c   : > { %v2014_v15 = vpop.f32.mrf.mxu2 }
0x182d   : > { %v2034_v58 = vmul.f32 0.1, %v2014_v15 }
0x182f   : > { %v3392_v5 = vsub.f32 %v3170_v62, %v2034_v58  ;;  %v3408_v62 = vsub.f32 %v3206_v30, %v2030_v59  ;;  %v1674_v30 = vrot.slane %v1673_v16, 4 }
0x1831   : > { %v1675_v20 = vadd.f32 %v1674_v30, %v1673_v16  ;;  %v1937_v16 = vsel %vm359_vm2, %v3348_v14, 0.0 }
0x1832   : > { %v1938_v30 = vrot.slane %v1937_v16, 4 }
0x1833   : > { %v1676_v41 = vrot.slane %v1675_v20, 2 }
0x1834   : > { %v2017_v57 = vpop.f32.mrf.mxu2 }
0x1835   : > { %v2035_v34 = vmul.f32 0.1, %v2017_v57  ;;  %v1677_v42 = vadd.f32 %v1676_v41, %v1675_v20  ;;  %v1939_v20 = vadd.f32 %v1938_v30, %v1937_v16 }
0x1837   : > { %v3386_v6 = vsub.f32 %v3154_v49, %v2035_v34  ;;  %v2059_v49 = vpack.c.bf16 %v3392_v5, %v3397_v9  ;;  %v1678_v53 = vrot.slane %v1677_v42, 1  ;;  %v1940_v41 = vrot.slane %v1939_v20, 2 }
0x183c   : > { %v2019_v7 = vpop.f32.mrf.mxu2 }
0x183d   : > { %v2036_v3 = vmul.f32 0.1, %v2019_v7 }
0x183f   : > { %v3389_v50 = vsub.f32 %v3162_v18, %v2036_v3  ;;  %v2029_v18 = vmul.f32 0.1, %v2002_v17 }
0x1841   : > { %v2060_v23 = vpack.c.bf16 %v3389_v50, %v3386_v6  ;;  %v3413_v37 = vsub.f32 %v3216_v43, %v2029_v18  ;;  %v1679_v43 = vadd.f32 %v1678_v53, %v1677_v42  ;;  %v1941_v42 = vadd.f32 %v1940_v41, %v1939_v20 }
0x1843   : > { %2070 = vmatpush.bf16.msrb.mxu0 %v2060_v23  ;;  %v2057_v38 = vpack.c.bf16 %v3408_v62, %v3413_v37  ;;  %v1769_v55 = vmul.f32 0.1, %v1679_v43  ;;  %v1942_v53 = vrot.slane %v1941_v42, 1 }
0x1845   : > { %v1770_v29 = vsub.f32 %v3293_v63, %v1769_v55 }
0x1847   : > { %2071 = vmatpush.bf16.msrb.mxu0 %v2059_v49  ;;  %v1801_v46 = vperm.slane %v1770_v29, 0 }
0x184b   : > { %2072 = vmatpush.bf16.msrb.mxu0 %v2058_v52 }
0x184f   : > { %2073 = vmatpush.bf16.msrb.mxu0 %v2057_v38 }
0x1852   : > { %2489 = vmatmul.msk.bf16.vlgmr.msrb.gmra.mxu0 %vm320_vm0, %v3331_v61 }
0x1875   : > { %v1815_v24 = vpop.f32.mrf.mxu1 }
0x1876   : > { %v1816_v10 = vadd.f32 %v1815_v24, %v1801_v46 }
0x1878   : > { %v1820_v4 = vmul.f32 2.0, %v1816_v10 }
0x187a   : > { %2475 = vst.msk [vmem:[%s2939_s22 + $0x20] sm:$0xff] %vm403_vm3, %v1820_v4 }
0x187d   : > { %v1817_v31 = vpop.f32.mrf.mxu1 }
0x187e   : > { %v1818_v11 = vadd.f32 %v1817_v31, %v1801_v46 }
0x1880   : > { %v1821_v32 = vmul.f32 2.0, %v1818_v11 }
0x1882   : > { %2476 = vst.msk [vmem:[%s2939_s22 + $0x28] sm:$0x7f] %vm827_vm6, %v1821_v32 }
0x1885   : > { %v1927_v61 = vpop.f32.mrf.mxu1 }
0x1886   : > { %v2047_v48 = vmul.f32 0.1, %v1927_v61 }
0x1888   : > { %v3430_v35 = vsub.f32 %v3243_v0, %v2047_v48 }
0x188d   : > { %v1929_v12 = vpop.f32.mrf.mxu1 }
0x188e   : > { %v2048_v27 = vmul.f32 0.1, %v1929_v12 }
0x1890   : > { %v3433_v33 = vsub.f32 %v3251_v22, %v2048_v27  ;;  %v2022_v22 = vsel %vm527_vm12, %v3355_v13, 0.0 }
0x1891   : > { %v2023_v7 = vrot.slane %v2022_v22, 4 }
0x1895   : > { %v1932_v40 = vpop.f32.mrf.mxu1 }
0x1896   : > { %v2049_v17 = vmul.f32 0.1, %v1932_v40 }
0x1898   : > { %v3427_v63 = vsub.f32 %v3235_v1, %v2049_v17  ;;  %v2061_v1 = vpack.c.bf16 %v3433_v33, %v3430_v35 }
0x189a   : > { %v2181_v0 = vsel %vm403_vm3, %v2061_v1, 0 }
0x189d   : > { %v1934_v2 = vpop.f32.mrf.mxu1 }
0x189e   : > { %v2050_v47 = vmul.f32 0.1, %v1934_v2 }
0x18a0   : > { %v3436_v15 = vsub.f32 %v3259_v19, %v2050_v47  ;;  %v2024_v19 = vadd.f32 %v2023_v7, %v2022_v22 }
0x18a2   : > { %v2062_v57 = vpack.c.bf16 %v3436_v15, %v3427_v63  ;;  %v2025_v58 = vrot.slane %v2024_v19, 2 }
0x18a4   : > { %2093 = vmatpush.bf16.msra.mxu3 %v2062_v57  ;;  %v2184_v34 = vsel %vm403_vm3, %v2062_v57, 0  ;;  %v2026_v3 = vadd.f32 %v2025_v58, %v2024_v19 }
0x18a5   : > { %2192 = vmatpush.bf16.xpose.msra.mxu0 %v2184_v34 }
0x18a6   : > { %v2027_v28 = vrot.slane %v2026_v3, 1 }
0x18a8   : > { %2094 = vmatpush.bf16.msra.mxu3 %v2061_v1  ;;  %v2028_v44 = vadd.f32 %v2027_v28, %v2026_v3 }
0x18aa   : > { %v2045_v23 = vmul.f32 0.1, %v2028_v44 }
0x18ac   : > { %v3447_v8 = vsub.f32 %v3275_v25, %v2045_v23  ;;  %v1943_v25 = vadd.f32 %v1942_v53, %v1941_v42 }
0x18ad   : > { %2193 = vmatpush.bf16.xpose.msra.mxu0 %v2181_v0 }
0x18ae   : > { %v2064_v59 = vperm.slane %v3447_v8, 0  ;;  %v2055_v43 = vmul.f32 0.1, %v1943_v25 }
0x18b0   : > { %v3454_v55 = vsub.f32 %v3290_v45, %v2055_v43 }
0x18b2   : > { %v2082_v29 = vperm.slane %v3454_v55, 0 }
0x18cf   : > { %v2075_v49 = vpop.f32.mrf.mxu0 }
0x18d0   : > { %v2076_v18 = vadd.f32 %v2075_v49, %v2064_v59 }
0x18d2   : > { %v2079_v52 = vmax.f32 %v2076_v18, 0.0  ;;  %vm2199_vm5 = vcmp.gt.f32.partialorder %v2076_v18, 0.0 }
0x18d4   : > { %v2080_v38 = vpack.c.bf16 %v2079_v52, %v2079_v52 }
0x18d6   : > { %2127 = vxpose.xlu0.c.b16.start.end [1/1] (short) (narrow) %v2080_v38, 32  ;;  %2490 = vmatmul.msk.bf16.vlgmr.msra.gmra.mxu3 %vm342_vm1, %v2080_v38 }
0x18d7   : > { %v2077_v13 = vpop.f32.mrf.mxu0 }
0x1959   : > { %v2096_v46 = vpop.f32.mrf.mxu3 }
0x195a   : > { %v2097_v24 = vadd.f32 %v2096_v46, %v2082_v29 }
0x195c   : > { %v2100_v10 = vsel %vm359_vm2, %v2097_v24, -inf }
0x195d   : > { %2101 = vmax.xlane.f32.xlu1 %v2100_v10 }
0x1961   : > { %v2098_v4 = vpop.f32.mrf.mxu3 }
0x1982   : > { %v2135_v3 = vpop.trf.xlu0 }
0x1992   : > { %v2136_v28 = vpop.trf.xlu0 }
0x19d0   : > { %v2102_v31 = vpop.xlane.xlu1 %2101 }
0x19d1   : > { %v2103_v14 = vsub.f32 %v2097_v24, %v2102_v31 }
0x19d3   : > { %v2104_v11 = vmul.f32 1.442695, %v2103_v14 }
0x19d5   : > { %2547 = vpow2.f32 %v2104_v11 }
0x19db   : > { %v2548_v32 = vpop.eup %2547 }
0x19dc   : > { %v2106_v61 = vsel %vm359_vm2, %v2548_v32, 0.0 }
0x19dd   : > { %2107 = vadd.xlane.f32.xlu2 %v2106_v61 }
0x1a50   : > { %v2108_v12 = vpop.xlane.xlu2 %2107 }
0x1a51   : > { %2549 = vrcp.f32 %v2108_v12  ;;  %v2120_v48 = vand.u32 2147483648, %v2108_v12  ;;  %v2118_v2 = vand.u32 2147483647, %v2108_v12  ;;  %vm2114_vm14 = vweird.f32 %v2108_v12 }
0x1a53   : > { %v2121_v57 = vor.u32 1.1754944e-38, %v2120_v48  ;;  %vm2119_vm4 = vcmp.eq.f32.partialorder %v2118_v2, 8.507059e+37 }
0x1a57   : > { %v2550_v45 = vpop.eup %2549 }
0x1a58   : > { %v2110_v40 = vmul.f32 %v2550_v45, %v2108_v12  ;;  %vm2115_vm13 = vweird.f32 %v2550_v45 }
0x1a59   : > { %vm2116_vm15 = vmor %vm2114_vm14, %vm2115_vm13 }
0x1a5a   : > { %v2111_v17 = vsub.f32 1.0, %v2110_v40 }
0x1a5c   : > { %v2112_v27 = vmul.f32 %v2550_v45, %v2111_v17 }
0x1a5e   : > { %v2113_v47 = vadd.f32 %v2550_v45, %v2112_v27 }
0x1a60   : > { %v2117_v34 = vsel %vm2116_vm15, %v2550_v45, %v2113_v47 }
0x1a61   : > { %v2122_v1 = vsel %vm2119_vm4, %v2121_v57, %v2117_v34  ;;  %v2479_v57 = vld [vmem:[%s2904_s18 + $0x38] sm:$0x7f] }
0x1a62   : > { %v2123_v0 = vmul.f32 %v2548_v32, %v2122_v1 }
0x1a64   : > { %v2124_v22 = vsub.f32 %v2123_v0, %v2752_v54 }
0x1a66   : > { %v3460_v7 = vmul.f32 0.2, %v2124_v22 }
0x1a68   : > { %v2126_v19 = vpack.c.bf16 %v3460_v7, %v3460_v7 }
0x1a6a   : > { %2493 = vmatmul.msk.bf16.vlgmr.msra.gmra.mxu0 %vm403_vm3, %v2126_v19  ;;  %v2150_v58 = vand.u32 %v2126_v19, %v2757_v60 }
0x1a6c   : > { %2159 = vmatpush.bf16.msrb.mxu1 %v2150_v58 }
0x1a6f   : > { %2491 = vmatmul.msk.bf16.vlgmr.msrb.gmra.mxu1 %vm403_vm3, %v2135_v3 }
0x1a7f   : > { %2492 = vmatmul.msk.bf16.gmra.mxu1 %vm403_vm3, %v2136_v28 }
0x1ae7   : > { %v2195_v44 = vpop.f32.mrf.mxu0 }
0x1ae8   : > { %v2200_v23 = vsel %vm2199_vm5, %v2195_v44, 0.0 }
0x1ae9   : > { %v2201_v54 = vpack.c.bf16 %v2200_v23, %v2200_v23 }
0x1aeb   : > { %v2203_v59 = vand.u32 %v2201_v54, %v2757_v60 }
0x1aec   : > { %v2161_v49 = vpop.f32.mrf.mxu1 }
0x1aed   : > { %2212 = vmatpush.bf16.msrb.mxu3 %v2203_v59  ;;  %v2259_v18 = vmul.f32 0.1, %v2161_v49 }
0x1aef   : > { %v2197_v52 = vpop.f32.mrf.mxu0  ;;  %v2263_v43 = vsub.f32 %v3430_v35, %v2259_v18 }
0x1af0   : > { %2494 = vmatmul.msk.bf16.vlgmr.msrb.gmra.mxu3 %vm403_vm3, %v3360_v56 }
0x1af4   : > { %v2163_v38 = vpop.f32.mrf.mxu1 }
0x1af5   : > { %v2260_v20 = vmul.f32 0.1, %v2163_v38 }
0x1af7   : > { %v2264_v53 = vsub.f32 %v3433_v33, %v2260_v20 }
0x1af9   : > { %v2296_v56 = vpack.c.bf16 %v2264_v53, %v2263_v43 }
0x1afc   : > { %v2166_v13 = vpop.f32.mrf.mxu1 }
0x1afd   : > { %v2261_v16 = vmul.f32 0.1, %v2166_v13 }
0x1aff   : > { %v2265_v42 = vsub.f32 %v3427_v63, %v2261_v16 }
0x1b00   : > { %2495 = vmatmul.msk.bf16.gmra.mxu3 %vm403_vm3, %v3364_v21 }
0x1b04   : > { %v2168_v30 = vpop.f32.mrf.mxu1 }
0x1b05   : > { %v2262_v41 = vmul.f32 0.1, %v2168_v30 }
0x1b07   : > { %v2266_v60 = vsub.f32 %v3436_v15, %v2262_v41 }
0x1b09   : > { %v2297_v25 = vpack.c.bf16 %v2266_v60, %v2265_v42 }
0x1b0b   : > { %2310 = vmatpush.bf16.msra.mxu1 %v2297_v25 }
0x1b0f   : > { %2311 = vmatpush.bf16.msra.mxu1 %v2296_v56 }
0x1b10   : > { %2496 = vmatmul.msk.bf16.gmra.mxu3 %vm403_vm3, %v3368_v51 }
0x1b20   : > { %2497 = vmatmul.msk.bf16.gmra.mxu3 %vm403_vm3, %v3372_v26 }
0x1b73   : > { %v2214_v21 = vpop.f32.mrf.mxu3 }
0x1b74   : > { %v2241_v27 = vmul.f32 0.1, %v2214_v21 }
0x1b76   : > { %v2249_v47 = vsub.f32 %v3413_v37, %v2241_v27 }
0x1b7b   : > { %v2216_v29 = vpop.f32.mrf.mxu3 }
0x1b7c   : > { %v2242_v40 = vmul.f32 0.1, %v2216_v29 }
0x1b83   : > { %v2219_v46 = vpop.f32.mrf.mxu3 }
0x1b84   : > { %v2243_v12 = vmul.f32 0.1, %v2219_v46 }
0x1b86   : > { %v2251_v2 = vsub.f32 %v3405_v39, %v2243_v12 }
0x1b8b   : > { %v2221_v63 = vpop.f32.mrf.mxu3 }
0x1b8c   : > { %v2244_v51 = vmul.f32 0.1, %v2221_v63 }
0x1b8e   : > { %v2252_v17 = vsub.f32 %v3400_v36, %v2244_v51 }
0x1b93   : > { %v2224_v24 = vpop.f32.mrf.mxu3 }
0x1b94   : > { %v2245_v14 = vmul.f32 0.1, %v2224_v24 }
0x1b96   : > { %v2253_v45 = vsub.f32 %v3397_v9, %v2245_v14  ;;  %v2234_v9 = vsel %vm527_vm12, %v2200_v23, 0.0  ;;  %v2171_v23 = vsel %vm359_vm2, %v3460_v7, 0.0 }
0x1b97   : > { %v2235_v36 = vrot.slane %v2234_v9, 4  ;;  %v2172_v13 = vrot.slane %v2171_v23, 4 }
0x1b99   : > { %v2236_v0 = vadd.f32 %v2235_v36, %v2234_v9  ;;  %v2173_v16 = vadd.f32 %v2172_v13, %v2171_v23 }
0x1b9b   : > { %v2226_v15 = vpop.f32.mrf.mxu3  ;;  %v2237_v22 = vrot.slane %v2236_v0, 2  ;;  %v2174_v30 = vrot.slane %v2173_v16, 2 }
0x1b9c   : > { %v2246_v31 = vmul.f32 0.1, %v2226_v15 }
0x1b9d   : > { %v2238_v39 = vadd.f32 %v2237_v22, %v2236_v0  ;;  %v2175_v20 = vadd.f32 %v2174_v30, %v2173_v16 }
0x1b9e   : > { %v2254_v26 = vsub.f32 %v3392_v5, %v2246_v31  ;;  %v2478_v5 = vld [vmem:[%s2904_s18 + $0x30] sm:$0xff] }
0x1b9f   : > { %v1831_v1 = vpack.c.bf16 %v2479_v57, %v2478_v5  ;;  %v2239_v19 = vrot.slane %v2238_v39, 1  ;;  %v2176_v41 = vrot.slane %v2175_v20, 1 }
0x1ba0   : > { %v2271_v48 = vpack.c.bf16 %v2254_v26, %v2253_v45 }
0x1ba1   : > { %v2240_v58 = vadd.f32 %v2239_v19, %v2238_v39 }
0x1ba3   : > { %v2229_v10 = vpop.f32.mrf.mxu3 }
0x1ba4   : > { %v2247_v33 = vmul.f32 0.1, %v2229_v10 }
0x1ba6   : > { %v2255_v11 = vsub.f32 %v3386_v6, %v2247_v33  ;;  %v2250_v6 = vsub.f32 %v3408_v62, %v2242_v40  ;;  %v2257_v62 = vmul.f32 0.1, %v2240_v58 }
0x1ba8   : > { %v2269_v34 = vpack.c.bf16 %v2250_v6, %v2249_v47  ;;  %v2258_v37 = vsub.f32 %v3447_v8, %v2257_v62  ;;  %v2177_v8 = vadd.f32 %v2176_v41, %v2175_v20 }
0x1baa   : > { %v2274_v28 = vperm.slane %v2258_v37, 0  ;;  %v2267_v18 = vmul.f32 0.1, %v2177_v8 }
0x1bab   : > { %v2231_v4 = vpop.f32.mrf.mxu3 }
0x1bac   : > { %v2248_v35 = vmul.f32 0.1, %v2231_v4  ;;  %v2268_v42 = vsub.f32 %v3454_v55, %v2267_v18 }
0x1bae   : > { %v2256_v32 = vsub.f32 %v3389_v50, %v2248_v35  ;;  %v2270_v50 = vpack.c.bf16 %v2252_v17, %v2251_v2  ;;  %v2299_v60 = vperm.slane %v2268_v42, 0 }
0x1bb0   : > { %v2272_v61 = vpack.c.bf16 %v2256_v32, %v2255_v11 }
0x1bb2   : > { %2283 = vmatpush.bf16.msrb.mxu0 %v2272_v61 }
0x1bb6   : > { %2284 = vmatpush.bf16.msrb.mxu0 %v2271_v48 }
0x1bba   : > { %2285 = vmatpush.bf16.msrb.mxu0 %v2270_v50 }
0x1bbe   : > { %2286 = vmatpush.bf16.msrb.mxu0 %v2269_v34 }
0x1bc1   : > { %2498 = vmatmul.msk.bf16.vlgmr.msrb.gmra.mxu0 %vm320_vm0, %v1831_v1 }
0x1c3e   : > { %v2288_v3 = vpop.f32.mrf.mxu0 }
0x1c3f   : > { %v2289_v44 = vadd.f32 %v2288_v3, %v2274_v28 }
0x1c41   : > { %v2293_v49 = vmax.f32 %v2289_v44, 0.0 }
0x1c46   : > { %v2290_v54 = vpop.f32.mrf.mxu0 }
0x1c47   : > { %v2291_v59 = vadd.f32 %v2290_v54, %v2274_v28 }
0x1c49   : > { %v2294_v52 = vmax.f32 %v2291_v59, 0.0 }
0x1c4b   : > { %v2295_v38 = vpack.c.bf16 %v2294_v52, %v2293_v49 }
0x1c4d   : > { %2499 = vmatmul.msk.bf16.vlgmr.msra.gmra.mxu1 %vm342_vm1, %v2295_v38 }
0x1cca   : > { %v2313_v53 = vpop.f32.mrf.mxu1 }
0x1ccb   : > { %v2314_v25 = vadd.f32 %v2313_v53, %v2299_v60 }
0x1ccd   : > { %v2318_v43 = vmul.f32 2.0, %v2314_v25 }
0x1ccf   : > { %2500 = vst.msk [vmem:[%s2939_s22 + $0x30] sm:$0xff] %vm403_vm3, %v2318_v43 }
0x1cd2   : > { %v2315_v56 = vpop.f32.mrf.mxu1 }
0x1cd3   : > { %v2316_v21 = vadd.f32 %v2315_v56, %v2299_v60 }
0x1cd5   : > { %v2319_v29 = vmul.f32 2.0, %v2316_v21 }
0x1cd7   : > { %2501 = vst.msk [vmem:[%s2939_s22 + $0x38] sm:$0x7f] %vm827_vm6, %v2319_v29 }
0x1cd8 PF: > { %s16_s21 = sadd.s32 1, %s2573_s21  }
0x1cd9   : > { %p13_p4 = scmp.ge.s32.totalorder %s16_s21, 4  }
0x1cdb   :  { %15 = sbr.rel (!%p13_p4) target bundleno = 1 (0x1), region = 86 }

</bundles_post_ra>
